<compile_context>
chip_gen: v7x
topology: tpu7x:2x2x1
jax: 0.10.0
libtpu: 0.0.40
codegen_flags: <defaults>
</compile_context>

<pallas_src>
import functools

import jax
import jax.numpy as jnp
from jax import lax
from jax.experimental import pallas as pl
from jax.experimental.pallas import tpu as pltpu


NETWORK_WIDTH = 1024
LANE = 128
SUBLANE = 8


def _mlp_kernel(x_ref,
                w1_ref, b1_ref,
                w2_ref, b2_ref,
                w21_ref, b21_ref,
                w3_ref, b3_ref,
                q_ref, max_ref, act_ref,
                *, nb_actions):
    """Fused 4-layer MLP + greedy-action / max-Q reduction.

    Weights are bf16 (in, out); biases are f32 (1, out); all matmuls accumulate
    in f32 on the MXU; elementwise work (bias add, ReLU) stays in f32.
    """
    h = x_ref[...].astype(jnp.float32)

    h = jnp.dot(h.astype(jnp.bfloat16), w1_ref[...],
                preferred_element_type=jnp.float32) + b1_ref[...]
    h = jnp.maximum(h, 0.0)

    h = jnp.dot(h.astype(jnp.bfloat16), w2_ref[...],
                preferred_element_type=jnp.float32) + b2_ref[...]
    h = jnp.maximum(h, 0.0)

    h = jnp.dot(h.astype(jnp.bfloat16), w21_ref[...],
                preferred_element_type=jnp.float32) + b21_ref[...]
    h = jnp.maximum(h, 0.0)

    q = jnp.dot(h.astype(jnp.bfloat16), w3_ref[...],
                preferred_element_type=jnp.float32) + b3_ref[...]
    # Lane-dense (TB, A_pad) store; padded action columns are sliced off in the
    # wrapper.
    q_ref[...] = q.astype(q_ref.dtype)

    # Fused DiscreteActionValue accessors: greedy action + max Q.
    col = lax.broadcasted_iota(jnp.int32, q.shape, 1)
    valid = col < nb_actions
    q_masked = jnp.where(valid, q, -jnp.inf)
    mx = jnp.max(q_masked, axis=-1, keepdims=True)
    max_ref[...] = mx.astype(max_ref.dtype)
    # argmax with first-occurrence tie-break (min index among maxima).
    is_max = (q_masked == mx) & valid
    idx = jnp.where(is_max, col, q.shape[-1])
    act_ref[...] = jnp.min(idx, axis=-1, keepdims=True).astype(jnp.int32)


def _round_up(v, m):
    return ((v + m - 1) // m) * m


@functools.partial(jax.jit, static_argnames=("nb_actions",))
def q_function_forward(x, kernel_params, nb_actions):
    """Returns (q_values (B, nb_actions), greedy_actions (B,), max_q (B,))."""
    w1, b1, w2, b2, w21, b21, w3p, b3p = kernel_params
    batch, obs = x.shape
    a_pad = w3p.shape[1]
    width = w1.shape[1]

    # Batch tiling: multiples of 256 (MXU-friendly on v6e/v7x) for large B,
    # otherwise one sublane-aligned tile.
    pad_b = _round_up(batch, SUBLANE)
    if pad_b >= 256:
        tb = 256
        pad_b = _round_up(pad_b, tb)
    else:
        tb = pad_b
    if pad_b != batch:
        x = jnp.pad(x, ((0, pad_b - batch), (0, 0)))

    grid = (pad_b // tb,)

    def resident(shape):
        # Weights / biases: same block every grid step -> DMA'd once, stay in
        # VMEM across the batch loop.
        return pl.BlockSpec(shape, lambda i: (0, 0))

    in_specs = [
        pl.BlockSpec((tb, obs), lambda i: (i, 0)),
        resident((obs, width)), resident((1, width)),
        resident((width, width)), resident((1, width)),
        resident((width, width)), resident((1, width)),
        resident((width, a_pad)), resident((1, a_pad)),
    ]
    out_specs = [
        pl.BlockSpec((tb, a_pad), lambda i: (i, 0)),
        pl.BlockSpec((tb, 1), lambda i: (i, 0)),
        pl.BlockSpec((tb, 1), lambda i: (i, 0)),
    ]
    out_shape = (
        jax.ShapeDtypeStruct((pad_b, a_pad), jnp.float32),
        jax.ShapeDtypeStruct((pad_b, 1), jnp.float32),
        jax.ShapeDtypeStruct((pad_b, 1), jnp.int32),
    )

    q_pad, max_pad, act_pad = pl.pallas_call(
        functools.partial(_mlp_kernel, nb_actions=nb_actions),
        out_shape=out_shape,
        grid=grid,
        in_specs=in_specs,
        out_specs=out_specs,
        compiler_params=pltpu.CompilerParams(
            dimension_semantics=("parallel",),
            vmem_limit_bytes=32 << 20,
        ),
    )(x, w1, b1, w2, b2, w21, b21, w3p, b3p)

    q_values = q_pad[:batch, :nb_actions]
    greedy_actions = act_pad[:batch, 0]
    max_q = max_pad[:batch, 0]
    return q_values, greedy_actions, max_q


def init_params(key, observation_size, nb_actions):
    """Deterministic PyTorch-style init: U(-1/sqrt(fan_in), 1/sqrt(fan_in)).

    Weights are stored as (in, out) (transpose of torch's (out, in) layout).
    Biases are stored as (1, out). Everything f32 here; kernel-side casting is
    done in prepare_kernel_params.
    """
    dims = [(observation_size, NETWORK_WIDTH),
            (NETWORK_WIDTH, NETWORK_WIDTH),
            (NETWORK_WIDTH, NETWORK_WIDTH),
            (NETWORK_WIDTH, nb_actions)]
    params = []
    for (fan_in, fan_out) in dims:
        key, kw, kb = jax.random.split(key, 3)
        bound = 1.0 / jnp.sqrt(jnp.float32(fan_in))
        w = jax.random.uniform(kw, (fan_in, fan_out), jnp.float32, -bound, bound)
        b = jax.random.uniform(kb, (1, fan_out), jnp.float32, -bound, bound)
        params.append((w, b))
    return tuple(params)


def prepare_kernel_params(params):
    """Cast weights to bf16 and pad the last layer to 128 lanes (lane-dense)."""
    (w1, b1), (w2, b2), (w21, b21), (w3, b3) = params
    nb_actions = w3.shape[1]
    a_pad = _round_up(max(nb_actions, LANE), LANE)
    w3p = jnp.pad(w3, ((0, 0), (0, a_pad - nb_actions)))
    b3p = jnp.pad(b3, ((0, 0), (0, a_pad - nb_actions)))
    # TODO(synk): on v7x an fp8 per-output-channel-scaled weight path would
    # quarter the weight DMA; left as bf16 for accuracy/portability.
    return (w1.astype(jnp.bfloat16), b1,
            w2.astype(jnp.bfloat16), b2,
            w21.astype(jnp.bfloat16), b21,
            w3p.astype(jnp.bfloat16), b3p)


def reference_forward_bf16(x, params):
    """Pure-JAX reference simulating the kernel's bf16-weight / bf16-activation
    MXU inputs with f32 accumulation."""
    h = x.astype(jnp.float32)
    for i, (w, b) in enumerate(params):
        hb = h.astype(jnp.bfloat16).astype(jnp.float32)
        wb = w.astype(jnp.bfloat16).astype(jnp.float32)
        h = hb @ wb + b
        if i < len(params) - 1:
            h = jnp.maximum(h, 0.0)
    return h


if __name__ == "__main__":
    observation_size = 32
    nb_actions = 8
    batch = 2

    key = jax.random.PRNGKey(0)
    key, kx = jax.random.split(key)
    x = jax.random.normal(kx, (batch, observation_size), jnp.float32)
    params = init_params(key, observation_size, nb_actions)
    kernel_params = prepare_kernel_params(params)

    q_values, greedy_actions, max_q = q_function_forward(
        x, kernel_params, nb_actions)
    jax.block_until_ready((q_values, greedy_actions, max_q))

    # TODO(synk): pfrl.action_value.DiscreteActionValue is a Python container
    # with no Pallas equivalent; the kernel returns its contents directly
    # (q_values plus fused greedy_actions / max_q accessors).

    ref = reference_forward_bf16(x, params)
    assert q_values.shape == (batch, nb_actions)
    assert jnp.allclose(q_values, ref, atol=2e-3, rtol=2e-3), (
        float(jnp.max(jnp.abs(q_values - ref))))
    assert jnp.array_equal(greedy_actions, jnp.argmax(q_values, axis=-1))
    assert jnp.allclose(max_q, jnp.max(q_values, axis=-1), atol=1e-6)

    print("KERNEL_OK")
</pallas_src>

<mosaic_0001>
module attributes {stable_mosaic.version = 11 : i64} {
  func.func @_mlp_kernel(%arg0: i32, %arg1: memref<8x32xf32, #tpu.memory_space<vmem>>, %arg2: memref<32x1024xbf16, #tpu.memory_space<vmem>>, %arg3: memref<1x1024xf32, #tpu.memory_space<vmem>>, %arg4: memref<1024x1024xbf16, #tpu.memory_space<vmem>>, %arg5: memref<1x1024xf32, #tpu.memory_space<vmem>>, %arg6: memref<1024x1024xbf16, #tpu.memory_space<vmem>>, %arg7: memref<1x1024xf32, #tpu.memory_space<vmem>>, %arg8: memref<1024x128xbf16, #tpu.memory_space<vmem>>, %arg9: memref<1x128xf32, #tpu.memory_space<vmem>>, %arg10: memref<8x128xf32, #tpu.memory_space<vmem>>, %arg11: memref<8x1xf32, #tpu.memory_space<vmem>>, %arg12: memref<8x1xi32, #tpu.memory_space<vmem>>) attributes {dimension_semantics = [#tpu.dimension_semantics<parallel>], iteration_bounds = array<i64: 1>, scalar_prefetch = 0 : i64, scratch_operands = 0 : i64, tpu.core_type = #tpu.core_type<tc>, window_params = [{transform_indices = @transform_0, window_bounds = array<i64: 8, 32>}, {pipeline_mode = #tpu.pipeline_mode<synchronous>, transform_indices = @transform_1, window_bounds = array<i64: 32, 1024>}, {pipeline_mode = #tpu.pipeline_mode<synchronous>, transform_indices = @transform_2, window_bounds = array<i64: 1, 1024>}, {pipeline_mode = #tpu.pipeline_mode<synchronous>, transform_indices = @transform_3, window_bounds = array<i64: 1024, 1024>}, {pipeline_mode = #tpu.pipeline_mode<synchronous>, transform_indices = @transform_4, window_bounds = array<i64: 1, 1024>}, {pipeline_mode = #tpu.pipeline_mode<synchronous>, transform_indices = @transform_5, window_bounds = array<i64: 1024, 1024>}, {pipeline_mode = #tpu.pipeline_mode<synchronous>, transform_indices = @transform_6, window_bounds = array<i64: 1, 1024>}, {pipeline_mode = #tpu.pipeline_mode<synchronous>, transform_indices = @transform_7, window_bounds = array<i64: 1024, 128>}, {pipeline_mode = #tpu.pipeline_mode<synchronous>, transform_indices = @transform_8, window_bounds = array<i64: 1, 128>}, {transform_indices = @transform_9, window_bounds = array<i64: 8, 128>}, {transform_indices = @transform_10, window_bounds = array<i64: 8, 1>}, {transform_indices = @transform_11, window_bounds = array<i64: 8, 1>}]} {
    %c0 = arith.constant 0 : index
    %c0_0 = arith.constant 0 : index
    %0 = vector.load %arg1[%c0, %c0_0] : memref<8x32xf32, #tpu.memory_space<vmem>>, vector<8x32xf32>
    %1 = arith.truncf %0 : vector<8x32xf32> to vector<8x32xbf16>
    %c0_1 = arith.constant 0 : index
    %c0_2 = arith.constant 0 : index
    %2 = vector.load %arg2[%c0_1, %c0_2] : memref<32x1024xbf16, #tpu.memory_space<vmem>>, vector<32x1024xbf16>
    %cst = arith.constant dense<0.000000e+00> : vector<8x1024xf32>
    %3 = tpu.matmul %1, %2, %cst {dimension_numbers = #tpu.dot_dimension_numbers<[1], [0], [0], [1], [0, 0, 1, 1], [], []>} : vector<8x32xbf16>, vector<32x1024xbf16>, vector<8x1024xf32> -> vector<8x1024xf32>
    %c0_3 = arith.constant 0 : index
    %c0_4 = arith.constant 0 : index
    %4 = vector.load %arg3[%c0_3, %c0_4] : memref<1x1024xf32, #tpu.memory_space<vmem>>, vector<1x1024xf32>
    %5 = vector.broadcast %4 : vector<1x1024xf32> to vector<8x1024xf32>
    %6 = arith.addf %3, %5 : vector<8x1024xf32>
    %cst_5 = arith.constant 0.000000e+00 : f32
    %7 = vector.broadcast %cst_5 : f32 to vector<8x1024xf32>
    %8 = arith.maximumf %6, %7 : vector<8x1024xf32>
    %9 = arith.truncf %8 : vector<8x1024xf32> to vector<8x1024xbf16>
    %c0_6 = arith.constant 0 : index
    %c0_7 = arith.constant 0 : index
    %10 = vector.load %arg4[%c0_6, %c0_7] : memref<1024x1024xbf16, #tpu.memory_space<vmem>>, vector<1024x1024xbf16>
    %cst_8 = arith.constant dense<0.000000e+00> : vector<8x1024xf32>
    %11 = tpu.matmul %9, %10, %cst_8 {dimension_numbers = #tpu.dot_dimension_numbers<[1], [0], [0], [1], [0, 0, 1, 1], [], []>} : vector<8x1024xbf16>, vector<1024x1024xbf16>, vector<8x1024xf32> -> vector<8x1024xf32>
    %c0_9 = arith.constant 0 : index
    %c0_10 = arith.constant 0 : index
    %12 = vector.load %arg5[%c0_9, %c0_10] : memref<1x1024xf32, #tpu.memory_space<vmem>>, vector<1x1024xf32>
    %13 = vector.broadcast %12 : vector<1x1024xf32> to vector<8x1024xf32>
    %14 = arith.addf %11, %13 : vector<8x1024xf32>
    %cst_11 = arith.constant 0.000000e+00 : f32
    %15 = vector.broadcast %cst_11 : f32 to vector<8x1024xf32>
    %16 = arith.maximumf %14, %15 : vector<8x1024xf32>
    %17 = arith.truncf %16 : vector<8x1024xf32> to vector<8x1024xbf16>
    %c0_12 = arith.constant 0 : index
    %c0_13 = arith.constant 0 : index
    %18 = vector.load %arg6[%c0_12, %c0_13] : memref<1024x1024xbf16, #tpu.memory_space<vmem>>, vector<1024x1024xbf16>
    %cst_14 = arith.constant dense<0.000000e+00> : vector<8x1024xf32>
    %19 = tpu.matmul %17, %18, %cst_14 {dimension_numbers = #tpu.dot_dimension_numbers<[1], [0], [0], [1], [0, 0, 1, 1], [], []>} : vector<8x1024xbf16>, vector<1024x1024xbf16>, vector<8x1024xf32> -> vector<8x1024xf32>
    %c0_15 = arith.constant 0 : index
    %c0_16 = arith.constant 0 : index
    %20 = vector.load %arg7[%c0_15, %c0_16] : memref<1x1024xf32, #tpu.memory_space<vmem>>, vector<1x1024xf32>
    %21 = vector.broadcast %20 : vector<1x1024xf32> to vector<8x1024xf32>
    %22 = arith.addf %19, %21 : vector<8x1024xf32>
    %cst_17 = arith.constant 0.000000e+00 : f32
    %23 = vector.broadcast %cst_17 : f32 to vector<8x1024xf32>
    %24 = arith.maximumf %22, %23 : vector<8x1024xf32>
    %25 = arith.truncf %24 : vector<8x1024xf32> to vector<8x1024xbf16>
    %c0_18 = arith.constant 0 : index
    %c0_19 = arith.constant 0 : index
    %26 = vector.load %arg8[%c0_18, %c0_19] : memref<1024x128xbf16, #tpu.memory_space<vmem>>, vector<1024x128xbf16>
    %cst_20 = arith.constant dense<0.000000e+00> : vector<8x128xf32>
    %27 = tpu.matmul %25, %26, %cst_20 {dimension_numbers = #tpu.dot_dimension_numbers<[1], [0], [0], [1], [0, 0, 1, 1], [], []>} : vector<8x1024xbf16>, vector<1024x128xbf16>, vector<8x128xf32> -> vector<8x128xf32>
    %c0_21 = arith.constant 0 : index
    %c0_22 = arith.constant 0 : index
    %28 = vector.load %arg9[%c0_21, %c0_22] : memref<1x128xf32, #tpu.memory_space<vmem>>, vector<1x128xf32>
    %29 = vector.broadcast %28 : vector<1x128xf32> to vector<8x128xf32>
    %30 = arith.addf %27, %29 : vector<8x128xf32>
    %c0_23 = arith.constant 0 : index
    %c0_24 = arith.constant 0 : index
    %31 = vector.load %arg10[%c0_23, %c0_24] : memref<8x128xf32, #tpu.memory_space<vmem>>, vector<8x128xf32>
    tpu.vector_store %arg10[%c0_23, %c0_24], %30 {strides = array<i32>} : memref<8x128xf32, #tpu.memory_space<vmem>>, vector<8x128xf32>,
    %32 = tpu.iota {dimensions = array<i32: 1>} : vector<8x128xi32>
    %c8_i32 = arith.constant 8 : i32
    %33 = vector.broadcast %c8_i32 : i32 to vector<8x128xi32>
    %34 = arith.cmpi slt, %32, %33 : vector<8x128xi32>
    %cst_25 = arith.constant 0xFF800000 : f32
    %35 = vector.broadcast %cst_25 : f32 to vector<8x128xf32>
    %36 = arith.select %34, %30, %35 : vector<8x128xi1>, vector<8x128xf32>
    %cst_26 = arith.constant dense<0xFF800000> : vector<8xf32>
    %37 = vector.multi_reduction <maximumf>, %36, %cst_26 [1] : vector<8x128xf32> to vector<8xf32>
    %38 = vector.shape_cast %37 : vector<8xf32> to vector<8x1xf32>
    %c0_27 = arith.constant 0 : index
    %c0_28 = arith.constant 0 : index
    %39 = vector.load %arg11[%c0_27, %c0_28] : memref<8x1xf32, #tpu.memory_space<vmem>>, vector<8x1xf32>
    tpu.vector_store %arg11[%c0_27, %c0_28], %38 {strides = array<i32>} : memref<8x1xf32, #tpu.memory_space<vmem>>, vector<8x1xf32>,
    %40 = vector.broadcast %38 : vector<8x1xf32> to vector<8x128xf32>
    %41 = arith.cmpf oeq, %36, %40 : vector<8x128xf32>
    %42 = arith.andi %41, %34 : vector<8x128xi1>
    %c128_i32 = arith.constant 128 : i32
    %43 = vector.broadcast %c128_i32 : i32 to vector<8x128xi32>
    %44 = arith.select %42, %32, %43 : vector<8x128xi1>, vector<8x128xi32>
    %cst_29 = arith.constant dense<2147483647> : vector<8xi32>
    %45 = vector.multi_reduction <minsi>, %44, %cst_29 [1] : vector<8x128xi32> to vector<8xi32>
    %46 = vector.shape_cast %45 : vector<8xi32> to vector<8x1xi32>
    %c0_30 = arith.constant 0 : index
    %c0_31 = arith.constant 0 : index
    %47 = vector.load %arg12[%c0_30, %c0_31] : memref<8x1xi32, #tpu.memory_space<vmem>>, vector<8x1xi32>
    tpu.vector_store %arg12[%c0_30, %c0_31], %46 {strides = array<i32>} : memref<8x1xi32, #tpu.memory_space<vmem>>, vector<8x1xi32>,
    return
  }
  func.func @transform_0(%arg0: i32) -> (i32, i32) {
    %c0_i32 = arith.constant 0 : i32
    %c0_i32_0 = arith.constant 0 : i32
    return %arg0, %c0_i32 : i32, i32
  }
  func.func @transform_1(%arg0: i32) -> (i32, i32) {
    %c0_i32 = arith.constant 0 : i32
    %c0_i32_0 = arith.constant 0 : i32
    %c0_i32_1 = arith.constant 0 : i32
    return %c0_i32, %c0_i32_0 : i32, i32
  }
  func.func @transform_2(%arg0: i32) -> (i32, i32) {
    %c0_i32 = arith.constant 0 : i32
    %c0_i32_0 = arith.constant 0 : i32
    %c0_i32_1 = arith.constant 0 : i32
    return %c0_i32, %c0_i32_0 : i32, i32
  }
  func.func @transform_3(%arg0: i32) -> (i32, i32) {
    %c0_i32 = arith.constant 0 : i32
    %c0_i32_0 = arith.constant 0 : i32
    %c0_i32_1 = arith.constant 0 : i32
    return %c0_i32, %c0_i32_0 : i32, i32
  }
  func.func @transform_4(%arg0: i32) -> (i32, i32) {
    %c0_i32 = arith.constant 0 : i32
    %c0_i32_0 = arith.constant 0 : i32
    %c0_i32_1 = arith.constant 0 : i32
    return %c0_i32, %c0_i32_0 : i32, i32
  }
  func.func @transform_5(%arg0: i32) -> (i32, i32) {
    %c0_i32 = arith.constant 0 : i32
    %c0_i32_0 = arith.constant 0 : i32
    %c0_i32_1 = arith.constant 0 : i32
    return %c0_i32, %c0_i32_0 : i32, i32
  }
  func.func @transform_6(%arg0: i32) -> (i32, i32) {
    %c0_i32 = arith.constant 0 : i32
    %c0_i32_0 = arith.constant 0 : i32
    %c0_i32_1 = arith.constant 0 : i32
    return %c0_i32, %c0_i32_0 : i32, i32
  }
  func.func @transform_7(%arg0: i32) -> (i32, i32) {
    %c0_i32 = arith.constant 0 : i32
    %c0_i32_0 = arith.constant 0 : i32
    %c0_i32_1 = arith.constant 0 : i32
    return %c0_i32, %c0_i32_0 : i32, i32
  }
  func.func @transform_8(%arg0: i32) -> (i32, i32) {
    %c0_i32 = arith.constant 0 : i32
    %c0_i32_0 = arith.constant 0 : i32
    %c0_i32_1 = arith.constant 0 : i32
    return %c0_i32, %c0_i32_0 : i32, i32
  }
  func.func @transform_9(%arg0: i32) -> (i32, i32) {
    %c0_i32 = arith.constant 0 : i32
    %c0_i32_0 = arith.constant 0 : i32
    return %arg0, %c0_i32 : i32, i32
  }
  func.func @transform_10(%arg0: i32) -> (i32, i32) {
    %c0_i32 = arith.constant 0 : i32
    %c0_i32_0 = arith.constant 0 : i32
    return %arg0, %c0_i32 : i32, i32
  }
  func.func @transform_11(%arg0: i32) -> (i32, i32) {
    %c0_i32 = arith.constant 0 : i32
    %c0_i32_0 = arith.constant 0 : i32
    return %arg0, %c0_i32 : i32, i32
  }
}

</mosaic_0001>

<bundles_post_ra>
// kernel: q_function_forward.1
= control target key start
LH: loop header
LB: loop body
LE: loop exit
PB: predicated region body
PF: predicated region fallthrough
CT: control target
= control target key end

     0   :  { %17 = vsyncpa [#allocation3], 0  ;;  %s10761_s0 = inlined_call_operand.vmem [shape: f32[8,32], index: 0, kind: input, shape index: {}]   ;;  %s10762_s1 = inlined_call_operand.hbm [shape: bf16[32,1024], index: 1, kind: input, shape index: {}]   ;;  %s10763_s2 = inlined_call_operand.hbm [shape: f32[1,1024], index: 2, kind: input, shape index: {}]   ;;  %s10764_s3 = inlined_call_operand.hbm [shape: bf16[1024,1024], index: 3, kind: input, shape index: {}]   ;;  %s10765_s4 = inlined_call_operand.hbm [shape: f32[1,1024], index: 4, kind: input, shape index: {}]   ;;  %s10766_s5 = inlined_call_operand.hbm [shape: bf16[1024,1024], index: 5, kind: input, shape index: {}]   ;;  %s10767_s6 = inlined_call_operand.hbm [shape: f32[1,1024], index: 6, kind: input, shape index: {}]   ;;  %s10768_s7 = inlined_call_operand.hbm [shape: bf16[1024,128], index: 7, kind: input, shape index: {}]   ;;  %s10769_s8 = inlined_call_operand.hbm [shape: f32[1,128], index: 8, kind: input, shape index: {}]   ;;  %s10770_s9 = inlined_call_operand.vmem [shape: f32[8,128], index: 9, kind: output, shape index: {0}]   ;;  %s10771_s10 = inlined_call_operand.vmem [shape: f32[8,1], index: 10, kind: output, shape index: {1}]   ;;  %s10772_s11 = inlined_call_operand.vmem [shape: s32[8,1], index: 11, kind: output, shape index: {2}]  }
   0x1   :  { %18 = vsyncpa [#allocation5], 0 }
   0x2   :  { %19 = vsyncpa [#allocation8], 0 }
   0x3   :  { %20 = vsyncpa [#allocation11], 0 }
   0x4   :  { %21 = vsyncpa [#allocation14], 0  ;;  %s10330_s17 = smov [#allocation4]   ;;  %s10331_s19 = smov [#allocation7]  }
   0x5   :  { %s42_s18 = sshll.u32 %s10330_s17, 4  ;;  %s64_s20 = sshll.u32 %s10331_s19, 4  ;;  %s43_s18 = int_to_ptr.vmem [resolvable:$true] %s42_s18  ;;  %s65_s20 = int_to_ptr.vmem [resolvable:$true] %s64_s20 }
   0x6   :  { %s10144_s23 = scalar_lea.hbm %s10763_s2, 128 }
   0x7   :  { %p10145_p0 = scmp.ne.s32.totalorder %s10763_s2, %s10144_s23  ;;  %p10148_p1 = scmp.lt.u32.totalorder %s10144_s23, %s10763_s2 }
   0x9   :  { %p10150_p2 = pnand %p10148_p1, %p10145_p0 }
   0xb   :  { %10153 = shalt.err (!%p10150_p2)
}
   0xc   :  { %s10154_s28 = scalar_lea.vmem %s43_s18, 128  ;;  %p10159_p4 = scmp.lt.s32.totalorder %s43_s18, %s43_s18 }
   0xd   :  { %p10155_p3 = scmp.ne.s32.totalorder %s43_s18, %s10154_s28  ;;  %p10160_p5 = scmp.lt.s32.totalorder %s10154_s28, %s10154_s28 }
   0xf   :  { %p10161_p6 = por %p10160_p5, %p10159_p4 }
  0x11   :  { %p10162_p7 = pnand %p10161_p6, %p10155_p3 }
  0x13   :  { %10165 = shalt.err (!%p10162_p7)
}
  0x14   :  { %45 = dma.hbm_to_vmem [thread:$0]  %s10763_s2, 128, %s43_s18, [#allocation5]  }
  0x15   :  { %s10166_s14 = scalar_lea.hbm %s10765_s4, 128 }
  0x16   :  { %p10167_p8 = scmp.ne.s32.totalorder %s10765_s4, %s10166_s14  ;;  %p10170_p9 = scmp.lt.u32.totalorder %s10166_s14, %s10765_s4 }
  0x18   :  { %p10172_p10 = pnand %p10170_p9, %p10167_p8 }
  0x1a   :  { %10175 = shalt.err (!%p10172_p10)
}
  0x1b   :  { %s10176_s21 = scalar_lea.vmem %s65_s20, 128  ;;  %p10181_p12 = scmp.lt.s32.totalorder %s65_s20, %s65_s20 }
  0x1c   :  { %p10177_p11 = scmp.ne.s32.totalorder %s65_s20, %s10176_s21  ;;  %p10182_p13 = scmp.lt.s32.totalorder %s10176_s21, %s10176_s21 }
  0x1e   :  { %p10183_p0 = por %p10182_p13, %p10181_p12 }
  0x20   :  { %p10184_p1 = pnand %p10183_p0, %p10177_p11 }
  0x22   :  { %10187 = shalt.err (!%p10184_p1)
}
  0x23   :  { %67 = dma.hbm_to_vmem [thread:$0]  %s10765_s4, 128, %s65_s20, [#allocation8]  }
  0x24   :  { %s10332_s22 = smov [#allocation10]   ;;  %s10333_s24 = smov [#allocation2]  }
  0x25   :  { %s86_s23 = sshll.u32 %s10332_s22, 4  ;;  %s29_s25 = sshll.u32 %s10333_s24, 4  ;;  %s87_s23 = int_to_ptr.vmem [resolvable:$true] %s86_s23  ;;  %s10427_s25 = int_to_ptr.vmem [resolvable:$true] %s29_s25 }
  0x26   :  { %s10188_s28 = scalar_lea.hbm %s10767_s6, 128 }
  0x27   :  { %p10189_p2 = scmp.ne.s32.totalorder %s10767_s6, %s10188_s28  ;;  %p10192_p3 = scmp.lt.u32.totalorder %s10188_s28, %s10767_s6 }
  0x29   :  { %p10194_p4 = pnand %p10192_p3, %p10189_p2 }
  0x2b   :  { %10197 = shalt.err (!%p10194_p4)
}
  0x2c   :  { %s10198_s4 = scalar_lea.vmem %s87_s23, 128  ;;  %p10203_p6 = scmp.lt.s32.totalorder %s87_s23, %s87_s23 }
  0x2d   :  { %p10199_p5 = scmp.ne.s32.totalorder %s87_s23, %s10198_s4  ;;  %p10204_p7 = scmp.lt.s32.totalorder %s10198_s4, %s10198_s4 }
  0x2f   :  { %p10205_p8 = por %p10204_p7, %p10203_p6 }
  0x31   :  { %p10206_p9 = pnand %p10205_p8, %p10199_p5 }
  0x33   :  { %10209 = shalt.err (!%p10206_p9)
}
  0x34   :  { %89 = dma.hbm_to_vmem [thread:$0]  %s10767_s6, 128, %s87_s23, [#allocation11]  }
  0x35   :  { %s10210_s17 = scalar_lea.hbm %s10762_s1, 2048 }
  0x36   :  { %p10211_p10 = scmp.ne.s32.totalorder %s10762_s1, %s10210_s17  ;;  %p10214_p11 = scmp.lt.u32.totalorder %s10210_s17, %s10762_s1 }
  0x38   :  { %p10216_p12 = pnand %p10214_p11, %p10211_p10 }
  0x3a   :  { %10219 = shalt.err (!%p10216_p12)
}
  0x3b   :  { %s10220_s22 = scalar_lea.vmem %s10427_s25, 2048  ;;  %p10225_p0 = scmp.lt.s32.totalorder %s10427_s25, %s10427_s25 }
  0x3c   :  { %p10221_p13 = scmp.ne.s32.totalorder %s10427_s25, %s10220_s22  ;;  %p10226_p1 = scmp.lt.s32.totalorder %s10220_s22, %s10220_s22 }
  0x3e   :  { %p10227_p2 = por %p10226_p1, %p10225_p0 }
  0x40   :  { %p10228_p3 = pnand %p10227_p2, %p10221_p13 }
  0x42   :  { %10231 = shalt.err (!%p10228_p3)
}
  0x43   :  { %s10334_s6 = smov 512   ;;  %s10335_s23 = smov 32  }
  0x44   :  { %35 = dma.hbm_to_vmem [thread:$0]  %s10762_s1, 2048, %s10427_s25, [#allocation3], %s10334_s6, %s10334_s6, %s10335_s23  }
  0x45   :  { %s10336_s27 = smov [#allocation6]   ;;  %s10337_s29 = smov [#allocation9]  }
  0x46   :  { %s51_s28 = sshll.u32 %s10336_s27, 4  ;;  %s73_s30 = sshll.u32 %s10337_s29, 4  ;;  %s52_s28 = int_to_ptr.vmem [resolvable:$true] %s51_s28  ;;  %s10461_s30 = int_to_ptr.vmem [resolvable:$true] %s73_s30 }
  0x47   :  { %s10232_s4 = scalar_lea.hbm %s10764_s3, 65536 }
  0x48   :  { %p10233_p4 = scmp.ne.s32.totalorder %s10764_s3, %s10232_s4  ;;  %p10236_p5 = scmp.lt.u32.totalorder %s10232_s4, %s10764_s3 }
  0x4a   :  { %p10238_p6 = pnand %p10236_p5, %p10233_p4 }
  0x4c   :  { %10241 = shalt.err (!%p10238_p6)
}
  0x4d   :  { %s10242_s1 = scalar_lea.vmem %s52_s28, 65536  ;;  %p10247_p8 = scmp.lt.s32.totalorder %s52_s28, %s52_s28 }
  0x4e   :  { %p10243_p7 = scmp.ne.s32.totalorder %s52_s28, %s10242_s1  ;;  %p10248_p9 = scmp.lt.s32.totalorder %s10242_s1, %s10242_s1 }
  0x50   :  { %p10249_p10 = por %p10248_p9, %p10247_p8 }
  0x52   :  { %p10250_p11 = pnand %p10249_p10, %p10243_p7 }
  0x54   :  { %10253 = shalt.err (!%p10250_p11)
}
  0x55   :  { %57 = dma.hbm_to_vmem [thread:$0]  %s10764_s3, 65536, %s52_s28, [#allocation5], %s10334_s6, %s10334_s6, %s10335_s23  }
  0x56   :  { %s10254_s2 = scalar_lea.hbm %s10766_s5, 65536 }
  0x57   :  { %p10255_p12 = scmp.ne.s32.totalorder %s10766_s5, %s10254_s2  ;;  %p10258_p13 = scmp.lt.u32.totalorder %s10254_s2, %s10766_s5 }
  0x59   :  { %p10260_p0 = pnand %p10258_p13, %p10255_p12 }
  0x5b   :  { %10263 = shalt.err (!%p10260_p0)
}
  0x5c   :  { %s10264_s27 = scalar_lea.vmem %s10461_s30, 65536  ;;  %p10269_p2 = scmp.lt.s32.totalorder %s10461_s30, %s10461_s30 }
  0x5d   :  { %p10265_p1 = scmp.ne.s32.totalorder %s10461_s30, %s10264_s27  ;;  %p10270_p3 = scmp.lt.s32.totalorder %s10264_s27, %s10264_s27 }
  0x5f   :  { %p10271_p4 = por %p10270_p3, %p10269_p2 }
  0x61   :  { %p10272_p5 = pnand %p10271_p4, %p10265_p1 }
  0x63   :  { %10275 = shalt.err (!%p10272_p5)
}
  0x64   :  { %79 = dma.hbm_to_vmem [thread:$0]  %s10766_s5, 65536, %s10461_s30, [#allocation8], %s10334_s6, %s10334_s6, %s10335_s23  }
  0x65   :  { %s10338_s29 = smov [#allocation12]   ;;  %s10276_s20 = scalar_lea.hbm %s10768_s7, 8192 }
  0x66   :  { %s95_s12 = sshll.u32 %s10338_s29, 4  ;;  %p10277_p6 = scmp.ne.s32.totalorder %s10768_s7, %s10276_s20  ;;  %s96_s12 = int_to_ptr.vmem [resolvable:$true] %s95_s12 }
  0x67   :  { %p10280_p7 = scmp.lt.u32.totalorder %s10276_s20, %s10768_s7 }
  0x69   :  { %p10282_p8 = pnand %p10280_p7, %p10277_p6 }
  0x6b   :  { %10285 = shalt.err (!%p10282_p8)
}
  0x6c   :  { %s10286_s25 = scalar_lea.vmem %s96_s12, 8192  ;;  %p10291_p10 = scmp.lt.s32.totalorder %s96_s12, %s96_s12 }
  0x6d   :  { %p10287_p9 = scmp.ne.s32.totalorder %s96_s12, %s10286_s25  ;;  %p10292_p11 = scmp.lt.s32.totalorder %s10286_s25, %s10286_s25 }
  0x6f   :  { %p10293_p12 = por %p10292_p11, %p10291_p10 }
  0x71   :  { %p10294_p13 = pnand %p10293_p12, %p10287_p9 }
  0x73   :  { %10297 = shalt.err (!%p10294_p13)
}
  0x74   :  { %s10339_s5 = smov 64   ;;  %s10340_s6 = smov 4  }
  0x75   :  { %101 = dma.hbm_to_vmem [thread:$0]  %s10768_s7, 8192, %s96_s12, [#allocation11], %s10339_s5, %s10339_s5, %s10340_s6  }
  0x76   :  { %s10341_s17 = smov [#allocation13]   ;;  %s10298_s18 = scalar_lea.hbm %s10769_s8, 16 }
  0x77   :  { %s108_s19 = sshll.u32 %s10341_s17, 4  ;;  %p10299_p0 = scmp.ne.s32.totalorder %s10769_s8, %s10298_s18  ;;  %s109_s19 = int_to_ptr.vmem [resolvable:$true] %s108_s19 }
  0x78   :  { %p10302_p1 = scmp.lt.u32.totalorder %s10298_s18, %s10769_s8 }
  0x7a   :  { %p10304_p2 = pnand %p10302_p1, %p10299_p0 }
  0x7c   :  { %10307 = shalt.err (!%p10304_p2)
}
  0x7d   :  { %s10308_s3 = scalar_lea.vmem %s109_s19, 16  ;;  %s10312_s7 = scalar_lea.vmem %s109_s19, 32 }
  0x7e   :  { %p10309_p3 = scmp.ne.s32.totalorder %s109_s19, %s10308_s3  ;;  %p10313_p4 = scmp.lt.s32.totalorder %s109_s19, %s109_s19 }
  0x7f   :  { %p10314_p5 = scmp.lt.s32.totalorder %s10312_s7, %s10308_s3 }
  0x81   :  { %p10315_p6 = por %p10314_p5, %p10313_p4 }
  0x83   :  { %p10316_p7 = pnand %p10315_p6, %p10309_p3 }
  0x85   :  { %10319 = shalt.err (!%p10316_p7)
}
  0x86   :  { %111 = dma.hbm_to_vmem [thread:$0]  %s10769_s8, 16, %s109_s19, [#allocation14]  }
  0x87   :  { %10320 = dma.done.wait [#allocation3], 2048  }
  0x88   :  { %10321 = vsyncadd [#allocation3], 4294965248 }
  0x89   :  { %10322 = dma.done.wait [#allocation5], 65664  }
  0x8a   :  { %10323 = vsyncadd [#allocation5], 4294901632 }
  0x8b   :  { %10324 = dma.done.wait [#allocation8], 65664  }
  0x8c   :  { %10325 = vsyncadd [#allocation8], 4294901632 }
  0x8d   :  { %10326 = dma.done.wait [#allocation11], 8320  }
  0x8e   :  { %10327 = vsyncadd [#allocation11], 4294958976 }
  0x8f   :  { %10328 = dma.done.wait [#allocation14], 16  }
  0x90   :  { %10329 = vsyncadd [#allocation14], 4294967280  ;;  %v10342_v0 = vmov 0   ;;  %v139_v1 = vld [vmem:[#allocation2] sm:$0xff]  ;;  %v140_v7 = vld [vmem:[#allocation2 + $0x8] sm:$0xff]  ;;  %vm277_vm0 = vcmask 261120  }
  0x91   :  { %313 = vmatprep.mubr.bf16.mxu0 %v10342_v0  ;;  %354 = vmatprep.mubr.bf16.mxu1 %v10342_v0  ;;  %v143_v2 = vld [vmem:[#allocation2 + $0x20] sm:$0xff]  ;;  %v144_v9 = vld [vmem:[#allocation2 + $0x28] sm:$0xff]  ;;  %v141_v15 = vld [vmem:[#allocation2 + $0x10] sm:$0xff]  ;;  %vm8719_vm2 = vcmask 7168  }
  0x92   :  { %v147_v3 = vld [vmem:[#allocation2 + $0x40] sm:$0xff]  ;;  %v8757_v4 = vcombine.high %v139_v1, %v143_v2  ;;  %v8756_v5 = vcombine.low %v139_v1, %v143_v2  ;;  %v148_v10 = vld [vmem:[#allocation2 + $0x48] sm:$0xff]  ;;  %v8759_v12 = vcombine.high %v140_v7, %v144_v9  ;;  %v8758_v13 = vcombine.low %v140_v7, %v144_v9  ;;  %v145_v16 = vld [vmem:[#allocation2 + $0x30] sm:$0xff] }
  0x93   :  { %v151_v6 = vld [vmem:[#allocation2 + $0x60] sm:$0xff]  ;;  %v152_v11 = vld [vmem:[#allocation2 + $0x68] sm:$0xff]  ;;  %v137_v18 = vld [vmem:[%s10761_s0] sm:$0xff]  ;;  %v8761_v21 = vcombine.high %v141_v15, %v145_v16  ;;  %v8760_v27 = vcombine.low %v141_v15, %v145_v16 }
  0x94   :  { %v8765_v8 = vcombine.high %v147_v3, %v151_v6  ;;  %281 = vmatprep.subr.bf16.mxu0 %v8757_v4  ;;  %v8767_v14 = vcombine.high %v148_v10, %v152_v11  ;;  %v8764_v17 = vcombine.low %v147_v3, %v151_v6  ;;  %v142_v19 = vld [vmem:[#allocation2 + $0x18] sm:$0xff]  ;;  %322 = vmatprep.subr.bf16.mxu1 %v8759_v12  ;;  %v149_v23 = vld [vmem:[#allocation2 + $0x50] sm:$0xff]  ;;  %v461_v32 = vld [vmem:[#allocation6] sm:$0xff] }
  0x95   :  { %282 = vmatpush1.bf16.msra.mxu0 %v8756_v5  ;;  %v146_v20 = vld [vmem:[#allocation2 + $0x38] sm:$0xff]  ;;  %323 = vmatpush1.bf16.msra.mxu1 %v8758_v13  ;;  %v8766_v22 = vcombine.low %v148_v10, %v152_v11  ;;  %v153_v24 = vld [vmem:[#allocation2 + $0x70] sm:$0xff]  ;;  %v138_v25 = vpack.c.bf16 %v137_v18, %v137_v18  ;;  %v465_v33 = vld [vmem:[#allocation6 + $0x20] sm:$0xff] }
  0x96   :  { %283 = vmatprep.subr.bf16.mxu0 %v8765_v8  ;;  %324 = vmatprep.subr.bf16.mxu1 %v8767_v14  ;;  %v8763_v26 = vcombine.high %v142_v19, %v146_v20  ;;  %v150_v28 = vld [vmem:[#allocation2 + $0x58] sm:$0xff]  ;;  %v8769_v30 = vcombine.high %v149_v23, %v153_v24  ;;  %v8762_v31 = vcombine.low %v142_v19, %v146_v20  ;;  %v462_v36 = vld [vmem:[#allocation6 + $0x8] sm:$0xff]  ;;  %v469_v40 = vld [vmem:[#allocation6 + $0x40] sm:$0xff] }
  0x97   :  { %v154_v29 = vld [vmem:[#allocation2 + $0x78] sm:$0xff]  ;;  %v8768_v35 = vcombine.low %v149_v23, %v153_v24  ;;  %v466_v37 = vld [vmem:[#allocation6 + $0x28] sm:$0xff]  ;;  %v8777_v38 = vcombine.high %v461_v32, %v465_v33  ;;  %v473_v41 = vld [vmem:[#allocation6 + $0x60] sm:$0xff]  ;;  %v8776_v43 = vcombine.low %v461_v32, %v465_v33 }
  0x98   :  { %v8771_v34 = vcombine.high %v150_v28, %v154_v29  ;;  %v8770_v39 = vcombine.low %v150_v28, %v154_v29  ;;  %v8779_v42 = vcombine.high %v462_v36, %v466_v37  ;;  %v470_v44 = vld [vmem:[#allocation6 + $0x48] sm:$0xff]  ;;  %v8785_v46 = vcombine.high %v469_v40, %v473_v41  ;;  %v477_v48 = vld [vmem:[#allocation6 + $0x80] sm:$0xff] }
  0x99   :  { %284 = vmatpush1.bf16.msra.mxu0 %v8764_v17  ;;  %325 = vmatpush1.bf16.msra.mxu1 %v8766_v22  ;;  %v474_v45 = vld [vmem:[#allocation6 + $0x68] sm:$0xff]  ;;  %v8778_v47 = vcombine.low %v462_v36, %v466_v37  ;;  %v481_v49 = vld [vmem:[#allocation6 + $0xa0] sm:$0xff]  ;;  %v8784_v51 = vcombine.low %v469_v40, %v473_v41 }
  0x9a   :  { %363 = vmatprep.subr.bf16.mxu0 %v8761_v21  ;;  %404 = vmatprep.subr.bf16.mxu1 %v8763_v26  ;;  %v8787_v50 = vcombine.high %v470_v44, %v474_v45  ;;  %v478_v52 = vld [vmem:[#allocation6 + $0x88] sm:$0xff]  ;;  %v8793_v54 = vcombine.high %v477_v48, %v481_v49  ;;  %v8786_v55 = vcombine.low %v470_v44, %v474_v45  ;;  %v485_v56 = vld [vmem:[#allocation6 + $0xc0] sm:$0xff] }
  0x9b   :  { %v482_v53 = vld [vmem:[#allocation6 + $0xa8] sm:$0xff]  ;;  %v489_v57 = vld [vmem:[#allocation6 + $0xe0] sm:$0xff]  ;;  %v8792_v61 = vcombine.low %v477_v48, %v481_v49 }
  0x9c   :  { %8772 = vmatmul.mubr.msk.bf16.vlgmr.msra.gmra.mrb[0].mxu0 %vm277_vm0, %v138_v25  ;;  %8773 = vmatmul.mubr.msk.bf16.vlgmr.msra.gmra.mrb[0].mxu1 %vm277_vm0, %v138_v25  ;;  %v8795_v58 = vcombine.high %v478_v52, %v482_v53  ;;  %v486_v59 = vld [vmem:[#allocation6 + $0xc8] sm:$0xff]  ;;  %v493_v62 = vld [vmem:[#allocation6 + $0x100] sm:$0xff]  ;;  %v8794_v1 = vcombine.low %v478_v52, %v482_v53  ;;  %v8800_v5 = vcombine.low %v485_v56, %v489_v57 }
  0x9d   :  { %364 = vmatpush1.bf16.msra.mxu0 %v8760_v27  ;;  %395 = vmatprep.mubr.bf16.mxu0 %v10342_v0  ;;  %v490_v60 = vld [vmem:[#allocation6 + $0xe8] sm:$0xff]  ;;  %v497_v63 = vld [vmem:[#allocation6 + $0x120] sm:$0xff] }
  0x9e   :  { %365 = vmatprep.subr.bf16.mxu0 %v8769_v30  ;;  %405 = vmatpush1.bf16.msra.mxu1 %v8762_v31  ;;  %v494_v2 = vld [vmem:[#allocation6 + $0x108] sm:$0xff]  ;;  %v8803_v4 = vcombine.high %v486_v59, %v490_v60  ;;  %v501_v6 = vld [vmem:[#allocation6 + $0x140] sm:$0xff]  ;;  %v8809_v8 = vcombine.high %v493_v62, %v497_v63  ;;  %v8802_v9 = vcombine.low %v486_v59, %v490_v60 }
  0x9f   :  { %436 = vmatprep.mubr.bf16.mxu1 %v10342_v0  ;;  %406 = vmatprep.subr.bf16.mxu1 %v8771_v34  ;;  %v8801_v0 = vcombine.high %v485_v56, %v489_v57  ;;  %v498_v3 = vld [vmem:[#allocation6 + $0x128] sm:$0xff]  ;;  %v505_v7 = vld [vmem:[#allocation6 + $0x160] sm:$0xff]  ;;  %v8808_v13 = vcombine.low %v493_v62, %v497_v63 }
  0xa0   :  { %v502_v10 = vld [vmem:[#allocation6 + $0x148] sm:$0xff]  ;;  %v8811_v12 = vcombine.high %v494_v2, %v498_v3  ;;  %v509_v14 = vld [vmem:[#allocation6 + $0x180] sm:$0xff]  ;;  %v8817_v16 = vcombine.high %v501_v6, %v505_v7  ;;  %v8810_v17 = vcombine.low %v494_v2, %v498_v3  ;;  %v8816_v21 = vcombine.low %v501_v6, %v505_v7 }
  0xa1   :  { %366 = vmatpush1.bf16.msra.mxu0 %v8768_v35  ;;  %v506_v11 = vld [vmem:[#allocation6 + $0x168] sm:$0xff]  ;;  %v513_v15 = vld [vmem:[#allocation6 + $0x1a0] sm:$0xff] }
  0xa2   :  { %3575 = vmatprep.subr.bf16.mxu0 %v8777_v38  ;;  %407 = vmatpush1.bf16.msra.mxu1 %v8770_v39  ;;  %v510_v18 = vld [vmem:[#allocation6 + $0x188] sm:$0xff]  ;;  %v8819_v20 = vcombine.high %v502_v10, %v506_v11  ;;  %v517_v22 = vld [vmem:[#allocation6 + $0x1c0] sm:$0xff]  ;;  %v8825_v24 = vcombine.high %v509_v14, %v513_v15  ;;  %v8824_v29 = vcombine.low %v509_v14, %v513_v15 }
  0xa3   :  { %3739 = vmatprep.subr.bf16.mxu1 %v8779_v42  ;;  %v514_v19 = vld [vmem:[#allocation6 + $0x1a8] sm:$0xff]  ;;  %v521_v23 = vld [vmem:[#allocation6 + $0x1e0] sm:$0xff] }
  0xa4   :  { %8774 = vmatmul.mubr.msk.bf16.vlgmr.msra.gmra.mrb[4].mxu0 %vm277_vm0, %v138_v25  ;;  %v518_v26 = vld [vmem:[#allocation6 + $0x1c8] sm:$0xff]  ;;  %v8827_v28 = vcombine.high %v510_v18, %v514_v19  ;;  %v525_v30 = vld [vmem:[#allocation6 + $0x200] sm:$0xff]  ;;  %v8833_v32 = vcombine.high %v517_v22, %v521_v23  ;;  %v8826_v33 = vcombine.low %v510_v18, %v514_v19  ;;  %v8832_v37 = vcombine.low %v517_v22, %v521_v23 }
  0xa5   :  { %3576 = vmatpush1.bf16.msra.mxu0 %v8776_v43  ;;  %8775 = vmatmul.mubr.msk.bf16.vlgmr.msra.gmra.mrb[4].mxu1 %vm277_vm0, %v138_v25  ;;  %v8818_v25 = vcombine.low %v502_v10, %v506_v11  ;;  %v522_v27 = vld [vmem:[#allocation6 + $0x1e8] sm:$0xff]  ;;  %v529_v31 = vld [vmem:[#allocation6 + $0x220] sm:$0xff] }
  0xa6   :  { %3577 = vmatprep.subr.bf16.mxu0 %v8785_v46  ;;  %3740 = vmatpush1.bf16.msra.mxu1 %v8778_v47  ;;  %v526_v34 = vld [vmem:[#allocation6 + $0x208] sm:$0xff]  ;;  %v8835_v36 = vcombine.high %v518_v26, %v522_v27  ;;  %v533_v38 = vld [vmem:[#allocation6 + $0x240] sm:$0xff]  ;;  %v8841_v40 = vcombine.high %v525_v30, %v529_v31  ;;  %v8834_v41 = vcombine.low %v518_v26, %v522_v27 }
  0xa7   :  { %3741 = vmatprep.subr.bf16.mxu1 %v8787_v50  ;;  %v530_v35 = vld [vmem:[#allocation6 + $0x228] sm:$0xff]  ;;  %v537_v39 = vld [vmem:[#allocation6 + $0x260] sm:$0xff]  ;;  %v8840_v45 = vcombine.low %v525_v30, %v529_v31 }
  0xa8   :  { %v534_v42 = vld [vmem:[#allocation6 + $0x248] sm:$0xff]  ;;  %v8843_v44 = vcombine.high %v526_v34, %v530_v35  ;;  %v541_v46 = vld [vmem:[#allocation6 + $0x280] sm:$0xff]  ;;  %v8849_v48 = vcombine.high %v533_v38, %v537_v39  ;;  %v8842_v49 = vcombine.low %v526_v34, %v530_v35  ;;  %v8848_v53 = vcombine.low %v533_v38, %v537_v39 }
  0xa9   :  { %3578 = vmatpush1.bf16.msra.mxu0 %v8784_v51  ;;  %v538_v43 = vld [vmem:[#allocation6 + $0x268] sm:$0xff]  ;;  %v545_v47 = vld [vmem:[#allocation6 + $0x2a0] sm:$0xff] }
  0xaa   :  { %3579 = vmatprep.subr.bf16.mxu0 %v8793_v54  ;;  %3742 = vmatpush1.bf16.msra.mxu1 %v8786_v55  ;;  %v542_v50 = vld [vmem:[#allocation6 + $0x288] sm:$0xff]  ;;  %v8851_v52 = vcombine.high %v534_v42, %v538_v43  ;;  %v549_v54 = vld [vmem:[#allocation6 + $0x2c0] sm:$0xff]  ;;  %v8857_v56 = vcombine.high %v541_v46, %v545_v47  ;;  %v8850_v57 = vcombine.low %v534_v42, %v538_v43  ;;  %v157_v43 = vlaneseq }
  0xab   :  { %3743 = vmatprep.subr.bf16.mxu1 %v8795_v58  ;;  %v546_v51 = vld [vmem:[#allocation6 + $0x2a8] sm:$0xff]  ;;  %v553_v55 = vld [vmem:[#allocation6 + $0x2e0] sm:$0xff] }
  0xac   :  { %v550_v58 = vld [vmem:[#allocation6 + $0x2c8] sm:$0xff]  ;;  %v8859_v60 = vcombine.high %v542_v50, %v546_v51  ;;  %v557_v62 = vld [vmem:[#allocation6 + $0x300] sm:$0xff] }
  0xad   :  { %3580 = vmatpush1.bf16.msra.mxu0 %v8792_v61  ;;  %v554_v59 = vld [vmem:[#allocation6 + $0x2e8] sm:$0xff]  ;;  %v8856_v61 = vcombine.low %v541_v46, %v545_v47  ;;  %v561_v63 = vld [vmem:[#allocation6 + $0x320] sm:$0xff]  ;;  %v10535_v46 = vld [vmem:[#allocation4] sm:$0xff] }
  0xae   :  { %3581 = vmatprep.subr.bf16.mxu0 %v8801_v0  ;;  %3744 = vmatpush1.bf16.msra.mxu1 %v8794_v1  ;;  %v8865_v0 = vcombine.high %v549_v54, %v553_v55  ;;  %v8858_v1 = vcombine.low %v542_v50, %v546_v51  ;;  %v558_v2 = vld [vmem:[#allocation6 + $0x308] sm:$0xff]  ;;  %v565_v6 = vld [vmem:[#allocation6 + $0x340] sm:$0xff] }
  0xaf   :  { %3745 = vmatprep.subr.bf16.mxu1 %v8803_v4  ;;  %v562_v3 = vld [vmem:[#allocation6 + $0x328] sm:$0xff]  ;;  %v8867_v4 = vcombine.high %v550_v58, %v554_v59  ;;  %v569_v7 = vld [vmem:[#allocation6 + $0x360] sm:$0xff] }
  0xb0   :  { %v566_v10 = vld [vmem:[#allocation6 + $0x348] sm:$0xff]  ;;  %v8881_v14 = vcombine.high %v565_v6, %v569_v7  ;;  %v8874_v15 = vcombine.low %v558_v2, %v562_v3  ;;  %v573_v19 = vld [vmem:[#allocation6 + $0x380] sm:$0xff] }
  0xb1   :  { %3582 = vmatpush1.bf16.msra.mxu0 %v8800_v5  ;;  %v8864_v5 = vcombine.low %v549_v54, %v553_v55  ;;  %v570_v11 = vld [vmem:[#allocation6 + $0x368] sm:$0xff]  ;;  %v581_v27 = vld [vmem:[#allocation6 + $0x3c0] sm:$0xff] }
  0xb2   :  { %3583 = vmatprep.subr.bf16.mxu0 %v8809_v8  ;;  %3746 = vmatpush1.bf16.msra.mxu1 %v8802_v9  ;;  %v8873_v8 = vcombine.high %v557_v62, %v561_v63  ;;  %v8866_v9 = vcombine.low %v550_v58, %v554_v59  ;;  %v8882_v18 = vcombine.low %v566_v10, %v570_v11  ;;  %v578_v23 = vld [vmem:[#allocation6 + $0x3a8] sm:$0xff]  ;;  %v589_v35 = vld [vmem:[#allocation6 + $0x400] sm:$0xff] }
  0xb3   :  { %3747 = vmatprep.subr.bf16.mxu1 %v8811_v12  ;;  %v8875_v12 = vcombine.high %v558_v2, %v562_v3  ;;  %v586_v31 = vld [vmem:[#allocation6 + $0x3e8] sm:$0xff] }
  0xb4   :  { %v594_v39 = vld [vmem:[#allocation6 + $0x428] sm:$0xff] }
  0xb5   :  { %3584 = vmatpush1.bf16.msra.mxu0 %v8808_v13  ;;  %v8872_v13 = vcombine.low %v557_v62, %v561_v63  ;;  %v601_v63 = vld [vmem:[#allocation6 + $0x460] sm:$0xff] }
  0xb6   :  { %3585 = vmatprep.subr.bf16.mxu0 %v8817_v16  ;;  %3748 = vmatpush1.bf16.msra.mxu1 %v8810_v17  ;;  %v8883_v16 = vcombine.high %v566_v10, %v570_v11  ;;  %v8880_v17 = vcombine.low %v565_v6, %v569_v7  ;;  %v605_v10 = vld [vmem:[#allocation6 + $0x480] sm:$0xff] }
  0xb7   :  { %3749 = vmatprep.subr.bf16.mxu1 %v8819_v20  ;;  %v577_v20 = vld [vmem:[#allocation6 + $0x3a0] sm:$0xff] }
  0xb8   :  { %v8889_v22 = vcombine.high %v573_v19, %v577_v20  ;;  %v609_v11 = vld [vmem:[#allocation6 + $0x4a0] sm:$0xff] }
  0xb9   :  { %3586 = vmatpush1.bf16.msra.mxu0 %v8816_v21  ;;  %v574_v21 = vld [vmem:[#allocation6 + $0x388] sm:$0xff] }
  0xba   :  { %3587 = vmatprep.subr.bf16.mxu0 %v8825_v24  ;;  %3750 = vmatpush1.bf16.msra.mxu1 %v8818_v25  ;;  %v8888_v24 = vcombine.low %v573_v19, %v577_v20  ;;  %v8890_v25 = vcombine.low %v574_v21, %v578_v23  ;;  %v8891_v26 = vcombine.high %v574_v21, %v578_v23 }
  0xbb   :  { %3751 = vmatprep.subr.bf16.mxu1 %v8827_v28  ;;  %v585_v28 = vld [vmem:[#allocation6 + $0x3e0] sm:$0xff]  ;;  %v8921_v20 = vcombine.high %v605_v10, %v609_v11 }
  0xbc   :  { %v8897_v30 = vcombine.high %v581_v27, %v585_v28 }
  0xbd   :  { %3588 = vmatpush1.bf16.msra.mxu0 %v8824_v29  ;;  %v582_v29 = vld [vmem:[#allocation6 + $0x3c8] sm:$0xff] }
  0xbe   :  { %3589 = vmatprep.subr.bf16.mxu0 %v8833_v32  ;;  %3752 = vmatpush1.bf16.msra.mxu1 %v8826_v33  ;;  %v8896_v32 = vcombine.low %v581_v27, %v585_v28  ;;  %v8898_v33 = vcombine.low %v582_v29, %v586_v31  ;;  %v8899_v34 = vcombine.high %v582_v29, %v586_v31  ;;  %v621_v31 = vld [vmem:[#allocation6 + $0x500] sm:$0xff] }
  0xbf   :  { %3753 = vmatprep.subr.bf16.mxu1 %v8835_v36  ;;  %v593_v36 = vld [vmem:[#allocation6 + $0x420] sm:$0xff]  ;;  %v8920_v27 = vcombine.low %v605_v10, %v609_v11  ;;  %v654_v10 = vld [vmem:[#allocation6 + $0x608] sm:$0xff] }
  0xc0   :  { %v8905_v38 = vcombine.high %v589_v35, %v593_v36  ;;  %v658_v11 = vld [vmem:[#allocation6 + $0x628] sm:$0xff] }
  0xc1   :  { %3590 = vmatpush1.bf16.msra.mxu0 %v8832_v37  ;;  %v590_v37 = vld [vmem:[#allocation6 + $0x408] sm:$0xff] }
  0xc2   :  { %3591 = vmatprep.subr.bf16.mxu0 %v8841_v40  ;;  %3754 = vmatpush1.bf16.msra.mxu1 %v8834_v41  ;;  %v8904_v40 = vcombine.low %v589_v35, %v593_v36  ;;  %v8906_v41 = vcombine.low %v590_v37, %v594_v39  ;;  %v8907_v42 = vcombine.high %v590_v37, %v594_v39  ;;  %v629_v39 = vld [vmem:[#allocation6 + $0x540] sm:$0xff] }
  0xc3   :  { %3755 = vmatprep.subr.bf16.mxu1 %v8843_v44  ;;  %v10530_v44 = vshrl.u32 %v157_v43, 7 }
  0xc5   :  { %3592 = vmatpush1.bf16.msra.mxu0 %v8840_v45  ;;  %v10533_v45 = vsub.s32 0, %v10530_v44  ;;  %v10538_v47 = vsub.s32 1, %v10530_v44 }
  0xc6   :  { %3593 = vmatprep.subr.bf16.mxu0 %v8849_v48  ;;  %3756 = vmatpush1.bf16.msra.mxu1 %v8842_v49  ;;  %v10541_v48 = vsub.s32 3, %v10530_v44 }
  0xc7   :  { %3757 = vmatprep.subr.bf16.mxu1 %v8851_v52  ;;  %v160_v49 = vrot.slane %v10535_v46, %v10533_v45  ;;  %v164_v50 = vrot.slane %v10535_v46, %v10538_v47 }
  0xc8   :  { %v172_v52 = vrot.slane %v10535_v46, %v10541_v48 }
  0xc9   :  { %3594 = vmatpush1.bf16.msra.mxu0 %v8848_v53 }
  0xca   :  { %3595 = vmatprep.subr.bf16.mxu0 %v8857_v56  ;;  %3758 = vmatpush1.bf16.msra.mxu1 %v8850_v57 }
  0xcb   :  { %3759 = vmatprep.subr.bf16.mxu1 %v8859_v60  ;;  %v597_v60 = vld [vmem:[#allocation6 + $0x440] sm:$0xff] }
  0xcd   :  { %3596 = vmatpush1.bf16.msra.mxu0 %v8856_v61 }
  0xce   :  { %3597 = vmatprep.subr.bf16.mxu0 %v8865_v0  ;;  %3760 = vmatpush1.bf16.msra.mxu1 %v8858_v1  ;;  %v598_v0 = vld [vmem:[#allocation6 + $0x448] sm:$0xff] }
  0xcf   :  { %3761 = vmatprep.subr.bf16.mxu1 %v8867_v4  ;;  %v602_v1 = vld [vmem:[#allocation6 + $0x468] sm:$0xff] }
  0xd1   :  { %3598 = vmatpush1.bf16.msra.mxu0 %v8864_v5 }
  0xd2   :  { %3599 = vmatprep.subr.bf16.mxu0 %v8873_v8  ;;  %3762 = vmatpush1.bf16.msra.mxu1 %v8866_v9  ;;  %v8913_v8 = vcombine.high %v597_v60, %v601_v63  ;;  %v8915_v9 = vcombine.high %v598_v0, %v602_v1 }
  0xd3   :  { %3763 = vmatprep.subr.bf16.mxu1 %v8875_v12  ;;  %v606_v12 = vld [vmem:[#allocation6 + $0x488] sm:$0xff] }
  0xd5   :  { %3600 = vmatpush1.bf16.msra.mxu0 %v8872_v13  ;;  %v610_v13 = vld [vmem:[#allocation6 + $0x4a8] sm:$0xff] }
  0xd6   :  { %3601 = vmatprep.subr.bf16.mxu0 %v8881_v14  ;;  %3764 = vmatpush1.bf16.msra.mxu1 %v8874_v15  ;;  %v8923_v21 = vcombine.high %v606_v12, %v610_v13  ;;  %v8922_v28 = vcombine.low %v606_v12, %v610_v13 }
  0xd7   :  { %3765 = vmatprep.subr.bf16.mxu1 %v8883_v16 }
  0xd9   :  { %3602 = vmatpush1.bf16.msra.mxu0 %v8880_v17  ;;  %v8912_v17 = vcombine.low %v597_v60, %v601_v63  ;;  %v649_v63 = vld [vmem:[#allocation6 + $0x5e0] sm:$0xff] }
  0xda   :  { %3766 = vmatpush1.bf16.msra.mxu1 %v8882_v18  ;;  %3603 = vmatprep.subr.bf16.mxu0 %v8889_v22  ;;  %v8914_v18 = vcombine.low %v598_v0, %v602_v1  ;;  %v613_v22 = vld [vmem:[#allocation6 + $0x4c0] sm:$0xff]  ;;  %v646_v0 = vld [vmem:[#allocation6 + $0x5c8] sm:$0xff] }
  0xdb   :  { %3767 = vmatprep.subr.bf16.mxu1 %v8891_v26  ;;  %v618_v26 = vld [vmem:[#allocation6 + $0x4e8] sm:$0xff] }
  0xdc   :  { %v650_v1 = vld [vmem:[#allocation6 + $0x5e8] sm:$0xff] }
  0xdd   :  { %3604 = vmatpush1.bf16.msra.mxu0 %v8888_v24  ;;  %v617_v24 = vld [vmem:[#allocation6 + $0x4e0] sm:$0xff]  ;;  %v8962_v13 = vcombine.low %v646_v0, %v650_v1 }
  0xde   :  { %3768 = vmatpush1.bf16.msra.mxu1 %v8890_v25  ;;  %3605 = vmatprep.subr.bf16.mxu0 %v8897_v30  ;;  %v614_v25 = vld [vmem:[#allocation6 + $0x4c8] sm:$0xff]  ;;  %v8929_v29 = vcombine.high %v613_v22, %v617_v24  ;;  %v8928_v35 = vcombine.low %v613_v22, %v617_v24  ;;  %v8970_v24 = vcombine.low %v654_v10, %v658_v11 }
  0xdf   :  { %3769 = vmatprep.subr.bf16.mxu1 %v8899_v34  ;;  %v8931_v30 = vcombine.high %v614_v25, %v618_v26  ;;  %v626_v34 = vld [vmem:[#allocation6 + $0x528] sm:$0xff]  ;;  %v8930_v36 = vcombine.low %v614_v25, %v618_v26 }
  0xe0   :  { %v666_v22 = vld [vmem:[#allocation6 + $0x668] sm:$0xff] }
  0xe1   :  { %3606 = vmatpush1.bf16.msra.mxu0 %v8896_v32  ;;  %v625_v32 = vld [vmem:[#allocation6 + $0x520] sm:$0xff] }
  0xe2   :  { %3770 = vmatpush1.bf16.msra.mxu1 %v8898_v33  ;;  %3616 = vmatprep.subr.bf16.mxu0 %v8905_v38  ;;  %v622_v33 = vld [vmem:[#allocation6 + $0x508] sm:$0xff]  ;;  %v8937_v37 = vcombine.high %v621_v31, %v625_v32 }
  0xe3   :  { %3780 = vmatprep.subr.bf16.mxu1 %v8907_v42  ;;  %v8939_v38 = vcombine.high %v622_v33, %v626_v34  ;;  %v634_v42 = vld [vmem:[#allocation6 + $0x568] sm:$0xff] }
 0x16f   :  { %v315_v51 = vpop.f32.mrb[0].mxu0  ;;  %v10549_v57 = vpop.f32.mrb[0].mxu1 }
 0x170   :  { %v316_v53 = vadd.f32 %v315_v51, %v160_v49  ;;  %v317_v54 = vpop.f32.mrb[1].mxu0  ;;  %v358_v61 = vpop.f32.mrb[1].mxu1  ;;  %v8936_v49 = vcombine.low %v621_v31, %v625_v32 }
 0x171   :  { %v318_v55 = vadd.f32 %v317_v54, %v164_v50  ;;  %v319_v56 = vpop.f32.mrb[2].mxu0  ;;  %v359_v2 = vadd.f32 %v358_v61, %v172_v52  ;;  %v360_v3 = vpop.f32.mrb[2].mxu1  ;;  %v8938_v50 = vcombine.low %v622_v33, %v626_v34  ;;  %v641_v54 = vld [vmem:[#allocation6 + $0x5a0] sm:$0xff] }
 0x172   :  { %v445_v58 = vmax.f32 %v316_v53, 0.0  ;;  %v320_v59 = vpop.f32.mrb[3].mxu0  ;;  %v361_v4 = vpop.f32.mrb[3].mxu1  ;;  %v637_v53 = vld [vmem:[#allocation6 + $0x580] sm:$0xff]  ;;  %v642_v56 = vld [vmem:[#allocation6 + $0x5a8] sm:$0xff] }
 0x173   :  { %v446_v62 = vmax.f32 %v318_v55, 0.0  ;;  %v448_v6 = vmax.f32 %v359_v2, 0.0  ;;  %v638_v55 = vld [vmem:[#allocation6 + $0x588] sm:$0xff]  ;;  %v8953_v60 = vcombine.high %v637_v53, %v641_v54  ;;  %v8952_v2 = vcombine.low %v637_v53, %v641_v54 }
 0x174   :  { %v10553_v7 = vpack.c.bf16 %v445_v58, %v445_v58  ;;  %v8955_v61 = vcombine.high %v638_v55, %v642_v56  ;;  %v8954_v3 = vcombine.low %v638_v55, %v642_v56 }
 0x175   :  { %v10551_v5 = vpack.c.bf16 %v446_v62, %v446_v62  ;;  %v10557_v14 = vpack.c.bf16 %v448_v6, %v448_v6  ;;  %v645_v62 = vld [vmem:[#allocation6 + $0x5c0] sm:$0xff]  ;;  %v8963_v6 = vcombine.high %v646_v0, %v650_v1 }
 0x176   :  { %v8961_v4 = vcombine.high %v645_v62, %v649_v63  ;;  %v8960_v12 = vcombine.low %v645_v62, %v649_v63  ;;  %v10568_v62 = vsub.s32 2, %v10530_v44 }
 0x177   :  { %3607 = vmatprep.mubr.bf16.mxu0 %v10551_v5  ;;  %3771 = vmatprep.mubr.bf16.mxu1 %v10551_v5  ;;  %v10559_v15 = vpop.f32.mrb[4].mxu0 }
 0x178   :  { %3608 = vmatmul.mubr.bf16.vlgmr.msra.gmra.mrb[8].mxu0 %v10553_v7  ;;  %3772 = vmatmul.mubr.bf16.vlgmr.msra.gmra.mrb[8].mxu1 %v10553_v7  ;;  %v10563_v16 = vpop.f32.mrb[5].mxu0  ;;  %v10570_v1 = vpop.f32.mrb[4].mxu1 }
 0x179   :  { %3617 = vmatpush1.bf16.msra.mxu0 %v8904_v40  ;;  %3781 = vmatpush1.bf16.msra.mxu1 %v8906_v41  ;;  %v401_v19 = vpop.f32.mrb[6].mxu0  ;;  %v633_v40 = vld [vmem:[#allocation6 + $0x560] sm:$0xff]  ;;  %v630_v41 = vld [vmem:[#allocation6 + $0x548] sm:$0xff] }
 0x17a   :  { %3618 = vmatprep.subr.bf16.mxu0 %v8913_v8  ;;  %3782 = vmatprep.subr.bf16.mxu1 %v8915_v9  ;;  %v402_v23 = vpop.f32.mrb[7].mxu0  ;;  %v8945_v51 = vcombine.high %v629_v39, %v633_v40  ;;  %v8947_v52 = vcombine.high %v630_v41, %v634_v42  ;;  %v8944_v58 = vcombine.low %v629_v39, %v633_v40  ;;  %v653_v8 = vld [vmem:[#allocation6 + $0x600] sm:$0xff] }
 0x17b   :  { %3648 = vmatprep.mubr.bf16.mxu0 %v10557_v14  ;;  %3812 = vmatprep.mubr.bf16.mxu1 %v10557_v14  ;;  %v8946_v59 = vcombine.low %v630_v41, %v634_v42  ;;  %v657_v9 = vld [vmem:[#allocation6 + $0x620] sm:$0xff] }
 0x17c   :  { %v661_v19 = vld [vmem:[#allocation6 + $0x640] sm:$0xff]  ;;  %v8968_v23 = vcombine.low %v653_v8, %v657_v9 }
 0x17d   :  { %3619 = vmatpush1.bf16.msra.mxu0 %v8912_v17  ;;  %3783 = vmatpush1.bf16.msra.mxu1 %v8914_v18  ;;  %v8969_v17 = vcombine.high %v653_v8, %v657_v9  ;;  %v8971_v18 = vcombine.high %v654_v10, %v658_v11  ;;  %v705_v8 = vld [vmem:[#allocation6 + $0x7a0] sm:$0xff]  ;;  %v702_v9 = vld [vmem:[#allocation6 + $0x788] sm:$0xff]  ;;  %v10575_v11 = vsub.s32 5, %v10530_v44 }
 0x17e   :  { %3620 = vmatprep.subr.bf16.mxu0 %v8921_v20  ;;  %3784 = vmatprep.subr.bf16.mxu1 %v8923_v21  ;;  %v665_v20 = vld [vmem:[#allocation6 + $0x660] sm:$0xff]  ;;  %v662_v21 = vld [vmem:[#allocation6 + $0x648] sm:$0xff] }
 0x17f   :  { %v8977_v25 = vcombine.high %v661_v19, %v665_v20  ;;  %v8979_v26 = vcombine.high %v662_v21, %v666_v22  ;;  %v8976_v31 = vcombine.low %v661_v19, %v665_v20  ;;  %v8978_v32 = vcombine.low %v662_v21, %v666_v22  ;;  %v706_v10 = vld [vmem:[#allocation6 + $0x7a8] sm:$0xff]  ;;  %v709_v22 = vld [vmem:[#allocation6 + $0x7c0] sm:$0xff] }
 0x180   :  { %v9019_v21 = vcombine.high %v702_v9, %v706_v10 }
 0x181   :  { %3621 = vmatpush1.bf16.msra.mxu0 %v8920_v27  ;;  %3785 = vmatpush1.bf16.msra.mxu1 %v8922_v28  ;;  %v669_v27 = vld [vmem:[#allocation6 + $0x680] sm:$0xff] }
 0x182   :  { %3622 = vmatprep.subr.bf16.mxu0 %v8929_v29  ;;  %3786 = vmatprep.subr.bf16.mxu1 %v8931_v30  ;;  %v673_v28 = vld [vmem:[#allocation6 + $0x6a0] sm:$0xff]  ;;  %v670_v29 = vld [vmem:[#allocation6 + $0x688] sm:$0xff] }
 0x183   :  { %v674_v30 = vld [vmem:[#allocation6 + $0x6a8] sm:$0xff]  ;;  %v8985_v33 = vcombine.high %v669_v27, %v673_v28  ;;  %v8984_v39 = vcombine.low %v669_v27, %v673_v28 }
 0x184   :  { %v8987_v34 = vcombine.high %v670_v29, %v674_v30  ;;  %v8986_v40 = vcombine.low %v670_v29, %v674_v30  ;;  %v9018_v29 = vcombine.low %v702_v9, %v706_v10  ;;  %v742_v9 = vld [vmem:[#allocation6 + $0x8c8] sm:$0xff] }
 0x185   :  { %3623 = vmatpush1.bf16.msra.mxu0 %v8928_v35  ;;  %3787 = vmatpush1.bf16.msra.mxu1 %v8930_v36  ;;  %v677_v35 = vld [vmem:[#allocation6 + $0x6c0] sm:$0xff]  ;;  %v746_v10 = vld [vmem:[#allocation6 + $0x8e8] sm:$0xff] }
 0x186   :  { %3624 = vmatprep.subr.bf16.mxu0 %v8937_v37  ;;  %3788 = vmatprep.subr.bf16.mxu1 %v8939_v38  ;;  %v681_v36 = vld [vmem:[#allocation6 + $0x6e0] sm:$0xff]  ;;  %v678_v37 = vld [vmem:[#allocation6 + $0x6c8] sm:$0xff] }
 0x187   :  { %v682_v38 = vld [vmem:[#allocation6 + $0x6e8] sm:$0xff]  ;;  %v8993_v41 = vcombine.high %v677_v35, %v681_v36  ;;  %v8992_v53 = vcombine.low %v677_v35, %v681_v36 }
 0x188   :  { %v8995_v42 = vcombine.high %v678_v37, %v682_v38  ;;  %v8994_v54 = vcombine.low %v678_v37, %v682_v38  ;;  %v722_v35 = vld [vmem:[#allocation6 + $0x828] sm:$0xff] }
 0x189   :  { %3625 = vmatpush1.bf16.msra.mxu0 %v8936_v49  ;;  %3789 = vmatpush1.bf16.msra.mxu1 %v8938_v50  ;;  %v685_v49 = vld [vmem:[#allocation6 + $0x700] sm:$0xff] }
 0x18a   :  { %3626 = vmatprep.subr.bf16.mxu0 %v8945_v51  ;;  %3790 = vmatprep.subr.bf16.mxu1 %v8947_v52  ;;  %v689_v50 = vld [vmem:[#allocation6 + $0x720] sm:$0xff]  ;;  %v686_v51 = vld [vmem:[#allocation6 + $0x708] sm:$0xff] }
 0x18b   :  { %v690_v52 = vld [vmem:[#allocation6 + $0x728] sm:$0xff]  ;;  %v9001_v55 = vcombine.high %v685_v49, %v689_v50  ;;  %v9000_v63 = vcombine.low %v685_v49, %v689_v50 }
 0x18c   :  { %v9003_v56 = vcombine.high %v686_v51, %v690_v52  ;;  %v9002_v0 = vcombine.low %v686_v51, %v690_v52  ;;  %v726_v49 = vld [vmem:[#allocation6 + $0x848] sm:$0xff] }
 0x18d   :  { %3627 = vmatpush1.bf16.msra.mxu0 %v8944_v58  ;;  %3791 = vmatpush1.bf16.msra.mxu1 %v8946_v59  ;;  %v693_v58 = vld [vmem:[#allocation6 + $0x740] sm:$0xff]  ;;  %v730_v50 = vld [vmem:[#allocation6 + $0x868] sm:$0xff] }
 0x18e   :  { %3628 = vmatprep.subr.bf16.mxu0 %v8953_v60  ;;  %3792 = vmatprep.subr.bf16.mxu1 %v8955_v61  ;;  %v697_v59 = vld [vmem:[#allocation6 + $0x760] sm:$0xff]  ;;  %v694_v60 = vld [vmem:[#allocation6 + $0x748] sm:$0xff] }
 0x18f   :  { %v698_v61 = vld [vmem:[#allocation6 + $0x768] sm:$0xff] }
 0x190   :  { %v9010_v19 = vcombine.low %v694_v60, %v698_v61 }
 0x191   :  { %3629 = vmatpush1.bf16.msra.mxu0 %v8952_v2  ;;  %3793 = vmatpush1.bf16.msra.mxu1 %v8954_v3  ;;  %v9009_v2 = vcombine.high %v693_v58, %v697_v59  ;;  %v9011_v3 = vcombine.high %v694_v60, %v698_v61  ;;  %v738_v60 = vld [vmem:[#allocation6 + $0x8a8] sm:$0xff] }
 0x192   :  { %3630 = vmatprep.subr.bf16.mxu0 %v8961_v4  ;;  %3794 = vmatprep.subr.bf16.mxu1 %v8963_v6  ;;  %v701_v4 = vld [vmem:[#allocation6 + $0x780] sm:$0xff]  ;;  %v10572_v6 = vpop.f32.mrb[5].mxu1 }
 0x193   :  { %v9017_v20 = vcombine.high %v701_v4, %v705_v8  ;;  %v9016_v28 = vcombine.low %v701_v4, %v705_v8  ;;  %v741_v4 = vld [vmem:[#allocation6 + $0x8c0] sm:$0xff] }
 0x194   :  { %v745_v8 = vld [vmem:[#allocation6 + $0x8e0] sm:$0xff] }
 0x195   :  { %3631 = vmatpush1.bf16.msra.mxu0 %v8960_v12  ;;  %3795 = vmatpush1.bf16.msra.mxu1 %v8962_v13  ;;  %v442_v12 = vpop.f32.mrb[6].mxu1  ;;  %v168_v13 = vrot.slane %v10535_v46, %v10568_v62 }
 0x196   :  { %3632 = vmatprep.subr.bf16.mxu0 %v8969_v17  ;;  %3796 = vmatprep.subr.bf16.mxu1 %v8971_v18  ;;  %v443_v17 = vpop.f32.mrb[7].mxu1  ;;  %v9008_v18 = vcombine.low %v693_v58, %v697_v59  ;;  %v737_v58 = vld [vmem:[#allocation6 + $0x8a0] sm:$0xff]  ;;  %v734_v59 = vld [vmem:[#allocation6 + $0x888] sm:$0xff] }
 0x197   :  { %v357_v27 = vadd.f32 %v10549_v57, %v168_v13  ;;  %v9050_v13 = vcombine.low %v734_v59, %v738_v60  ;;  %v9057_v17 = vcombine.high %v741_v4, %v745_v8 }
 0x199   :  { %3633 = vmatpush1.bf16.msra.mxu0 %v8968_v23  ;;  %3797 = vmatpush1.bf16.msra.mxu1 %v8970_v24  ;;  %v713_v23 = vld [vmem:[#allocation6 + $0x7e0] sm:$0xff]  ;;  %v710_v24 = vld [vmem:[#allocation6 + $0x7c8] sm:$0xff]  ;;  %v447_v37 = vmax.f32 %v357_v27, 0.0 }
 0x19a   :  { %3634 = vmatprep.subr.bf16.mxu0 %v8977_v25  ;;  %3798 = vmatprep.subr.bf16.mxu1 %v8979_v26  ;;  %v714_v25 = vld [vmem:[#allocation6 + $0x7e8] sm:$0xff]  ;;  %v180_v26 = vrot.slane %v10535_v46, %v10575_v11  ;;  %v9025_v30 = vcombine.high %v709_v22, %v713_v23  ;;  %v9024_v38 = vcombine.low %v709_v22, %v713_v23  ;;  %v757_v27 = vld [vmem:[#allocation6 + $0x940] sm:$0xff] }
 0x19b   :  { %v10583_v52 = vpack.c.bf16 %v447_v37, %v447_v37  ;;  %v754_v22 = vld [vmem:[#allocation6 + $0x928] sm:$0xff]  ;;  %v9056_v23 = vcombine.low %v741_v4, %v745_v8  ;;  %v789_v4 = vld [vmem:[#allocation6 + $0xa40] sm:$0xff] }
 0x19c   :  { %v400_v36 = vadd.f32 %v10563_v16, %v180_v26  ;;  %v766_v37 = vld [vmem:[#allocation6 + $0x988] sm:$0xff]  ;;  %v793_v8 = vld [vmem:[#allocation6 + $0xa60] sm:$0xff] }
 0x19d   :  { %3635 = vmatpush1.bf16.msra.mxu0 %v8976_v31  ;;  %3799 = vmatpush1.bf16.msra.mxu1 %v8978_v32  ;;  %v9027_v31 = vcombine.high %v710_v24, %v714_v25  ;;  %v717_v32 = vld [vmem:[#allocation6 + $0x800] sm:$0xff] }
 0x19e   :  { %3636 = vmatprep.subr.bf16.mxu0 %v8985_v33  ;;  %3800 = vmatprep.subr.bf16.mxu1 %v8987_v34  ;;  %v721_v33 = vld [vmem:[#allocation6 + $0x820] sm:$0xff]  ;;  %v718_v34 = vld [vmem:[#allocation6 + $0x808] sm:$0xff]  ;;  %v450_v51 = vmax.f32 %v400_v36, 0.0 }
 0x19f   :  { %v9033_v57 = vcombine.high %v717_v32, %v721_v33  ;;  %v9034_v16 = vcombine.low %v718_v34, %v722_v35  ;;  %v769_v36 = vld [vmem:[#allocation6 + $0x9a0] sm:$0xff] }
 0x1a0   :  { %v10585_v61 = vpack.c.bf16 %v450_v51, %v450_v51  ;;  %v778_v51 = vld [vmem:[#allocation6 + $0x9e8] sm:$0xff] }
 0x1a1   :  { %3637 = vmatpush1.bf16.msra.mxu0 %v8984_v39  ;;  %3801 = vmatpush1.bf16.msra.mxu1 %v8986_v40  ;;  %v9026_v39 = vcombine.low %v710_v24, %v714_v25  ;;  %v9035_v40 = vcombine.high %v718_v34, %v722_v35  ;;  %v9058_v24 = vcombine.low %v742_v9, %v746_v10  ;;  %v765_v35 = vld [vmem:[#allocation6 + $0x980] sm:$0xff] }
 0x1a2   :  { %3638 = vmatprep.subr.bf16.mxu0 %v8993_v41  ;;  %3802 = vmatprep.subr.bf16.mxu1 %v8995_v42  ;;  %v725_v41 = vld [vmem:[#allocation6 + $0x840] sm:$0xff] }
 0x1a3   :  { %v729_v42 = vld [vmem:[#allocation6 + $0x860] sm:$0xff] }
 0x1a5   :  { %3639 = vmatpush1.bf16.msra.mxu0 %v8992_v53  ;;  %3803 = vmatpush1.bf16.msra.mxu1 %v8994_v54  ;;  %v9032_v53 = vcombine.low %v717_v32, %v721_v33  ;;  %v9041_v54 = vcombine.high %v725_v41, %v729_v42 }
 0x1a6   :  { %3640 = vmatprep.subr.bf16.mxu0 %v9001_v55  ;;  %3804 = vmatprep.subr.bf16.mxu1 %v9003_v56  ;;  %v9043_v55 = vcombine.high %v726_v49, %v730_v50  ;;  %v733_v56 = vld [vmem:[#allocation6 + $0x880] sm:$0xff] }
 0x1a7   :  { %v9048_v12 = vcombine.low %v733_v56, %v737_v58 }
 0x1a9   :  { %3641 = vmatpush1.bf16.msra.mxu0 %v9000_v63  ;;  %3805 = vmatpush1.bf16.msra.mxu1 %v9002_v0  ;;  %v9040_v63 = vcombine.low %v725_v41, %v729_v42  ;;  %v9042_v0 = vcombine.low %v726_v49, %v730_v50  ;;  %v773_v42 = vld [vmem:[#allocation6 + $0x9c0] sm:$0xff]  ;;  %v774_v50 = vld [vmem:[#allocation6 + $0x9c8] sm:$0xff] }
 0x1aa   :  { %3642 = vmatprep.subr.bf16.mxu0 %v9009_v2  ;;  %3806 = vmatprep.subr.bf16.mxu1 %v9011_v3  ;;  %v9049_v2 = vcombine.high %v733_v56, %v737_v58  ;;  %v9051_v3 = vcombine.high %v734_v59, %v738_v60  ;;  %v777_v49 = vld [vmem:[#allocation6 + $0x9e0] sm:$0xff]  ;;  %v782_v59 = vld [vmem:[#allocation6 + $0xa08] sm:$0xff] }
 0x1ab   :  { %v781_v56 = vld [vmem:[#allocation6 + $0xa00] sm:$0xff]  ;;  %v786_v60 = vld [vmem:[#allocation6 + $0xa28] sm:$0xff] }
 0x1ac   :  { %v785_v58 = vld [vmem:[#allocation6 + $0xa20] sm:$0xff] }
 0x1ad   :  { %3643 = vmatpush1.bf16.msra.mxu0 %v9008_v18  ;;  %3807 = vmatpush1.bf16.msra.mxu1 %v9010_v19  ;;  %v9059_v18 = vcombine.high %v742_v9, %v746_v10  ;;  %v749_v19 = vld [vmem:[#allocation6 + $0x900] sm:$0xff]  ;;  %v790_v9 = vld [vmem:[#allocation6 + $0xa48] sm:$0xff] }
 0x1ae   :  { %3644 = vmatprep.subr.bf16.mxu0 %v9017_v20  ;;  %3808 = vmatprep.subr.bf16.mxu1 %v9019_v21  ;;  %v753_v20 = vld [vmem:[#allocation6 + $0x920] sm:$0xff]  ;;  %v750_v21 = vld [vmem:[#allocation6 + $0x908] sm:$0xff] }
 0x1af   :  { %v9065_v25 = vcombine.high %v749_v19, %v753_v20  ;;  %v9067_v26 = vcombine.high %v750_v21, %v754_v22  ;;  %v9066_v32 = vcombine.low %v750_v21, %v754_v22  ;;  %v794_v10 = vld [vmem:[#allocation6 + $0xa68] sm:$0xff] }
 0x1b0   :  { %v798_v21 = vld [vmem:[#allocation6 + $0xa88] sm:$0xff] }
 0x1b1   :  { %3645 = vmatpush1.bf16.msra.mxu0 %v9016_v28  ;;  %3809 = vmatpush1.bf16.msra.mxu1 %v9018_v29  ;;  %v761_v28 = vld [vmem:[#allocation6 + $0x960] sm:$0xff]  ;;  %v758_v29 = vld [vmem:[#allocation6 + $0x948] sm:$0xff] }
 0x1b2   :  { %3646 = vmatprep.subr.bf16.mxu0 %v9025_v30  ;;  %3810 = vmatprep.subr.bf16.mxu1 %v9027_v31  ;;  %v762_v30 = vld [vmem:[#allocation6 + $0x968] sm:$0xff]  ;;  %v9064_v31 = vcombine.low %v749_v19, %v753_v20  ;;  %v9073_v33 = vcombine.high %v757_v27, %v761_v28  ;;  %v797_v19 = vld [vmem:[#allocation6 + $0xa80] sm:$0xff] }
 0x1b3   :  { %v9075_v34 = vcombine.high %v758_v29, %v762_v30  ;;  %v801_v20 = vld [vmem:[#allocation6 + $0xaa0] sm:$0xff]  ;;  %v802_v22 = vld [vmem:[#allocation6 + $0xaa8] sm:$0xff] }
 0x1b5   :  { %3647 = vmatpush1.bf16.msra.mxu0 %v9024_v38  ;;  %3811 = vmatpush1.bf16.msra.mxu1 %v9026_v39  ;;  %v770_v38 = vld [vmem:[#allocation6 + $0x9a8] sm:$0xff]  ;;  %v9072_v39 = vcombine.low %v757_v27, %v761_v28  ;;  %v805_v27 = vld [vmem:[#allocation6 + $0xac0] sm:$0xff] }
 0x1b6   :  { %3657 = vmatprep.subr.bf16.mxu0 %v9033_v57  ;;  %3821 = vmatprep.subr.bf16.mxu1 %v9035_v40  ;;  %v9074_v57 = vcombine.low %v758_v29, %v762_v30  ;;  %v9081_v40 = vcombine.high %v765_v35, %v769_v36  ;;  %v9083_v41 = vcombine.high %v766_v37, %v770_v38  ;;  %v809_v28 = vld [vmem:[#allocation6 + $0xae0] sm:$0xff]  ;;  %v806_v29 = vld [vmem:[#allocation6 + $0xac8] sm:$0xff] }
 0x1b7   :  { %v810_v30 = vld [vmem:[#allocation6 + $0xae8] sm:$0xff] }
 0x1b8   :  { %3649 = vmatmul.mubr.bf16.vlgmr.msra.gmra.mrb[8].mxu0 %v10583_v52  ;;  %3813 = vmatmul.mubr.bf16.vlgmr.msra.gmra.mrb[8].mxu1 %v10583_v52 }
 0x1b9   :  { %3658 = vmatpush1.bf16.msra.mxu0 %v9032_v53  ;;  %3822 = vmatpush1.bf16.msra.mxu1 %v9034_v16  ;;  %v9080_v53 = vcombine.low %v765_v35, %v769_v36  ;;  %v9082_v16 = vcombine.low %v766_v37, %v770_v38  ;;  %v813_v35 = vld [vmem:[#allocation6 + $0xb00] sm:$0xff]  ;;  %v814_v37 = vld [vmem:[#allocation6 + $0xb08] sm:$0xff] }
 0x1ba   :  { %3659 = vmatprep.subr.bf16.mxu0 %v9041_v54  ;;  %3823 = vmatprep.subr.bf16.mxu1 %v9043_v55  ;;  %v9089_v54 = vcombine.high %v773_v42, %v777_v49  ;;  %v9091_v55 = vcombine.high %v774_v50, %v778_v51  ;;  %v817_v36 = vld [vmem:[#allocation6 + $0xb20] sm:$0xff]  ;;  %v818_v38 = vld [vmem:[#allocation6 + $0xb28] sm:$0xff] }
 0x1bb   :  { %3689 = vmatprep.mubr.bf16.mxu0 %v10585_v61  ;;  %3853 = vmatprep.mubr.bf16.mxu1 %v10585_v61 }
 0x1bd   :  { %3660 = vmatpush1.bf16.msra.mxu0 %v9040_v63  ;;  %3824 = vmatpush1.bf16.msra.mxu1 %v9042_v0  ;;  %v9088_v63 = vcombine.low %v773_v42, %v777_v49  ;;  %v9090_v0 = vcombine.low %v774_v50, %v778_v51  ;;  %v821_v42 = vld [vmem:[#allocation6 + $0xb40] sm:$0xff]  ;;  %v822_v50 = vld [vmem:[#allocation6 + $0xb48] sm:$0xff] }
 0x1be   :  { %3661 = vmatprep.subr.bf16.mxu0 %v9049_v2  ;;  %3825 = vmatprep.subr.bf16.mxu1 %v9051_v3  ;;  %v9097_v2 = vcombine.high %v781_v56, %v785_v58  ;;  %v9099_v3 = vcombine.high %v782_v59, %v786_v60  ;;  %v825_v49 = vld [vmem:[#allocation6 + $0xb60] sm:$0xff]  ;;  %v826_v51 = vld [vmem:[#allocation6 + $0xb68] sm:$0xff] }
 0x1c1   :  { %3662 = vmatpush1.bf16.msra.mxu0 %v9048_v12  ;;  %3826 = vmatpush1.bf16.msra.mxu1 %v9050_v13  ;;  %v9096_v12 = vcombine.low %v781_v56, %v785_v58  ;;  %v9098_v13 = vcombine.low %v782_v59, %v786_v60  ;;  %v9139_v56 = vcombine.high %v822_v50, %v826_v51  ;;  %v829_v58 = vld [vmem:[#allocation6 + $0xb80] sm:$0xff]  ;;  %v830_v60 = vld [vmem:[#allocation6 + $0xb88] sm:$0xff] }
 0x1c2   :  { %3663 = vmatprep.subr.bf16.mxu0 %v9057_v17  ;;  %3827 = vmatprep.subr.bf16.mxu1 %v9059_v18  ;;  %v9105_v17 = vcombine.high %v789_v4, %v793_v8  ;;  %v9107_v18 = vcombine.high %v790_v9, %v794_v10  ;;  %v833_v59 = vld [vmem:[#allocation6 + $0xba0] sm:$0xff] }
 0x1c5   :  { %3664 = vmatpush1.bf16.msra.mxu0 %v9056_v23  ;;  %3828 = vmatpush1.bf16.msra.mxu1 %v9058_v24  ;;  %v9104_v23 = vcombine.low %v789_v4, %v793_v8  ;;  %v9106_v24 = vcombine.low %v790_v9, %v794_v10  ;;  %v9138_v4 = vcombine.low %v822_v50, %v826_v51  ;;  %v837_v10 = vld [vmem:[#allocation6 + $0xbc0] sm:$0xff] }
 0x1c6   :  { %3665 = vmatprep.subr.bf16.mxu0 %v9065_v25  ;;  %3829 = vmatprep.subr.bf16.mxu1 %v9067_v26  ;;  %v9113_v25 = vcombine.high %v797_v19, %v801_v20  ;;  %v9115_v26 = vcombine.high %v798_v21, %v802_v22  ;;  %v9145_v8 = vcombine.high %v829_v58, %v833_v59 }
 0x1c9   :  { %3666 = vmatpush1.bf16.msra.mxu0 %v9064_v31  ;;  %3830 = vmatpush1.bf16.msra.mxu1 %v9066_v32  ;;  %v9112_v31 = vcombine.low %v797_v19, %v801_v20  ;;  %v9114_v32 = vcombine.low %v798_v21, %v802_v22  ;;  %v9144_v20 = vcombine.low %v829_v58, %v833_v59  ;;  %v873_v58 = vld [vmem:[#allocation6 + $0xce0] sm:$0xff]  ;;  %v870_v59 = vld [vmem:[#allocation6 + $0xcc8] sm:$0xff] }
 0x1ca   :  { %3667 = vmatprep.subr.bf16.mxu0 %v9073_v33  ;;  %3831 = vmatprep.subr.bf16.mxu1 %v9075_v34  ;;  %v9121_v33 = vcombine.high %v805_v27, %v809_v28  ;;  %v9123_v34 = vcombine.high %v806_v29, %v810_v30 }
 0x1cd   :  { %3668 = vmatpush1.bf16.msra.mxu0 %v9072_v39  ;;  %3832 = vmatpush1.bf16.msra.mxu1 %v9074_v57  ;;  %v9120_v39 = vcombine.low %v805_v27, %v809_v28  ;;  %v9122_v57 = vcombine.low %v806_v29, %v810_v30  ;;  %v850_v27 = vld [vmem:[#allocation6 + $0xc28] sm:$0xff] }
 0x1ce   :  { %3669 = vmatprep.subr.bf16.mxu0 %v9081_v40  ;;  %3833 = vmatprep.subr.bf16.mxu1 %v9083_v41  ;;  %v9129_v40 = vcombine.high %v813_v35, %v817_v36  ;;  %v9131_v41 = vcombine.high %v814_v37, %v818_v38 }
 0x1d1   :  { %3670 = vmatpush1.bf16.msra.mxu0 %v9080_v53  ;;  %3834 = vmatpush1.bf16.msra.mxu1 %v9082_v16  ;;  %v10592_v53 = vsub.s32 4, %v10530_v44  ;;  %v9128_v16 = vcombine.low %v813_v35, %v817_v36  ;;  %v858_v35 = vld [vmem:[#allocation6 + $0xc68] sm:$0xff] }
 0x1d2   :  { %3671 = vmatprep.subr.bf16.mxu0 %v9089_v54  ;;  %3835 = vmatprep.subr.bf16.mxu1 %v9091_v55  ;;  %v9130_v54 = vcombine.low %v814_v37, %v818_v38  ;;  %v9137_v55 = vcombine.high %v821_v42, %v825_v49 }
 0x1d5   :  { %3672 = vmatpush1.bf16.msra.mxu0 %v9088_v63  ;;  %3836 = vmatpush1.bf16.msra.mxu1 %v9090_v0  ;;  %v834_v63 = vld [vmem:[#allocation6 + $0xba8] sm:$0xff]  ;;  %v10595_v0 = vsub.s32 7, %v10530_v44 }
 0x1d6   :  { %3673 = vmatprep.subr.bf16.mxu0 %v9097_v2  ;;  %3837 = vmatprep.subr.bf16.mxu1 %v9099_v3  ;;  %v176_v2 = vrot.slane %v10535_v46, %v10592_v53  ;;  %v9136_v3 = vcombine.low %v821_v42, %v825_v49  ;;  %v9147_v9 = vcombine.high %v830_v60, %v834_v63  ;;  %v862_v42 = vld [vmem:[#allocation6 + $0xc88] sm:$0xff] }
 0x1d7   :  { %v9146_v21 = vcombine.low %v830_v60, %v834_v63  ;;  %v866_v49 = vld [vmem:[#allocation6 + $0xca8] sm:$0xff] }
 0x1d8   :  { %v398_v19 = vadd.f32 %v10559_v15, %v176_v2  ;;  %v874_v60 = vld [vmem:[#allocation6 + $0xce8] sm:$0xff]  ;;  %v9178_v2 = vcombine.low %v862_v42, %v866_v49 }
 0x1d9   :  { %3674 = vmatpush1.bf16.msra.mxu0 %v9096_v12  ;;  %3838 = vmatpush1.bf16.msra.mxu1 %v9098_v13  ;;  %v841_v12 = vld [vmem:[#allocation6 + $0xbe0] sm:$0xff]  ;;  %v838_v13 = vld [vmem:[#allocation6 + $0xbc8] sm:$0xff] }
 0x1da   :  { %3675 = vmatprep.subr.bf16.mxu0 %v9105_v17  ;;  %3839 = vmatprep.subr.bf16.mxu1 %v9107_v18  ;;  %v842_v17 = vld [vmem:[#allocation6 + $0xbe8] sm:$0xff]  ;;  %v188_v18 = vrot.slane %v10535_v46, %v10595_v0  ;;  %v9153_v22 = vcombine.high %v837_v10, %v841_v12  ;;  %v449_v29 = vmax.f32 %v398_v19, 0.0  ;;  %v9152_v46 = vcombine.low %v837_v10, %v841_v12 }
 0x1db   :  { %v9154_v30 = vcombine.low %v838_v13, %v842_v17  ;;  %v878_v10 = vld [vmem:[#allocation6 + $0xd08] sm:$0xff] }
 0x1dc   :  { %v441_v28 = vadd.f32 %v10572_v6, %v188_v18  ;;  %v10603_v37 = vpack.c.bf16 %v449_v29, %v449_v29  ;;  %v882_v12 = vld [vmem:[#allocation6 + $0xd28] sm:$0xff]  ;;  %v897_v29 = vld [vmem:[#allocation6 + $0xda0] sm:$0xff] }
 0x1dd   :  { %3676 = vmatpush1.bf16.msra.mxu0 %v9104_v23  ;;  %3840 = vmatpush1.bf16.msra.mxu1 %v9106_v24  ;;  %v9155_v23 = vcombine.high %v838_v13, %v842_v17  ;;  %v845_v24 = vld [vmem:[#allocation6 + $0xc00] sm:$0xff]  ;;  %v9186_v17 = vcombine.low %v870_v59, %v874_v60  ;;  %v9195_v19 = vcombine.high %v878_v10, %v882_v12 }
 0x1de   :  { %3677 = vmatprep.subr.bf16.mxu0 %v9113_v25  ;;  %3841 = vmatprep.subr.bf16.mxu1 %v9115_v26  ;;  %v849_v25 = vld [vmem:[#allocation6 + $0xc20] sm:$0xff]  ;;  %v846_v26 = vld [vmem:[#allocation6 + $0xc08] sm:$0xff]  ;;  %v452_v36 = vmax.f32 %v441_v28, 0.0 }
 0x1df   :  { %v9161_v15 = vcombine.high %v845_v24, %v849_v25  ;;  %v9160_v38 = vcombine.low %v845_v24, %v849_v25  ;;  %v9162_v6 = vcombine.low %v846_v26, %v850_v27  ;;  %v9194_v25 = vcombine.low %v878_v10, %v882_v12  ;;  %v893_v28 = vld [vmem:[#allocation6 + $0xd80] sm:$0xff]  ;;  %v926_v12 = vld [vmem:[#allocation6 + $0xe88] sm:$0xff] }
 0x1e0   :  { %v10605_v50 = vpack.c.bf16 %v452_v36, %v452_v36  ;;  %v902_v36 = vld [vmem:[#allocation6 + $0xdc8] sm:$0xff]  ;;  %v929_v10 = vld [vmem:[#allocation6 + $0xea0] sm:$0xff] }
 0x1e1   :  { %3678 = vmatpush1.bf16.msra.mxu0 %v9112_v31  ;;  %3842 = vmatpush1.bf16.msra.mxu1 %v9114_v32  ;;  %v9163_v31 = vcombine.high %v846_v26, %v850_v27  ;;  %v853_v32 = vld [vmem:[#allocation6 + $0xc40] sm:$0xff] }
 0x1e2   :  { %3679 = vmatprep.subr.bf16.mxu0 %v9121_v33  ;;  %3843 = vmatprep.subr.bf16.mxu1 %v9123_v34  ;;  %v857_v33 = vld [vmem:[#allocation6 + $0xc60] sm:$0xff]  ;;  %v854_v34 = vld [vmem:[#allocation6 + $0xc48] sm:$0xff] }
 0x1e3   :  { %v9168_v51 = vcombine.low %v853_v32, %v857_v33 }
 0x1e5   :  { %3680 = vmatpush1.bf16.msra.mxu0 %v9120_v39  ;;  %3844 = vmatpush1.bf16.msra.mxu1 %v9122_v57  ;;  %v9169_v39 = vcombine.high %v853_v32, %v857_v33  ;;  %v9171_v57 = vcombine.high %v854_v34, %v858_v35  ;;  %v9209_v32 = vcombine.high %v893_v28, %v897_v29 }
 0x1e6   :  { %3681 = vmatprep.subr.bf16.mxu0 %v9129_v40  ;;  %3845 = vmatprep.subr.bf16.mxu1 %v9131_v41  ;;  %v861_v40 = vld [vmem:[#allocation6 + $0xc80] sm:$0xff] }
 0x1e7   :  { %v865_v41 = vld [vmem:[#allocation6 + $0xca0] sm:$0xff] }
 0x1e8   :  { %v9176_v63 = vcombine.low %v861_v40, %v865_v41 }
 0x1e9   :  { %3682 = vmatpush1.bf16.msra.mxu0 %v9128_v16  ;;  %3846 = vmatpush1.bf16.msra.mxu1 %v9130_v54  ;;  %v9170_v16 = vcombine.low %v854_v34, %v858_v35  ;;  %v9177_v54 = vcombine.high %v861_v40, %v865_v41  ;;  %v901_v34 = vld [vmem:[#allocation6 + $0xdc0] sm:$0xff] }
 0x1ea   :  { %3683 = vmatprep.subr.bf16.mxu0 %v9137_v55  ;;  %3847 = vmatprep.subr.bf16.mxu1 %v9139_v56  ;;  %v9179_v55 = vcombine.high %v862_v42, %v866_v49  ;;  %v869_v56 = vld [vmem:[#allocation6 + $0xcc0] sm:$0xff]  ;;  %v910_v49 = vld [vmem:[#allocation6 + $0xe08] sm:$0xff] }
 0x1eb   :  { %v9184_v13 = vcombine.low %v869_v56, %v873_v58  ;;  %v905_v35 = vld [vmem:[#allocation6 + $0xde0] sm:$0xff] }
 0x1ec   :  { %v909_v41 = vld [vmem:[#allocation6 + $0xe00] sm:$0xff] }
 0x1ed   :  { %3684 = vmatpush1.bf16.msra.mxu0 %v9136_v3  ;;  %3848 = vmatpush1.bf16.msra.mxu1 %v9138_v4  ;;  %v9185_v3 = vcombine.high %v869_v56, %v873_v58  ;;  %v9187_v4 = vcombine.high %v870_v59, %v874_v60  ;;  %v913_v42 = vld [vmem:[#allocation6 + $0xe20] sm:$0xff]  ;;  %v918_v60 = vld [vmem:[#allocation6 + $0xe48] sm:$0xff] }
 0x1ee   :  { %3685 = vmatprep.subr.bf16.mxu0 %v9145_v8  ;;  %3849 = vmatprep.subr.bf16.mxu1 %v9147_v9  ;;  %v877_v8 = vld [vmem:[#allocation6 + $0xd00] sm:$0xff] }
 0x1ef   :  { %v881_v9 = vld [vmem:[#allocation6 + $0xd20] sm:$0xff] }
 0x1f0   :  { %v9193_v18 = vcombine.high %v877_v8, %v881_v9  ;;  %v9192_v24 = vcombine.low %v877_v8, %v881_v9  ;;  %v917_v58 = vld [vmem:[#allocation6 + $0xe40] sm:$0xff] }
 0x1f1   :  { %3686 = vmatpush1.bf16.msra.mxu0 %v9144_v20  ;;  %3850 = vmatpush1.bf16.msra.mxu1 %v9146_v21  ;;  %v885_v20 = vld [vmem:[#allocation6 + $0xd40] sm:$0xff] }
 0x1f2   :  { %3687 = vmatprep.subr.bf16.mxu0 %v9153_v22  ;;  %3851 = vmatprep.subr.bf16.mxu1 %v9155_v23  ;;  %v889_v21 = vld [vmem:[#allocation6 + $0xd60] sm:$0xff]  ;;  %v886_v22 = vld [vmem:[#allocation6 + $0xd48] sm:$0xff] }
 0x1f3   :  { %v890_v23 = vld [vmem:[#allocation6 + $0xd68] sm:$0xff]  ;;  %v9201_v26 = vcombine.high %v885_v20, %v889_v21  ;;  %v921_v59 = vld [vmem:[#allocation6 + $0xe60] sm:$0xff] }
 0x1f4   :  { %v9203_v27 = vcombine.high %v886_v22, %v890_v23  ;;  %v925_v9 = vld [vmem:[#allocation6 + $0xe80] sm:$0xff] }
 0x1f5   :  { %3688 = vmatpush1.bf16.msra.mxu0 %v9152_v46  ;;  %3852 = vmatpush1.bf16.msra.mxu1 %v9154_v30  ;;  %v894_v46 = vld [vmem:[#allocation6 + $0xd88] sm:$0xff] }
 0x1f6   :  { %3698 = vmatprep.subr.bf16.mxu0 %v9161_v15  ;;  %3862 = vmatprep.subr.bf16.mxu1 %v9163_v31  ;;  %v898_v30 = vld [vmem:[#allocation6 + $0xda8] sm:$0xff]  ;;  %v9200_v15 = vcombine.low %v885_v20, %v889_v21  ;;  %v9202_v31 = vcombine.low %v886_v22, %v890_v23  ;;  %v933_v21 = vld [vmem:[#allocation6 + $0xec0] sm:$0xff] }
 0x1f7   :  { %v9211_v33 = vcombine.high %v894_v46, %v898_v30  ;;  %v937_v22 = vld [vmem:[#allocation6 + $0xee0] sm:$0xff]  ;;  %v934_v23 = vld [vmem:[#allocation6 + $0xec8] sm:$0xff] }
 0x1f8   :  { %3690 = vmatmul.mubr.bf16.vlgmr.msra.gmra.mrb[8].mxu0 %v10603_v37  ;;  %3854 = vmatmul.mubr.bf16.vlgmr.msra.gmra.mrb[8].mxu1 %v10603_v37 }
 0x1f9   :  { %3699 = vmatpush1.bf16.msra.mxu0 %v9160_v38  ;;  %3863 = vmatpush1.bf16.msra.mxu1 %v9162_v6  ;;  %v906_v38 = vld [vmem:[#allocation6 + $0xde8] sm:$0xff]  ;;  %v9208_v6 = vcombine.low %v893_v28, %v897_v29  ;;  %v941_v29 = vld [vmem:[#allocation6 + $0xf00] sm:$0xff] }
 0x1fa   :  { %3700 = vmatprep.subr.bf16.mxu0 %v9169_v39  ;;  %3864 = vmatprep.subr.bf16.mxu1 %v9171_v57  ;;  %v9210_v39 = vcombine.low %v894_v46, %v898_v30  ;;  %v9217_v57 = vcombine.high %v901_v34, %v905_v35  ;;  %v9219_v40 = vcombine.high %v902_v36, %v906_v38  ;;  %v945_v46 = vld [vmem:[#allocation6 + $0xf20] sm:$0xff]  ;;  %v942_v30 = vld [vmem:[#allocation6 + $0xf08] sm:$0xff] }
 0x1fb   :  { %3730 = vmatprep.mubr.bf16.mxu0 %v10605_v50  ;;  %3894 = vmatprep.mubr.bf16.mxu1 %v10605_v50 }
 0x1fd   :  { %3701 = vmatpush1.bf16.msra.mxu0 %v9168_v51  ;;  %3865 = vmatpush1.bf16.msra.mxu1 %v9170_v16  ;;  %v914_v51 = vld [vmem:[#allocation6 + $0xe28] sm:$0xff]  ;;  %v9216_v16 = vcombine.low %v901_v34, %v905_v35  ;;  %v949_v35 = vld [vmem:[#allocation6 + $0xf40] sm:$0xff] }
 0x1fe   :  { %3702 = vmatprep.subr.bf16.mxu0 %v9177_v54  ;;  %3866 = vmatprep.subr.bf16.mxu1 %v9179_v55  ;;  %v9218_v54 = vcombine.low %v902_v36, %v906_v38  ;;  %v9225_v55 = vcombine.high %v909_v41, %v913_v42  ;;  %v9227_v56 = vcombine.high %v910_v49, %v914_v51  ;;  %v953_v36 = vld [vmem:[#allocation6 + $0xf60] sm:$0xff]  ;;  %v950_v38 = vld [vmem:[#allocation6 + $0xf48] sm:$0xff] }
 0x201   :  { %3703 = vmatpush1.bf16.msra.mxu0 %v9176_v63  ;;  %3867 = vmatpush1.bf16.msra.mxu1 %v9178_v2  ;;  %v922_v63 = vld [vmem:[#allocation6 + $0xe68] sm:$0xff]  ;;  %v9224_v2 = vcombine.low %v909_v41, %v913_v42  ;;  %v9265_v41 = vcombine.high %v949_v35, %v953_v36 }
 0x202   :  { %3704 = vmatprep.subr.bf16.mxu0 %v9185_v3  ;;  %3868 = vmatprep.subr.bf16.mxu1 %v9187_v4  ;;  %v9226_v3 = vcombine.low %v910_v49, %v914_v51  ;;  %v9233_v4 = vcombine.high %v917_v58, %v921_v59  ;;  %v9235_v8 = vcombine.high %v918_v60, %v922_v63  ;;  %v957_v49 = vld [vmem:[#allocation6 + $0xf80] sm:$0xff] }
 0x203   :  { %v961_v51 = vld [vmem:[#allocation6 + $0xfa0] sm:$0xff] }
 0x205   :  { %3705 = vmatpush1.bf16.msra.mxu0 %v9184_v13  ;;  %3869 = vmatpush1.bf16.msra.mxu1 %v9186_v17  ;;  %v930_v13 = vld [vmem:[#allocation6 + $0xea8] sm:$0xff]  ;;  %v9232_v17 = vcombine.low %v917_v58, %v921_v59  ;;  %v10142_v58 = vld [vmem:[#allocation4] sm:$0xff] }
 0x206   :  { %3706 = vmatprep.subr.bf16.mxu0 %v9193_v18  ;;  %3870 = vmatprep.subr.bf16.mxu1 %v9195_v19  ;;  %v9234_v18 = vcombine.low %v918_v60, %v922_v63  ;;  %v9241_v19 = vcombine.high %v925_v9, %v929_v10  ;;  %v9243_v20 = vcombine.high %v926_v12, %v930_v13  ;;  %v965_v63 = vld [vmem:[#allocation6 + $0xfc0] sm:$0xff] }
 0x207   :  { %v9273_v60 = vcombine.high %v957_v49, %v961_v51 }
 0x209   :  { %3707 = vmatpush1.bf16.msra.mxu0 %v9192_v24  ;;  %3871 = vmatpush1.bf16.msra.mxu1 %v9194_v25  ;;  %v938_v24 = vld [vmem:[#allocation6 + $0xee8] sm:$0xff]  ;;  %v9240_v25 = vcombine.low %v925_v9, %v929_v10 }
 0x20a   :  { %3708 = vmatprep.subr.bf16.mxu0 %v9201_v26  ;;  %3872 = vmatprep.subr.bf16.mxu1 %v9203_v27  ;;  %v9242_v26 = vcombine.low %v926_v12, %v930_v13  ;;  %v9249_v27 = vcombine.high %v933_v21, %v937_v22  ;;  %v9251_v28 = vcombine.high %v934_v23, %v938_v24 }
 0x20d   :  { %3709 = vmatpush1.bf16.msra.mxu0 %v9200_v15  ;;  %3873 = vmatpush1.bf16.msra.mxu1 %v9202_v31  ;;  %v946_v15 = vld [vmem:[#allocation6 + $0xf28] sm:$0xff]  ;;  %v9248_v31 = vcombine.low %v933_v21, %v937_v22 }
 0x20e   :  { %3710 = vmatprep.subr.bf16.mxu0 %v9209_v32  ;;  %3874 = vmatprep.subr.bf16.mxu1 %v9211_v33  ;;  %v9250_v32 = vcombine.low %v934_v23, %v938_v24  ;;  %v9257_v33 = vcombine.high %v941_v29, %v945_v46  ;;  %v9259_v34 = vcombine.high %v942_v30, %v946_v15 }
 0x211   :  { %3711 = vmatpush1.bf16.msra.mxu0 %v9208_v6  ;;  %3875 = vmatpush1.bf16.msra.mxu1 %v9210_v39  ;;  %v954_v6 = vld [vmem:[#allocation6 + $0xf68] sm:$0xff]  ;;  %v9256_v39 = vcombine.low %v941_v29, %v945_v46 }
 0x212   :  { %3712 = vmatprep.subr.bf16.mxu0 %v9217_v57  ;;  %3876 = vmatprep.subr.bf16.mxu1 %v9219_v40  ;;  %v9258_v57 = vcombine.low %v942_v30, %v946_v15  ;;  %v10612_v40 = vsub.s32 6, %v10530_v44  ;;  %v9267_v42 = vcombine.high %v950_v38, %v954_v6 }
 0x214   :  { %v184_v59 = vrot.slane %v10142_v58, %v10612_v40  ;;  %v499_v58 = vld [vmem:[#allocation6 + $0x130] sm:$0xff] }
 0x215   :  { %3713 = vmatpush1.bf16.msra.mxu0 %v9216_v16  ;;  %3877 = vmatpush1.bf16.msra.mxu1 %v9218_v54  ;;  %v958_v16 = vld [vmem:[#allocation6 + $0xf88] sm:$0xff] }
 0x216   :  { %3714 = vmatprep.subr.bf16.mxu0 %v9225_v55  ;;  %3878 = vmatprep.subr.bf16.mxu1 %v9227_v56  ;;  %v962_v54 = vld [vmem:[#allocation6 + $0xfa8] sm:$0xff]  ;;  %v9264_v55 = vcombine.low %v949_v35, %v953_v36  ;;  %v9266_v56 = vcombine.low %v950_v38, %v954_v6  ;;  %v439_v10 = vadd.f32 %v10570_v1, %v184_v59  ;;  %v472_v1 = vld [vmem:[#allocation6 + $0x58] sm:$0xff] }
 0x217   :  { %v9275_v44 = vcombine.high %v958_v16, %v962_v54  ;;  %v9274_v9 = vcombine.low %v958_v16, %v962_v54  ;;  %v484_v35 = vld [vmem:[#allocation6 + $0xb8] sm:$0xff] }
 0x218   :  { %v451_v23 = vmax.f32 %v439_v10, 0.0  ;;  %v500_v59 = vld [vmem:[#allocation6 + $0x138] sm:$0xff] }
 0x219   :  { %3715 = vmatpush1.bf16.msra.mxu0 %v9224_v2  ;;  %3879 = vmatpush1.bf16.msra.mxu1 %v9226_v3  ;;  %v969_v2 = vld [vmem:[#allocation6 + $0xfe0] sm:$0xff]  ;;  %v966_v3 = vld [vmem:[#allocation6 + $0xfc8] sm:$0xff] }
 0x21a   :  { %3716 = vmatprep.subr.bf16.mxu0 %v9233_v4  ;;  %3880 = vmatprep.subr.bf16.mxu1 %v9235_v8  ;;  %v970_v4 = vld [vmem:[#allocation6 + $0xfe8] sm:$0xff]  ;;  %v9272_v8 = vcombine.low %v957_v49, %v961_v51  ;;  %v9281_v12 = vcombine.high %v965_v63, %v969_v2  ;;  %v9280_v21 = vcombine.low %v965_v63, %v969_v2  ;;  %v492_v49 = vld [vmem:[#allocation6 + $0xf8] sm:$0xff] }
 0x21b   :  { %v9283_v13 = vcombine.high %v966_v3, %v970_v4  ;;  %v9282_v22 = vcombine.low %v966_v3, %v970_v4  ;;  %v10616_v46 = vpack.c.bf16 %v451_v23, %v451_v23  ;;  %v503_v3 = vld [vmem:[#allocation6 + $0x150] sm:$0xff] }
 0x21c   :  { %v507_v4 = vld [vmem:[#allocation6 + $0x170] sm:$0xff] }
 0x21d   :  { %3717 = vmatpush1.bf16.msra.mxu0 %v9232_v17  ;;  %3881 = vmatpush1.bf16.msra.mxu1 %v9234_v18  ;;  %v463_v17 = vld [vmem:[#allocation6 + $0x10] sm:$0xff] }
 0x21e   :  { %3718 = vmatprep.subr.bf16.mxu0 %v9241_v19  ;;  %3882 = vmatprep.subr.bf16.mxu1 %v9243_v20  ;;  %v467_v18 = vld [vmem:[#allocation6 + $0x30] sm:$0xff]  ;;  %v464_v19 = vld [vmem:[#allocation6 + $0x18] sm:$0xff] }
 0x21f   :  { %v468_v20 = vld [vmem:[#allocation6 + $0x38] sm:$0xff]  ;;  %v8781_v24 = vcombine.high %v463_v17, %v467_v18  ;;  %v8780_v29 = vcombine.low %v463_v17, %v467_v18  ;;  %v511_v18 = vld [vmem:[#allocation6 + $0x190] sm:$0xff] }
 0x220   :  { %v8782_v30 = vcombine.low %v464_v19, %v468_v20 }
 0x221   :  { %3719 = vmatpush1.bf16.msra.mxu0 %v9240_v25  ;;  %3883 = vmatpush1.bf16.msra.mxu1 %v9242_v26  ;;  %v8783_v25 = vcombine.high %v464_v19, %v468_v20  ;;  %v471_v26 = vld [vmem:[#allocation6 + $0x50] sm:$0xff]  ;;  %v512_v20 = vld [vmem:[#allocation6 + $0x198] sm:$0xff] }
 0x222   :  { %3720 = vmatprep.subr.bf16.mxu0 %v9249_v27  ;;  %3884 = vmatprep.subr.bf16.mxu1 %v9251_v28  ;;  %v475_v27 = vld [vmem:[#allocation6 + $0x70] sm:$0xff]  ;;  %v476_v28 = vld [vmem:[#allocation6 + $0x78] sm:$0xff] }
 0x223   :  { %v8789_v15 = vcombine.high %v471_v26, %v475_v27  ;;  %v8788_v36 = vcombine.low %v471_v26, %v475_v27  ;;  %v8790_v38 = vcombine.low %v472_v1, %v476_v28  ;;  %v515_v19 = vld [vmem:[#allocation6 + $0x1b0] sm:$0xff] }
 0x224   :  { %v519_v26 = vld [vmem:[#allocation6 + $0x1d0] sm:$0xff] }
 0x225   :  { %3721 = vmatpush1.bf16.msra.mxu0 %v9248_v31  ;;  %3885 = vmatpush1.bf16.msra.mxu1 %v9250_v32  ;;  %v8791_v31 = vcombine.high %v472_v1, %v476_v28  ;;  %v479_v32 = vld [vmem:[#allocation6 + $0x90] sm:$0xff]  ;;  %v520_v1 = vld [vmem:[#allocation6 + $0x1d8] sm:$0xff] }
 0x226   :  { %3722 = vmatprep.subr.bf16.mxu0 %v9257_v33  ;;  %3886 = vmatprep.subr.bf16.mxu1 %v9259_v34  ;;  %v483_v33 = vld [vmem:[#allocation6 + $0xb0] sm:$0xff]  ;;  %v480_v34 = vld [vmem:[#allocation6 + $0x98] sm:$0xff] }
 0x227   :  { %v8797_v6 = vcombine.high %v479_v32, %v483_v33  ;;  %v8796_v51 = vcombine.low %v479_v32, %v483_v33  ;;  %v8798_v16 = vcombine.low %v480_v34, %v484_v35  ;;  %v523_v27 = vld [vmem:[#allocation6 + $0x1f0] sm:$0xff]  ;;  %v524_v28 = vld [vmem:[#allocation6 + $0x1f8] sm:$0xff] }
 0x228   :  { %v527_v32 = vld [vmem:[#allocation6 + $0x210] sm:$0xff] }
 0x229   :  { %3723 = vmatpush1.bf16.msra.mxu0 %v9256_v39  ;;  %3887 = vmatpush1.bf16.msra.mxu1 %v9258_v57  ;;  %v8799_v39 = vcombine.high %v480_v34, %v484_v35  ;;  %v487_v57 = vld [vmem:[#allocation6 + $0xd0] sm:$0xff]  ;;  %v528_v34 = vld [vmem:[#allocation6 + $0x218] sm:$0xff] }
 0x22a   :  { %3724 = vmatprep.subr.bf16.mxu0 %v9265_v41  ;;  %3888 = vmatprep.subr.bf16.mxu1 %v9267_v42  ;;  %v491_v41 = vld [vmem:[#allocation6 + $0xf0] sm:$0xff]  ;;  %v488_v42 = vld [vmem:[#allocation6 + $0xd8] sm:$0xff] }
 0x22b   :  { %v8805_v54 = vcombine.high %v487_v57, %v491_v41  ;;  %v531_v33 = vld [vmem:[#allocation6 + $0x230] sm:$0xff]  ;;  %v532_v35 = vld [vmem:[#allocation6 + $0x238] sm:$0xff] }
 0x22d   :  { %3725 = vmatpush1.bf16.msra.mxu0 %v9264_v55  ;;  %3889 = vmatpush1.bf16.msra.mxu1 %v9266_v56  ;;  %v8807_v55 = vcombine.high %v488_v42, %v492_v49  ;;  %v495_v56 = vld [vmem:[#allocation6 + $0x110] sm:$0xff] }
 0x22e   :  { %3726 = vmatprep.subr.bf16.mxu0 %v9273_v60  ;;  %3890 = vmatprep.subr.bf16.mxu1 %v9275_v44  ;;  %v8804_v60 = vcombine.low %v487_v57, %v491_v41  ;;  %v8806_v44 = vcombine.low %v488_v42, %v492_v49  ;;  %v8813_v63 = vcombine.high %v495_v56, %v499_v58  ;;  %v535_v57 = vld [vmem:[#allocation6 + $0x250] sm:$0xff]  ;;  %v536_v42 = vld [vmem:[#allocation6 + $0x258] sm:$0xff] }
 0x22f   :  { %v8812_v10 = vcombine.low %v495_v56, %v499_v58  ;;  %v539_v41 = vld [vmem:[#allocation6 + $0x270] sm:$0xff]  ;;  %v540_v49 = vld [vmem:[#allocation6 + $0x278] sm:$0xff] }
 0x230   :  { %v543_v56 = vld [vmem:[#allocation6 + $0x290] sm:$0xff] }
 0x231   :  { %3727 = vmatpush1.bf16.msra.mxu0 %v9272_v8  ;;  %3891 = vmatpush1.bf16.msra.mxu1 %v9274_v9  ;;  %v504_v8 = vld [vmem:[#allocation6 + $0x158] sm:$0xff]  ;;  %v547_v58 = vld [vmem:[#allocation6 + $0x2b0] sm:$0xff] }
 0x232   :  { %3728 = vmatprep.subr.bf16.mxu0 %v9281_v12  ;;  %3892 = vmatprep.subr.bf16.mxu1 %v9283_v13  ;;  %v508_v9 = vld [vmem:[#allocation6 + $0x178] sm:$0xff]  ;;  %v8821_v13 = vcombine.high %v503_v3, %v507_v4 }
 0x233   :  { %v8823_v17 = vcombine.high %v504_v8, %v508_v9  ;;  %v8822_v23 = vcombine.low %v504_v8, %v508_v9  ;;  %v552_v8 = vld [vmem:[#allocation6 + $0x2d8] sm:$0xff] }
 0x234   :  { %v556_v9 = vld [vmem:[#allocation6 + $0x2f8] sm:$0xff] }
 0x235   :  { %3729 = vmatpush1.bf16.msra.mxu0 %v9280_v21  ;;  %3893 = vmatpush1.bf16.msra.mxu1 %v9282_v22  ;;  %v516_v21 = vld [vmem:[#allocation6 + $0x1b8] sm:$0xff]  ;;  %v8820_v22 = vcombine.low %v503_v3, %v507_v4  ;;  %v551_v3 = vld [vmem:[#allocation6 + $0x2d0] sm:$0xff] }
 0x236   :  { %3903 = vmatprep.subr.bf16.mxu0 %v8781_v24  ;;  %4067 = vmatprep.subr.bf16.mxu1 %v8783_v25  ;;  %v8829_v24 = vcombine.high %v511_v18, %v515_v19  ;;  %v8831_v25 = vcombine.high %v512_v20, %v516_v21  ;;  %v555_v4 = vld [vmem:[#allocation6 + $0x2f0] sm:$0xff] }
 0x238   :  { %3731 = vmatmul.mubr.bf16.vlgmr.msra.gmra.mrb[8].mxu0 %v10616_v46  ;;  %3895 = vmatmul.mubr.bf16.vlgmr.msra.gmra.mrb[8].mxu1 %v10616_v46 }
 0x239   :  { %3904 = vmatpush1.bf16.msra.mxu0 %v8780_v29  ;;  %3935 = vmatprep.mubr.bf16.mxu0 %v10551_v5  ;;  %v8828_v29 = vcombine.low %v511_v18, %v515_v19  ;;  %v559_v18 = vld [vmem:[#allocation6 + $0x310] sm:$0xff] }
 0x23a   :  { %4068 = vmatpush1.bf16.msra.mxu1 %v8782_v30  ;;  %4099 = vmatprep.mubr.bf16.mxu1 %v10551_v5  ;;  %v496_v5 = vld [vmem:[#allocation6 + $0x118] sm:$0xff]  ;;  %v8830_v30 = vcombine.low %v512_v20, %v516_v21  ;;  %v563_v19 = vld [vmem:[#allocation6 + $0x330] sm:$0xff] }
 0x23b   :  { %3905 = vmatprep.subr.bf16.mxu0 %v8789_v15  ;;  %4069 = vmatprep.subr.bf16.mxu1 %v8791_v31  ;;  %v8815_v2 = vcombine.high %v496_v5, %v500_v59  ;;  %v8814_v12 = vcombine.low %v496_v5, %v500_v59  ;;  %v8837_v15 = vcombine.high %v519_v26, %v523_v27  ;;  %v544_v5 = vld [vmem:[#allocation6 + $0x298] sm:$0xff] }
 0x23c   :  { %v8839_v31 = vcombine.high %v520_v1, %v524_v28  ;;  %v548_v59 = vld [vmem:[#allocation6 + $0x2b8] sm:$0xff] }
 0x23d   :  { %3906 = vmatpush1.bf16.msra.mxu0 %v8788_v36  ;;  %v8836_v36 = vcombine.low %v519_v26, %v523_v27  ;;  %v560_v20 = vld [vmem:[#allocation6 + $0x318] sm:$0xff]  ;;  %v567_v26 = vld [vmem:[#allocation6 + $0x350] sm:$0xff] }
 0x23e   :  { %4070 = vmatpush1.bf16.msra.mxu1 %v8790_v38  ;;  %3907 = vmatprep.subr.bf16.mxu0 %v8797_v6  ;;  %v8838_v38 = vcombine.low %v520_v1, %v524_v28  ;;  %v8845_v6 = vcombine.high %v527_v32, %v531_v33  ;;  %v564_v21 = vld [vmem:[#allocation6 + $0x338] sm:$0xff]  ;;  %v571_v27 = vld [vmem:[#allocation6 + $0x370] sm:$0xff] }
 0x23f   :  { %4071 = vmatprep.subr.bf16.mxu1 %v8799_v39  ;;  %v8847_v39 = vcombine.high %v528_v34, %v532_v35  ;;  %v568_v1 = vld [vmem:[#allocation6 + $0x358] sm:$0xff] }
 0x240   :  { %v572_v28 = vld [vmem:[#allocation6 + $0x378] sm:$0xff] }
 0x241   :  { %3908 = vmatpush1.bf16.msra.mxu0 %v8796_v51  ;;  %v8844_v51 = vcombine.low %v527_v32, %v531_v33  ;;  %v575_v32 = vld [vmem:[#allocation6 + $0x390] sm:$0xff] }
 0x242   :  { %4072 = vmatpush1.bf16.msra.mxu1 %v8798_v16  ;;  %3909 = vmatprep.subr.bf16.mxu0 %v8805_v54  ;;  %v8846_v16 = vcombine.low %v528_v34, %v532_v35  ;;  %v8853_v54 = vcombine.high %v535_v57, %v539_v41  ;;  %v579_v33 = vld [vmem:[#allocation6 + $0x3b0] sm:$0xff]  ;;  %v576_v34 = vld [vmem:[#allocation6 + $0x398] sm:$0xff] }
 0x243   :  { %4073 = vmatprep.subr.bf16.mxu1 %v8807_v55  ;;  %v8855_v55 = vcombine.high %v536_v42, %v540_v49  ;;  %v580_v35 = vld [vmem:[#allocation6 + $0x3b8] sm:$0xff] }
 0x245   :  { %3910 = vmatpush1.bf16.msra.mxu0 %v8804_v60  ;;  %v8852_v60 = vcombine.low %v535_v57, %v539_v41  ;;  %v583_v57 = vld [vmem:[#allocation6 + $0x3d0] sm:$0xff] }
 0x246   :  { %4074 = vmatpush1.bf16.msra.mxu1 %v8806_v44  ;;  %3911 = vmatprep.subr.bf16.mxu0 %v8813_v63  ;;  %v8854_v44 = vcombine.low %v536_v42, %v540_v49  ;;  %v8861_v63 = vcombine.high %v543_v56, %v547_v58  ;;  %v587_v41 = vld [vmem:[#allocation6 + $0x3f0] sm:$0xff]  ;;  %v584_v42 = vld [vmem:[#allocation6 + $0x3d8] sm:$0xff] }
 0x247   :  { %4075 = vmatprep.subr.bf16.mxu1 %v8815_v2  ;;  %v8863_v2 = vcombine.high %v544_v5, %v548_v59  ;;  %v588_v49 = vld [vmem:[#allocation6 + $0x3f8] sm:$0xff] }
 0x249   :  { %3912 = vmatpush1.bf16.msra.mxu0 %v8812_v10  ;;  %v8860_v10 = vcombine.low %v543_v56, %v547_v58  ;;  %v591_v56 = vld [vmem:[#allocation6 + $0x410] sm:$0xff] }
 0x24a   :  { %4076 = vmatpush1.bf16.msra.mxu1 %v8814_v12  ;;  %3913 = vmatprep.subr.bf16.mxu0 %v8821_v13  ;;  %v8862_v12 = vcombine.low %v544_v5, %v548_v59  ;;  %v8869_v13 = vcombine.high %v551_v3, %v555_v4  ;;  %v595_v58 = vld [vmem:[#allocation6 + $0x430] sm:$0xff]  ;;  %v592_v5 = vld [vmem:[#allocation6 + $0x418] sm:$0xff] }
 0x24b   :  { %4077 = vmatprep.subr.bf16.mxu1 %v8823_v17  ;;  %v8871_v17 = vcombine.high %v552_v8, %v556_v9  ;;  %v596_v59 = vld [vmem:[#allocation6 + $0x438] sm:$0xff] }
 0x24d   :  { %3914 = vmatpush1.bf16.msra.mxu0 %v8820_v22  ;;  %v8868_v22 = vcombine.low %v551_v3, %v555_v4  ;;  %v599_v3 = vld [vmem:[#allocation6 + $0x450] sm:$0xff] }
 0x24e   :  { %4078 = vmatpush1.bf16.msra.mxu1 %v8822_v23  ;;  %3915 = vmatprep.subr.bf16.mxu0 %v8829_v24  ;;  %v8870_v23 = vcombine.low %v552_v8, %v556_v9  ;;  %v8877_v24 = vcombine.high %v559_v18, %v563_v19  ;;  %v603_v4 = vld [vmem:[#allocation6 + $0x470] sm:$0xff]  ;;  %v8908_v8 = vcombine.low %v591_v56, %v595_v58  ;;  %v600_v9 = vld [vmem:[#allocation6 + $0x458] sm:$0xff] }
 0x24f   :  { %4079 = vmatprep.subr.bf16.mxu1 %v8831_v25  ;;  %v8879_v25 = vcombine.high %v560_v20, %v564_v21 }
 0x251   :  { %3916 = vmatpush1.bf16.msra.mxu0 %v8828_v29  ;;  %v8876_v29 = vcombine.low %v559_v18, %v563_v19  ;;  %v611_v18 = vld [vmem:[#allocation6 + $0x4b0] sm:$0xff] }
 0x252   :  { %4080 = vmatpush1.bf16.msra.mxu1 %v8830_v30  ;;  %3917 = vmatprep.subr.bf16.mxu0 %v8837_v15  ;;  %v8878_v30 = vcombine.low %v560_v20, %v564_v21  ;;  %v8885_v15 = vcombine.high %v567_v26, %v571_v27  ;;  %v608_v20 = vld [vmem:[#allocation6 + $0x498] sm:$0xff] }
 0x253   :  { %4081 = vmatprep.subr.bf16.mxu1 %v8839_v31  ;;  %v8887_v31 = vcombine.high %v568_v1, %v572_v28  ;;  %v612_v21 = vld [vmem:[#allocation6 + $0x4b8] sm:$0xff] }
 0x255   :  { %3918 = vmatpush1.bf16.msra.mxu0 %v8836_v36  ;;  %v8884_v36 = vcombine.low %v567_v26, %v571_v27  ;;  %v615_v26 = vld [vmem:[#allocation6 + $0x4d0] sm:$0xff] }
 0x256   :  { %4082 = vmatpush1.bf16.msra.mxu1 %v8838_v38  ;;  %3919 = vmatprep.subr.bf16.mxu0 %v8845_v6  ;;  %v8886_v38 = vcombine.low %v568_v1, %v572_v28  ;;  %v8893_v6 = vcombine.high %v575_v32, %v579_v33  ;;  %v619_v27 = vld [vmem:[#allocation6 + $0x4f0] sm:$0xff]  ;;  %v616_v1 = vld [vmem:[#allocation6 + $0x4d8] sm:$0xff] }
 0x257   :  { %4083 = vmatprep.subr.bf16.mxu1 %v8847_v39  ;;  %v8895_v39 = vcombine.high %v576_v34, %v580_v35  ;;  %v620_v28 = vld [vmem:[#allocation6 + $0x4f8] sm:$0xff] }
 0x259   :  { %3920 = vmatpush1.bf16.msra.mxu0 %v8844_v51  ;;  %v8892_v51 = vcombine.low %v575_v32, %v579_v33  ;;  %v627_v32 = vld [vmem:[#allocation6 + $0x530] sm:$0xff]  ;;  %v624_v33 = vld [vmem:[#allocation6 + $0x518] sm:$0xff] }
 0x25a   :  { %4084 = vmatpush1.bf16.msra.mxu1 %v8846_v16  ;;  %3921 = vmatprep.subr.bf16.mxu0 %v8853_v54  ;;  %v8894_v16 = vcombine.low %v576_v34, %v580_v35  ;;  %v8901_v54 = vcombine.high %v583_v57, %v587_v41  ;;  %v628_v34 = vld [vmem:[#allocation6 + $0x538] sm:$0xff]  ;;  %v8934_v35 = vcombine.low %v616_v1, %v620_v28 }
 0x25b   :  { %4085 = vmatprep.subr.bf16.mxu1 %v8855_v55  ;;  %v8903_v55 = vcombine.high %v584_v42, %v588_v49 }
 0x25d   :  { %3922 = vmatpush1.bf16.msra.mxu0 %v8852_v60  ;;  %v8900_v60 = vcombine.low %v583_v57, %v587_v41  ;;  %v632_v57 = vld [vmem:[#allocation6 + $0x558] sm:$0xff] }
 0x25e   :  { %4086 = vmatpush1.bf16.msra.mxu1 %v8854_v44  ;;  %3923 = vmatprep.subr.bf16.mxu0 %v8861_v63  ;;  %v8902_v44 = vcombine.low %v584_v42, %v588_v49  ;;  %v8909_v63 = vcombine.high %v591_v56, %v595_v58  ;;  %v636_v41 = vld [vmem:[#allocation6 + $0x578] sm:$0xff]  ;;  %v8942_v49 = vcombine.low %v624_v33, %v628_v34 }
 0x25f   :  { %4087 = vmatprep.subr.bf16.mxu1 %v8863_v2  ;;  %v8911_v2 = vcombine.high %v592_v5, %v596_v59  ;;  %v640_v56 = vld [vmem:[#allocation6 + $0x598] sm:$0xff] }
 0x260   :  { %v644_v58 = vld [vmem:[#allocation6 + $0x5b8] sm:$0xff] }
 0x261   :  { %3924 = vmatpush1.bf16.msra.mxu0 %v8860_v10  ;;  %v604_v10 = vld [vmem:[#allocation6 + $0x478] sm:$0xff] }
 0x262   :  { %4088 = vmatpush1.bf16.msra.mxu1 %v8862_v12  ;;  %3925 = vmatprep.subr.bf16.mxu0 %v8869_v13  ;;  %v8910_v12 = vcombine.low %v592_v5, %v596_v59  ;;  %v8917_v13 = vcombine.high %v599_v3, %v603_v4  ;;  %v8919_v19 = vcombine.high %v600_v9, %v604_v10 }
 0x263   :  { %4089 = vmatprep.subr.bf16.mxu1 %v8871_v17  ;;  %v607_v17 = vld [vmem:[#allocation6 + $0x490] sm:$0xff]  ;;  %v8950_v59 = vcombine.low %v632_v57, %v636_v41 }
 0x265   :  { %3926 = vmatpush1.bf16.msra.mxu0 %v8868_v22  ;;  %v8916_v22 = vcombine.low %v599_v3, %v603_v4  ;;  %v648_v3 = vld [vmem:[#allocation6 + $0x5d8] sm:$0xff] }
 0x266   :  { %4090 = vmatpush1.bf16.msra.mxu1 %v8870_v23  ;;  %3927 = vmatprep.subr.bf16.mxu0 %v8877_v24  ;;  %v8918_v23 = vcombine.low %v600_v9, %v604_v10  ;;  %v8925_v24 = vcombine.high %v607_v17, %v611_v18  ;;  %v652_v4 = vld [vmem:[#allocation6 + $0x5f8] sm:$0xff]  ;;  %v8958_v9 = vcombine.low %v640_v56, %v644_v58 }
 0x267   :  { %4091 = vmatprep.subr.bf16.mxu1 %v8879_v25  ;;  %v8927_v25 = vcombine.high %v608_v20, %v612_v21 }
 0x269   :  { %3928 = vmatpush1.bf16.msra.mxu0 %v8876_v29  ;;  %v8924_v29 = vcombine.low %v607_v17, %v611_v18  ;;  %v659_v17 = vld [vmem:[#allocation6 + $0x630] sm:$0xff]  ;;  %v656_v18 = vld [vmem:[#allocation6 + $0x618] sm:$0xff] }
 0x26a   :  { %4092 = vmatpush1.bf16.msra.mxu1 %v8878_v30  ;;  %3929 = vmatprep.subr.bf16.mxu0 %v8885_v15  ;;  %v8933_v30 = vcombine.high %v615_v26, %v619_v27  ;;  %v8935_v15 = vcombine.high %v616_v1, %v620_v28 }
 0x26b   :  { %4093 = vmatprep.subr.bf16.mxu1 %v8887_v31  ;;  %v623_v31 = vld [vmem:[#allocation6 + $0x510] sm:$0xff] }
 0x26c   :  { %v8940_v42 = vcombine.low %v623_v31, %v627_v32 }
 0x26d   :  { %3930 = vmatpush1.bf16.msra.mxu0 %v8884_v36  ;;  %v8941_v36 = vcombine.high %v623_v31, %v627_v32  ;;  %v672_v31 = vld [vmem:[#allocation6 + $0x698] sm:$0xff] }
 0x26e   :  { %4094 = vmatpush1.bf16.msra.mxu1 %v8886_v38  ;;  %3931 = vmatprep.subr.bf16.mxu0 %v8893_v6  ;;  %v8943_v38 = vcombine.high %v624_v33, %v628_v34  ;;  %v631_v6 = vld [vmem:[#allocation6 + $0x550] sm:$0xff]  ;;  %v676_v32 = vld [vmem:[#allocation6 + $0x6b8] sm:$0xff] }
 0x26f   :  { %4095 = vmatprep.subr.bf16.mxu1 %v8895_v39  ;;  %v635_v39 = vld [vmem:[#allocation6 + $0x570] sm:$0xff] }
 0x270   :  { %v8948_v5 = vcombine.low %v631_v6, %v635_v39 }
 0x271   :  { %3932 = vmatpush1.bf16.msra.mxu0 %v8892_v51  ;;  %v8949_v51 = vcombine.high %v631_v6, %v635_v39  ;;  %v680_v6 = vld [vmem:[#allocation6 + $0x6d8] sm:$0xff] }
 0x272   :  { %4096 = vmatpush1.bf16.msra.mxu1 %v8894_v16  ;;  %3933 = vmatprep.subr.bf16.mxu0 %v8901_v54  ;;  %v8951_v16 = vcombine.high %v632_v57, %v636_v41  ;;  %v639_v54 = vld [vmem:[#allocation6 + $0x590] sm:$0xff]  ;;  %v684_v39 = vld [vmem:[#allocation6 + $0x6f8] sm:$0xff]  ;;  %v8990_v41 = vcombine.low %v672_v31, %v676_v32 }
 0x273   :  { %4097 = vmatprep.subr.bf16.mxu1 %v8903_v55  ;;  %v643_v55 = vld [vmem:[#allocation6 + $0x5b0] sm:$0xff] }
 0x275   :  { %3934 = vmatpush1.bf16.msra.mxu0 %v8900_v60  ;;  %v8957_v60 = vcombine.high %v639_v54, %v643_v55 }
 0x276   :  { %4098 = vmatpush1.bf16.msra.mxu1 %v8902_v44  ;;  %3944 = vmatprep.subr.bf16.mxu0 %v8909_v63  ;;  %v8959_v44 = vcombine.high %v640_v56, %v644_v58  ;;  %v647_v63 = vld [vmem:[#allocation6 + $0x5d0] sm:$0xff]  ;;  %v8998_v58 = vcombine.low %v680_v6, %v684_v39 }
 0x277   :  { %4108 = vmatprep.subr.bf16.mxu1 %v8911_v2  ;;  %v651_v2 = vld [vmem:[#allocation6 + $0x5f0] sm:$0xff] }
 0x278   :  { %3936 = vmatmul.mubr.bf16.vlgmr.msra.gmra.mrb[12].mxu0 %v10553_v7  ;;  %v8965_v10 = vcombine.high %v647_v63, %v651_v2 }
 0x279   :  { %4100 = vmatmul.mubr.bf16.vlgmr.msra.gmra.mrb[12].mxu1 %v10553_v7  ;;  %3945 = vmatpush1.bf16.msra.mxu0 %v8908_v8  ;;  %v8926_v7 = vcombine.low %v608_v20, %v612_v21  ;;  %v8956_v8 = vcombine.low %v639_v54, %v643_v55  ;;  %v8964_v20 = vcombine.low %v647_v63, %v651_v2  ;;  %v688_v54 = vld [vmem:[#allocation6 + $0x718] sm:$0xff] }
 0x27a   :  { %3976 = vmatprep.mubr.bf16.mxu0 %v10557_v14  ;;  %4109 = vmatpush1.bf16.msra.mxu1 %v8910_v12  ;;  %v8967_v12 = vcombine.high %v648_v3, %v652_v4  ;;  %v8966_v21 = vcombine.low %v648_v3, %v652_v4  ;;  %v692_v55 = vld [vmem:[#allocation6 + $0x738] sm:$0xff] }
 0x27b   :  { %4140 = vmatprep.mubr.bf16.mxu1 %v10557_v14  ;;  %3946 = vmatprep.subr.bf16.mxu0 %v8917_v13  ;;  %v8932_v14 = vcombine.low %v615_v26, %v619_v27  ;;  %v655_v13 = vld [vmem:[#allocation6 + $0x610] sm:$0xff]  ;;  %v664_v26 = vld [vmem:[#allocation6 + $0x658] sm:$0xff]  ;;  %v9006_v4 = vcombine.low %v688_v54, %v692_v55 }
 0x27c   :  { %4110 = vmatprep.subr.bf16.mxu1 %v8919_v19  ;;  %v660_v19 = vld [vmem:[#allocation6 + $0x638] sm:$0xff]  ;;  %v8972_v1 = vcombine.low %v655_v13, %v659_v17 }
 0x27d   :  { %3947 = vmatpush1.bf16.msra.mxu0 %v8916_v22  ;;  %v8973_v22 = vcombine.high %v655_v13, %v659_v17  ;;  %v668_v27 = vld [vmem:[#allocation6 + $0x678] sm:$0xff]  ;;  %v8974_v28 = vcombine.low %v656_v18, %v660_v19 }
 0x27e   :  { %4111 = vmatpush1.bf16.msra.mxu1 %v8918_v23  ;;  %3948 = vmatprep.subr.bf16.mxu0 %v8925_v24  ;;  %v8975_v23 = vcombine.high %v656_v18, %v660_v19  ;;  %v663_v24 = vld [vmem:[#allocation6 + $0x650] sm:$0xff]  ;;  %v8982_v34 = vcombine.low %v664_v26, %v668_v27  ;;  %v696_v63 = vld [vmem:[#allocation6 + $0x758] sm:$0xff] }
 0x27f   :  { %4112 = vmatprep.subr.bf16.mxu1 %v8927_v25  ;;  %v667_v25 = vld [vmem:[#allocation6 + $0x670] sm:$0xff]  ;;  %v700_v2 = vld [vmem:[#allocation6 + $0x778] sm:$0xff] }
 0x280   :  { %v8980_v33 = vcombine.low %v663_v24, %v667_v25  ;;  %v704_v13 = vld [vmem:[#allocation6 + $0x798] sm:$0xff]  ;;  %v9014_v19 = vcombine.low %v696_v63, %v700_v2 }
 0x281   :  { %3949 = vmatpush1.bf16.msra.mxu0 %v8924_v29  ;;  %v8981_v29 = vcombine.high %v663_v24, %v667_v25  ;;  %v708_v17 = vld [vmem:[#allocation6 + $0x7b8] sm:$0xff] }
 0x282   :  { %4113 = vmatpush1.bf16.msra.mxu1 %v8926_v7  ;;  %3950 = vmatprep.subr.bf16.mxu0 %v8933_v30  ;;  %v8983_v7 = vcombine.high %v664_v26, %v668_v27  ;;  %v671_v30 = vld [vmem:[#allocation6 + $0x690] sm:$0xff]  ;;  %v712_v24 = vld [vmem:[#allocation6 + $0x7d8] sm:$0xff]  ;;  %v9022_v27 = vcombine.low %v704_v13, %v708_v17 }
 0x283   :  { %4114 = vmatprep.subr.bf16.mxu1 %v8935_v15  ;;  %v675_v15 = vld [vmem:[#allocation6 + $0x6b0] sm:$0xff]  ;;  %v716_v25 = vld [vmem:[#allocation6 + $0x7f8] sm:$0xff] }
 0x284   :  { %v8988_v57 = vcombine.low %v671_v30, %v675_v15 }
 0x285   :  { %3951 = vmatpush1.bf16.msra.mxu0 %v8932_v14  ;;  %v8989_v14 = vcombine.high %v671_v30, %v675_v15  ;;  %v720_v30 = vld [vmem:[#allocation6 + $0x818] sm:$0xff] }
 0x286   :  { %4115 = vmatpush1.bf16.msra.mxu1 %v8934_v35  ;;  %3952 = vmatprep.subr.bf16.mxu0 %v8941_v36  ;;  %v8991_v35 = vcombine.high %v672_v31, %v676_v32  ;;  %v679_v36 = vld [vmem:[#allocation6 + $0x6d0] sm:$0xff]  ;;  %v724_v15 = vld [vmem:[#allocation6 + $0x838] sm:$0xff]  ;;  %v9030_v32 = vcombine.low %v712_v24, %v716_v25 }
 0x287   :  { %4116 = vmatprep.subr.bf16.mxu1 %v8943_v38  ;;  %v683_v38 = vld [vmem:[#allocation6 + $0x6f0] sm:$0xff] }
 0x288   :  { %v8996_v56 = vcombine.low %v679_v36, %v683_v38 }
 0x289   :  { %3953 = vmatpush1.bf16.msra.mxu0 %v8940_v42  ;;  %v8997_v42 = vcombine.high %v679_v36, %v683_v38  ;;  %v728_v38 = vld [vmem:[#allocation6 + $0x858] sm:$0xff] }
 0x28a   :  { %4117 = vmatpush1.bf16.msra.mxu1 %v8942_v49  ;;  %3954 = vmatprep.subr.bf16.mxu0 %v8949_v51  ;;  %v8999_v49 = vcombine.high %v680_v6, %v684_v39  ;;  %v687_v51 = vld [vmem:[#allocation6 + $0x710] sm:$0xff]  ;;  %v732_v6 = vld [vmem:[#allocation6 + $0x878] sm:$0xff]  ;;  %v9038_v39 = vcombine.low %v720_v30, %v724_v15 }
 0x28b   :  { %4118 = vmatprep.subr.bf16.mxu1 %v8951_v16  ;;  %v691_v16 = vld [vmem:[#allocation6 + $0x730] sm:$0xff] }
 0x28c   :  { %v9004_v3 = vcombine.low %v687_v51, %v691_v16 }
 0x28d   :  { %3955 = vmatpush1.bf16.msra.mxu0 %v8948_v5  ;;  %v9005_v5 = vcombine.high %v687_v51, %v691_v16  ;;  %v736_v51 = vld [vmem:[#allocation6 + $0x898] sm:$0xff] }
 0x28e   :  { %4119 = vmatpush1.bf16.msra.mxu1 %v8950_v59  ;;  %3956 = vmatprep.subr.bf16.mxu0 %v8957_v60  ;;  %v9007_v59 = vcombine.high %v688_v54, %v692_v55  ;;  %v695_v60 = vld [vmem:[#allocation6 + $0x750] sm:$0xff]  ;;  %v740_v16 = vld [vmem:[#allocation6 + $0x8b8] sm:$0xff]  ;;  %v9046_v55 = vcombine.low %v728_v38, %v732_v6 }
 0x28f   :  { %4120 = vmatprep.subr.bf16.mxu1 %v8959_v44  ;;  %v699_v44 = vld [vmem:[#allocation6 + $0x770] sm:$0xff] }
 0x290   :  { %v9012_v18 = vcombine.low %v695_v60, %v699_v44 }
 0x291   :  { %3957 = vmatpush1.bf16.msra.mxu0 %v8956_v8  ;;  %v9013_v8 = vcombine.high %v695_v60, %v699_v44  ;;  %v744_v60 = vld [vmem:[#allocation6 + $0x8d8] sm:$0xff] }
 0x292   :  { %4121 = vmatpush1.bf16.msra.mxu1 %v8958_v9  ;;  %3958 = vmatprep.subr.bf16.mxu0 %v8965_v10  ;;  %v9015_v9 = vcombine.high %v696_v63, %v700_v2  ;;  %v703_v10 = vld [vmem:[#allocation6 + $0x790] sm:$0xff]  ;;  %v748_v44 = vld [vmem:[#allocation6 + $0x8f8] sm:$0xff] }
 0x293   :  { %4122 = vmatprep.subr.bf16.mxu1 %v8967_v12  ;;  %v707_v12 = vld [vmem:[#allocation6 + $0x7b0] sm:$0xff] }
 0x294   :  { %v9020_v26 = vcombine.low %v703_v10, %v707_v12 }
 0x295   :  { %3959 = vmatpush1.bf16.msra.mxu0 %v8964_v20  ;;  %v9021_v20 = vcombine.high %v703_v10, %v707_v12  ;;  %v756_v10 = vld [vmem:[#allocation6 + $0x938] sm:$0xff]  ;;  %v9062_v12 = vcombine.low %v744_v60, %v748_v44 }
 0x296   :  { %4123 = vmatpush1.bf16.msra.mxu1 %v8966_v21  ;;  %3960 = vmatprep.subr.bf16.mxu0 %v8973_v22  ;;  %v9023_v21 = vcombine.high %v704_v13, %v708_v17  ;;  %v711_v22 = vld [vmem:[#allocation6 + $0x7d0] sm:$0xff] }
 0x297   :  { %4124 = vmatprep.subr.bf16.mxu1 %v8975_v23  ;;  %v715_v23 = vld [vmem:[#allocation6 + $0x7f0] sm:$0xff] }
 0x298   :  { %v9028_v31 = vcombine.low %v711_v22, %v715_v23 }
 0x299   :  { %3961 = vmatpush1.bf16.msra.mxu0 %v8972_v1  ;;  %v9029_v1 = vcombine.high %v711_v22, %v715_v23 }
 0x29a   :  { %4125 = vmatpush1.bf16.msra.mxu1 %v8974_v28  ;;  %3962 = vmatprep.subr.bf16.mxu0 %v8981_v29  ;;  %v9031_v28 = vcombine.high %v712_v24, %v716_v25  ;;  %v719_v29 = vld [vmem:[#allocation6 + $0x810] sm:$0xff] }
 0x29b   :  { %4126 = vmatprep.subr.bf16.mxu1 %v8983_v7  ;;  %v723_v7 = vld [vmem:[#allocation6 + $0x830] sm:$0xff] }
 0x29c   :  { %v9036_v36 = vcombine.low %v719_v29, %v723_v7 }
 0x29d   :  { %3963 = vmatpush1.bf16.msra.mxu0 %v8980_v33  ;;  %v9037_v33 = vcombine.high %v719_v29, %v723_v7 }
 0x29e   :  { %4127 = vmatpush1.bf16.msra.mxu1 %v8982_v34  ;;  %3964 = vmatprep.subr.bf16.mxu0 %v8989_v14  ;;  %v9039_v34 = vcombine.high %v720_v30, %v724_v15  ;;  %v727_v14 = vld [vmem:[#allocation6 + $0x850] sm:$0xff] }
 0x29f   :  { %4128 = vmatprep.subr.bf16.mxu1 %v8991_v35  ;;  %v731_v35 = vld [vmem:[#allocation6 + $0x870] sm:$0xff] }
 0x2a0   :  { %v9044_v54 = vcombine.low %v727_v14, %v731_v35 }
 0x2a1   :  { %3965 = vmatpush1.bf16.msra.mxu0 %v8988_v57  ;;  %v9045_v57 = vcombine.high %v727_v14, %v731_v35 }
 0x2a2   :  { %4129 = vmatpush1.bf16.msra.mxu1 %v8990_v41  ;;  %3966 = vmatprep.subr.bf16.mxu0 %v8997_v42  ;;  %v735_v41 = vld [vmem:[#allocation6 + $0x890] sm:$0xff] }
 0x2a3   :  { %4130 = vmatprep.subr.bf16.mxu1 %v8999_v49  ;;  %v739_v42 = vld [vmem:[#allocation6 + $0x8b0] sm:$0xff]  ;;  %v9047_v49 = vcombine.high %v728_v38, %v732_v6 }
 0x2a4   :  { %v9052_v63 = vcombine.low %v735_v41, %v739_v42  ;;  %v783_v6 = vld [vmem:[#allocation6 + $0xa10] sm:$0xff] }
 0x2a5   :  { %3967 = vmatpush1.bf16.msra.mxu0 %v8996_v56  ;;  %v9053_v56 = vcombine.high %v735_v41, %v739_v42  ;;  %v788_v41 = vld [vmem:[#allocation6 + $0xa38] sm:$0xff] }
 0x2a6   :  { %4131 = vmatpush1.bf16.msra.mxu1 %v8998_v58  ;;  %3968 = vmatprep.subr.bf16.mxu0 %v9005_v5  ;;  %v9055_v58 = vcombine.high %v736_v51, %v740_v16  ;;  %v743_v5 = vld [vmem:[#allocation6 + $0x8d0] sm:$0xff] }
 0x2a7   :  { %4132 = vmatprep.subr.bf16.mxu1 %v9007_v59  ;;  %v747_v59 = vld [vmem:[#allocation6 + $0x8f0] sm:$0xff] }
 0x2a8   :  { %v9061_v2 = vcombine.high %v743_v5, %v747_v59 }
 0x2a9   :  { %3969 = vmatpush1.bf16.msra.mxu0 %v9004_v3  ;;  %v9063_v3 = vcombine.high %v744_v60, %v748_v44 }
 0x2aa   :  { %4133 = vmatpush1.bf16.msra.mxu1 %v9006_v4  ;;  %3970 = vmatprep.subr.bf16.mxu0 %v9013_v8  ;;  %v751_v4 = vld [vmem:[#allocation6 + $0x910] sm:$0xff] }
 0x2ab   :  { %4134 = vmatprep.subr.bf16.mxu1 %v9015_v9  ;;  %v755_v8 = vld [vmem:[#allocation6 + $0x930] sm:$0xff]  ;;  %v752_v9 = vld [vmem:[#allocation6 + $0x918] sm:$0xff] }
 0x2ac   :  { %v9069_v13 = vcombine.high %v751_v4, %v755_v8  ;;  %v9071_v17 = vcombine.high %v752_v9, %v756_v10  ;;  %v9068_v22 = vcombine.low %v751_v4, %v755_v8  ;;  %v9070_v23 = vcombine.low %v752_v9, %v756_v10 }
 0x2ad   :  { %3971 = vmatpush1.bf16.msra.mxu0 %v9012_v18  ;;  %v759_v18 = vld [vmem:[#allocation6 + $0x950] sm:$0xff] }
 0x2ae   :  { %4135 = vmatpush1.bf16.msra.mxu1 %v9014_v19  ;;  %3972 = vmatprep.subr.bf16.mxu0 %v9021_v20  ;;  %v763_v19 = vld [vmem:[#allocation6 + $0x970] sm:$0xff]  ;;  %v760_v20 = vld [vmem:[#allocation6 + $0x958] sm:$0xff] }
 0x2af   :  { %4136 = vmatprep.subr.bf16.mxu1 %v9023_v21  ;;  %v764_v21 = vld [vmem:[#allocation6 + $0x978] sm:$0xff]  ;;  %v9077_v24 = vcombine.high %v759_v18, %v763_v19  ;;  %v9076_v29 = vcombine.low %v759_v18, %v763_v19 }
 0x2b0   :  { %v9079_v25 = vcombine.high %v760_v20, %v764_v21  ;;  %v9078_v7 = vcombine.low %v760_v20, %v764_v21 }
 0x2b1   :  { %3973 = vmatpush1.bf16.msra.mxu0 %v9020_v26  ;;  %v767_v26 = vld [vmem:[#allocation6 + $0x990] sm:$0xff] }
 0x2b2   :  { %4137 = vmatpush1.bf16.msra.mxu1 %v9022_v27  ;;  %3974 = vmatprep.subr.bf16.mxu0 %v9029_v1  ;;  %v771_v27 = vld [vmem:[#allocation6 + $0x9b0] sm:$0xff]  ;;  %v768_v1 = vld [vmem:[#allocation6 + $0x998] sm:$0xff] }
 0x2b3   :  { %4138 = vmatprep.subr.bf16.mxu1 %v9031_v28  ;;  %v772_v28 = vld [vmem:[#allocation6 + $0x9b8] sm:$0xff]  ;;  %v9085_v30 = vcombine.high %v767_v26, %v771_v27  ;;  %v9084_v14 = vcombine.low %v767_v26, %v771_v27 }
 0x2b4   :  { %v9087_v15 = vcombine.high %v768_v1, %v772_v28  ;;  %v9086_v35 = vcombine.low %v768_v1, %v772_v28 }
 0x2b5   :  { %3975 = vmatpush1.bf16.msra.mxu0 %v9028_v31  ;;  %v775_v31 = vld [vmem:[#allocation6 + $0x9d0] sm:$0xff] }
 0x2b6   :  { %4139 = vmatpush1.bf16.msra.mxu1 %v9030_v32  ;;  %3985 = vmatprep.subr.bf16.mxu0 %v9037_v33  ;;  %v779_v32 = vld [vmem:[#allocation6 + $0x9f0] sm:$0xff]  ;;  %v776_v33 = vld [vmem:[#allocation6 + $0x9d8] sm:$0xff] }
 0x2b7   :  { %4149 = vmatprep.subr.bf16.mxu1 %v9039_v34  ;;  %v780_v34 = vld [vmem:[#allocation6 + $0x9f8] sm:$0xff]  ;;  %v9092_v42 = vcombine.low %v775_v31, %v779_v32 }
 0x2b8   :  { %3977 = vmatmul.mubr.bf16.vlgmr.msra.gmra.mrb[12].mxu0 %v10583_v52  ;;  %v9095_v38 = vcombine.high %v776_v33, %v780_v34 }
 0x2b9   :  { %4141 = vmatmul.mubr.bf16.vlgmr.msra.gmra.mrb[12].mxu1 %v10583_v52  ;;  %3986 = vmatpush1.bf16.msra.mxu0 %v9036_v36  ;;  %v9054_v52 = vcombine.low %v736_v51, %v740_v16  ;;  %v9093_v36 = vcombine.high %v775_v31, %v779_v32 }
 0x2ba   :  { %4017 = vmatprep.mubr.bf16.mxu0 %v10585_v61  ;;  %4150 = vmatpush1.bf16.msra.mxu1 %v9038_v39  ;;  %v787_v39 = vld [vmem:[#allocation6 + $0xa30] sm:$0xff] }
 0x2bb   :  { %4181 = vmatprep.mubr.bf16.mxu1 %v10585_v61  ;;  %3987 = vmatprep.subr.bf16.mxu0 %v9045_v57  ;;  %v9060_v61 = vcombine.low %v743_v5, %v747_v59  ;;  %v784_v57 = vld [vmem:[#allocation6 + $0xa18] sm:$0xff]  ;;  %v9101_v51 = vcombine.high %v783_v6, %v787_v39  ;;  %v9100_v5 = vcombine.low %v783_v6, %v787_v39 }
 0x2bc   :  { %4151 = vmatprep.subr.bf16.mxu1 %v9047_v49  ;;  %v9094_v49 = vcombine.low %v776_v33, %v780_v34  ;;  %v9103_v16 = vcombine.high %v784_v57, %v788_v41  ;;  %v9102_v59 = vcombine.low %v784_v57, %v788_v41 }
 0x2bd   :  { %3988 = vmatpush1.bf16.msra.mxu0 %v9044_v54  ;;  %v791_v54 = vld [vmem:[#allocation6 + $0xa50] sm:$0xff] }
 0x2be   :  { %4152 = vmatpush1.bf16.msra.mxu1 %v9046_v55  ;;  %3989 = vmatprep.subr.bf16.mxu0 %v9053_v56  ;;  %v795_v55 = vld [vmem:[#allocation6 + $0xa70] sm:$0xff]  ;;  %v792_v56 = vld [vmem:[#allocation6 + $0xa58] sm:$0xff] }
 0x2bf   :  { %4153 = vmatprep.subr.bf16.mxu1 %v9055_v58  ;;  %v796_v58 = vld [vmem:[#allocation6 + $0xa78] sm:$0xff]  ;;  %v9109_v60 = vcombine.high %v791_v54, %v795_v55  ;;  %v9108_v4 = vcombine.low %v791_v54, %v795_v55 }
 0x2c0   :  { %v9111_v44 = vcombine.high %v792_v56, %v796_v58  ;;  %v9110_v8 = vcombine.low %v792_v56, %v796_v58 }
 0x2c1   :  { %3990 = vmatpush1.bf16.msra.mxu0 %v9052_v63  ;;  %v799_v63 = vld [vmem:[#allocation6 + $0xa90] sm:$0xff] }
 0x2c2   :  { %4154 = vmatpush1.bf16.msra.mxu1 %v9054_v52  ;;  %3991 = vmatprep.subr.bf16.mxu0 %v9061_v2  ;;  %v803_v52 = vld [vmem:[#allocation6 + $0xab0] sm:$0xff]  ;;  %v800_v2 = vld [vmem:[#allocation6 + $0xa98] sm:$0xff] }
 0x2c3   :  { %4155 = vmatprep.subr.bf16.mxu1 %v9063_v3  ;;  %v804_v3 = vld [vmem:[#allocation6 + $0xab8] sm:$0xff]  ;;  %v9117_v9 = vcombine.high %v799_v63, %v803_v52  ;;  %v9116_v18 = vcombine.low %v799_v63, %v803_v52 }
 0x2c4   :  { %v9119_v10 = vcombine.high %v800_v2, %v804_v3  ;;  %v9118_v19 = vcombine.low %v800_v2, %v804_v3 }
 0x2c5   :  { %3992 = vmatpush1.bf16.msra.mxu0 %v9060_v61  ;;  %v807_v61 = vld [vmem:[#allocation6 + $0xad0] sm:$0xff] }
 0x2c6   :  { %4156 = vmatpush1.bf16.msra.mxu1 %v9062_v12  ;;  %3993 = vmatprep.subr.bf16.mxu0 %v9069_v13  ;;  %v811_v12 = vld [vmem:[#allocation6 + $0xaf0] sm:$0xff]  ;;  %v808_v13 = vld [vmem:[#allocation6 + $0xad8] sm:$0xff] }
 0x2c7   :  { %4157 = vmatprep.subr.bf16.mxu1 %v9071_v17  ;;  %v812_v17 = vld [vmem:[#allocation6 + $0xaf8] sm:$0xff]  ;;  %v9125_v20 = vcombine.high %v807_v61, %v811_v12  ;;  %v9124_v26 = vcombine.low %v807_v61, %v811_v12 }
 0x2c8   :  { %v9127_v21 = vcombine.high %v808_v13, %v812_v17  ;;  %v9126_v27 = vcombine.low %v808_v13, %v812_v17  ;;  %v860_v61 = vld [vmem:[#allocation6 + $0xc78] sm:$0xff]  ;;  %v863_v17 = vld [vmem:[#allocation6 + $0xc90] sm:$0xff] }
 0x2c9   :  { %3994 = vmatpush1.bf16.msra.mxu0 %v9068_v22  ;;  %v815_v22 = vld [vmem:[#allocation6 + $0xb10] sm:$0xff] }
 0x2ca   :  { %4158 = vmatpush1.bf16.msra.mxu1 %v9070_v23  ;;  %3995 = vmatprep.subr.bf16.mxu0 %v9077_v24  ;;  %v819_v23 = vld [vmem:[#allocation6 + $0xb30] sm:$0xff]  ;;  %v816_v24 = vld [vmem:[#allocation6 + $0xb18] sm:$0xff] }
 0x2cb   :  { %4159 = vmatprep.subr.bf16.mxu1 %v9079_v25  ;;  %v820_v25 = vld [vmem:[#allocation6 + $0xb38] sm:$0xff]  ;;  %v9133_v1 = vcombine.high %v815_v22, %v819_v23  ;;  %v9132_v31 = vcombine.low %v815_v22, %v819_v23 }
 0x2cc   :  { %v9135_v28 = vcombine.high %v816_v24, %v820_v25  ;;  %v9134_v32 = vcombine.low %v816_v24, %v820_v25 }
 0x2cd   :  { %3996 = vmatpush1.bf16.msra.mxu0 %v9076_v29  ;;  %v823_v29 = vld [vmem:[#allocation6 + $0xb50] sm:$0xff] }
 0x2ce   :  { %4160 = vmatpush1.bf16.msra.mxu1 %v9078_v7  ;;  %3997 = vmatprep.subr.bf16.mxu0 %v9085_v30  ;;  %v827_v7 = vld [vmem:[#allocation6 + $0xb70] sm:$0xff]  ;;  %v824_v30 = vld [vmem:[#allocation6 + $0xb58] sm:$0xff] }
 0x2cf   :  { %4161 = vmatprep.subr.bf16.mxu1 %v9087_v15  ;;  %v828_v15 = vld [vmem:[#allocation6 + $0xb78] sm:$0xff]  ;;  %v9141_v33 = vcombine.high %v823_v29, %v827_v7  ;;  %v9140_v6 = vcombine.low %v823_v29, %v827_v7 }
 0x2d0   :  { %v9143_v34 = vcombine.high %v824_v30, %v828_v15  ;;  %v9142_v39 = vcombine.low %v824_v30, %v828_v15  ;;  %v879_v15 = vld [vmem:[#allocation6 + $0xd10] sm:$0xff] }
 0x2d1   :  { %3998 = vmatpush1.bf16.msra.mxu0 %v9084_v14  ;;  %v831_v14 = vld [vmem:[#allocation6 + $0xb90] sm:$0xff] }
 0x2d2   :  { %4162 = vmatpush1.bf16.msra.mxu1 %v9086_v35  ;;  %3999 = vmatprep.subr.bf16.mxu0 %v9093_v36  ;;  %v835_v35 = vld [vmem:[#allocation6 + $0xbb0] sm:$0xff]  ;;  %v832_v36 = vld [vmem:[#allocation6 + $0xb98] sm:$0xff] }
 0x2d3   :  { %4163 = vmatprep.subr.bf16.mxu1 %v9095_v38  ;;  %v836_v38 = vld [vmem:[#allocation6 + $0xbb8] sm:$0xff]  ;;  %v9149_v57 = vcombine.high %v831_v14, %v835_v35  ;;  %v9148_v54 = vcombine.low %v831_v14, %v835_v35 }
 0x2d4   :  { %v9151_v41 = vcombine.high %v832_v36, %v836_v38  ;;  %v9150_v55 = vcombine.low %v832_v36, %v836_v38  ;;  %v887_v36 = vld [vmem:[#allocation6 + $0xd50] sm:$0xff] }
 0x2d5   :  { %4000 = vmatpush1.bf16.msra.mxu0 %v9092_v42  ;;  %v839_v42 = vld [vmem:[#allocation6 + $0xbd0] sm:$0xff] }
 0x2d6   :  { %4164 = vmatpush1.bf16.msra.mxu1 %v9094_v49  ;;  %4001 = vmatprep.subr.bf16.mxu0 %v9101_v51  ;;  %v843_v49 = vld [vmem:[#allocation6 + $0xbf0] sm:$0xff]  ;;  %v840_v51 = vld [vmem:[#allocation6 + $0xbd8] sm:$0xff] }
 0x2d7   :  { %4165 = vmatprep.subr.bf16.mxu1 %v9103_v16  ;;  %v844_v16 = vld [vmem:[#allocation6 + $0xbf8] sm:$0xff]  ;;  %v9157_v56 = vcombine.high %v839_v42, %v843_v49  ;;  %v9156_v63 = vcombine.low %v839_v42, %v843_v49  ;;  %v891_v38 = vld [vmem:[#allocation6 + $0xd70] sm:$0xff] }
 0x2d8   :  { %v9159_v58 = vcombine.high %v840_v51, %v844_v16  ;;  %v9158_v52 = vcombine.low %v840_v51, %v844_v16  ;;  %v9205_v42 = vcombine.high %v887_v36, %v891_v38  ;;  %v895_v51 = vld [vmem:[#allocation6 + $0xd90] sm:$0xff] }
 0x2d9   :  { %4002 = vmatpush1.bf16.msra.mxu0 %v9100_v5  ;;  %v847_v5 = vld [vmem:[#allocation6 + $0xc10] sm:$0xff] }
 0x2da   :  { %4166 = vmatpush1.bf16.msra.mxu1 %v9102_v59  ;;  %4003 = vmatprep.subr.bf16.mxu0 %v9109_v60  ;;  %v851_v59 = vld [vmem:[#allocation6 + $0xc30] sm:$0xff]  ;;  %v848_v60 = vld [vmem:[#allocation6 + $0xc18] sm:$0xff] }
 0x2db   :  { %4167 = vmatprep.subr.bf16.mxu1 %v9111_v44  ;;  %v852_v44 = vld [vmem:[#allocation6 + $0xc38] sm:$0xff]  ;;  %v9165_v2 = vcombine.high %v847_v5, %v851_v59  ;;  %v899_v16 = vld [vmem:[#allocation6 + $0xdb0] sm:$0xff] }
 0x2dc   :  { %v9167_v3 = vcombine.high %v848_v60, %v852_v44  ;;  %v9166_v12 = vcombine.low %v848_v60, %v852_v44 }
 0x2dd   :  { %4004 = vmatpush1.bf16.msra.mxu0 %v9108_v4  ;;  %v855_v4 = vld [vmem:[#allocation6 + $0xc50] sm:$0xff] }
 0x2de   :  { %4168 = vmatpush1.bf16.msra.mxu1 %v9110_v8  ;;  %4005 = vmatprep.subr.bf16.mxu0 %v9117_v9  ;;  %v859_v8 = vld [vmem:[#allocation6 + $0xc70] sm:$0xff]  ;;  %v9164_v9 = vcombine.low %v847_v5, %v851_v59  ;;  %v9213_v5 = vcombine.high %v895_v51, %v899_v16 }
 0x2df   :  { %4169 = vmatprep.subr.bf16.mxu1 %v9119_v10  ;;  %v856_v10 = vld [vmem:[#allocation6 + $0xc58] sm:$0xff]  ;;  %v9173_v13 = vcombine.high %v855_v4, %v859_v8  ;;  %v9172_v22 = vcombine.low %v855_v4, %v859_v8 }
 0x2e0   :  { %v9174_v23 = vcombine.low %v856_v10, %v860_v61  ;;  %v904_v4 = vld [vmem:[#allocation6 + $0xdd8] sm:$0xff] }
 0x2e1   :  { %4006 = vmatpush1.bf16.msra.mxu0 %v9116_v18  ;;  %v867_v18 = vld [vmem:[#allocation6 + $0xcb0] sm:$0xff]  ;;  %v908_v8 = vld [vmem:[#allocation6 + $0xdf8] sm:$0xff] }
 0x2e2   :  { %4170 = vmatpush1.bf16.msra.mxu1 %v9118_v19  ;;  %4007 = vmatprep.subr.bf16.mxu0 %v9125_v20  ;;  %v9175_v19 = vcombine.high %v856_v10, %v860_v61  ;;  %v864_v20 = vld [vmem:[#allocation6 + $0xc98] sm:$0xff]  ;;  %v9181_v24 = vcombine.high %v863_v17, %v867_v18  ;;  %v9180_v29 = vcombine.low %v863_v17, %v867_v18 }
 0x2e3   :  { %4171 = vmatprep.subr.bf16.mxu1 %v9127_v21  ;;  %v868_v21 = vld [vmem:[#allocation6 + $0xcb8] sm:$0xff]  ;;  %v9212_v61 = vcombine.low %v895_v51, %v899_v16 }
 0x2e4   :  { %v9183_v25 = vcombine.high %v864_v20, %v868_v21 }
 0x2e5   :  { %4008 = vmatpush1.bf16.msra.mxu0 %v9124_v26  ;;  %v871_v26 = vld [vmem:[#allocation6 + $0xcd0] sm:$0xff] }
 0x2e6   :  { %4172 = vmatpush1.bf16.msra.mxu1 %v9126_v27  ;;  %4009 = vmatprep.subr.bf16.mxu0 %v9133_v1  ;;  %v875_v27 = vld [vmem:[#allocation6 + $0xcf0] sm:$0xff]  ;;  %v872_v1 = vld [vmem:[#allocation6 + $0xcd8] sm:$0xff] }
 0x2e7   :  { %4173 = vmatprep.subr.bf16.mxu1 %v9135_v28  ;;  %v876_v28 = vld [vmem:[#allocation6 + $0xcf8] sm:$0xff]  ;;  %v9189_v7 = vcombine.high %v871_v26, %v875_v27 }
 0x2e8   :  { %v9191_v30 = vcombine.high %v872_v1, %v876_v28 }
 0x2e9   :  { %4010 = vmatpush1.bf16.msra.mxu0 %v9132_v31  ;;  %v883_v31 = vld [vmem:[#allocation6 + $0xd30] sm:$0xff] }
 0x2ea   :  { %4174 = vmatpush1.bf16.msra.mxu1 %v9134_v32  ;;  %4011 = vmatprep.subr.bf16.mxu0 %v9141_v33  ;;  %v880_v32 = vld [vmem:[#allocation6 + $0xd18] sm:$0xff]  ;;  %v9197_v14 = vcombine.high %v879_v15, %v883_v31 }
 0x2eb   :  { %4175 = vmatprep.subr.bf16.mxu1 %v9143_v34  ;;  %v884_v33 = vld [vmem:[#allocation6 + $0xd38] sm:$0xff]  ;;  %v9190_v34 = vcombine.low %v872_v1, %v876_v28  ;;  %v919_v1 = vld [vmem:[#allocation6 + $0xe50] sm:$0xff] }
 0x2ec   :  { %v9199_v35 = vcombine.high %v880_v32, %v884_v33  ;;  %v923_v28 = vld [vmem:[#allocation6 + $0xe70] sm:$0xff] }
 0x2ed   :  { %4012 = vmatpush1.bf16.msra.mxu0 %v9140_v6  ;;  %v888_v6 = vld [vmem:[#allocation6 + $0xd58] sm:$0xff] }
 0x2ee   :  { %4176 = vmatpush1.bf16.msra.mxu1 %v9142_v39  ;;  %4013 = vmatprep.subr.bf16.mxu0 %v9149_v57  ;;  %v892_v39 = vld [vmem:[#allocation6 + $0xd78] sm:$0xff]  ;;  %v9196_v57 = vcombine.low %v879_v15, %v883_v31  ;;  %v9237_v15 = vcombine.high %v919_v1, %v923_v28 }
 0x2ef   :  { %4177 = vmatprep.subr.bf16.mxu1 %v9151_v41  ;;  %v9198_v41 = vcombine.low %v880_v32, %v884_v33  ;;  %v9207_v49 = vcombine.high %v888_v6, %v892_v39  ;;  %v927_v32 = vld [vmem:[#allocation6 + $0xe90] sm:$0xff] }
 0x2f0   :  { %v931_v33 = vld [vmem:[#allocation6 + $0xeb0] sm:$0xff] }
 0x2f1   :  { %4014 = vmatpush1.bf16.msra.mxu0 %v9148_v54  ;;  %v896_v54 = vld [vmem:[#allocation6 + $0xd98] sm:$0xff] }
 0x2f2   :  { %4178 = vmatpush1.bf16.msra.mxu1 %v9150_v55  ;;  %4015 = vmatprep.subr.bf16.mxu0 %v9157_v56  ;;  %v900_v55 = vld [vmem:[#allocation6 + $0xdb8] sm:$0xff]  ;;  %v9204_v56 = vcombine.low %v887_v36, %v891_v38  ;;  %v9245_v36 = vcombine.high %v927_v32, %v931_v33 }
 0x2f3   :  { %4179 = vmatprep.subr.bf16.mxu1 %v9159_v58  ;;  %v9206_v58 = vcombine.low %v888_v6, %v892_v39  ;;  %v9215_v44 = vcombine.high %v896_v54, %v900_v55  ;;  %v9214_v17 = vcombine.low %v896_v54, %v900_v55  ;;  %v935_v6 = vld [vmem:[#allocation6 + $0xed0] sm:$0xff] }
 0x2f4   :  { %v939_v39 = vld [vmem:[#allocation6 + $0xef0] sm:$0xff] }
 0x2f5   :  { %4016 = vmatpush1.bf16.msra.mxu0 %v9156_v63  ;;  %v903_v63 = vld [vmem:[#allocation6 + $0xdd0] sm:$0xff]  ;;  %v9253_v51 = vcombine.high %v935_v6, %v939_v39 }
 0x2f6   :  { %4180 = vmatpush1.bf16.msra.mxu1 %v9158_v52  ;;  %4026 = vmatprep.subr.bf16.mxu0 %v9165_v2  ;;  %v907_v52 = vld [vmem:[#allocation6 + $0xdf0] sm:$0xff] }
 0x2f7   :  { %4190 = vmatprep.subr.bf16.mxu1 %v9167_v3  ;;  %v9221_v18 = vcombine.high %v903_v63, %v907_v52  ;;  %v943_v54 = vld [vmem:[#allocation6 + $0xf10] sm:$0xff] }
 0x2f8   :  { %4018 = vmatmul.mubr.bf16.vlgmr.msra.gmra.mrb[12].mxu0 %v10603_v37  ;;  %v947_v55 = vld [vmem:[#allocation6 + $0xf30] sm:$0xff] }
 0x2f9   :  { %4182 = vmatmul.mubr.bf16.vlgmr.msra.gmra.mrb[12].mxu1 %v10603_v37  ;;  %4027 = vmatpush1.bf16.msra.mxu0 %v9164_v9  ;;  %v9182_v37 = vcombine.low %v864_v20, %v868_v21  ;;  %v911_v20 = vld [vmem:[#allocation6 + $0xe10] sm:$0xff] }
 0x2fa   :  { %4058 = vmatprep.mubr.bf16.mxu0 %v10605_v50  ;;  %4191 = vmatpush1.bf16.msra.mxu1 %v9166_v12  ;;  %v915_v21 = vld [vmem:[#allocation6 + $0xe30] sm:$0xff] }
 0x2fb   :  { %4222 = vmatprep.mubr.bf16.mxu1 %v10605_v50  ;;  %4028 = vmatprep.subr.bf16.mxu0 %v9173_v13  ;;  %v9188_v50 = vcombine.low %v871_v26, %v875_v27  ;;  %v9229_v26 = vcombine.high %v911_v20, %v915_v21 }
 0x2fc   :  { %4192 = vmatprep.subr.bf16.mxu1 %v9175_v19  ;;  %v9223_v19 = vcombine.high %v904_v4, %v908_v8 }
 0x2fd   :  { %4029 = vmatpush1.bf16.msra.mxu0 %v9172_v22  ;;  %v912_v22 = vld [vmem:[#allocation6 + $0xe18] sm:$0xff] }
 0x2fe   :  { %4193 = vmatpush1.bf16.msra.mxu1 %v9174_v23  ;;  %4030 = vmatprep.subr.bf16.mxu0 %v9181_v24  ;;  %v916_v23 = vld [vmem:[#allocation6 + $0xe38] sm:$0xff]  ;;  %v9220_v24 = vcombine.low %v903_v63, %v907_v52  ;;  %v9261_v63 = vcombine.high %v943_v54, %v947_v55 }
 0x2ff   :  { %4194 = vmatprep.subr.bf16.mxu1 %v9183_v25  ;;  %v9222_v25 = vcombine.low %v904_v4, %v908_v8  ;;  %v9231_v27 = vcombine.high %v912_v22, %v916_v23  ;;  %v951_v4 = vld [vmem:[#allocation6 + $0xf50] sm:$0xff] }
 0x300   :  { %v955_v8 = vld [vmem:[#allocation6 + $0xf70] sm:$0xff] }
 0x301   :  { %4031 = vmatpush1.bf16.msra.mxu0 %v9180_v29  ;;  %v920_v29 = vld [vmem:[#allocation6 + $0xe58] sm:$0xff] }
 0x302   :  { %4195 = vmatpush1.bf16.msra.mxu1 %v9182_v37  ;;  %4032 = vmatprep.subr.bf16.mxu0 %v9189_v7  ;;  %v924_v37 = vld [vmem:[#allocation6 + $0xe78] sm:$0xff]  ;;  %v9228_v7 = vcombine.low %v911_v20, %v915_v21 }
 0x303   :  { %4196 = vmatprep.subr.bf16.mxu1 %v9191_v30  ;;  %v9230_v30 = vcombine.low %v912_v22, %v916_v23  ;;  %v9239_v31 = vcombine.high %v920_v29, %v924_v37  ;;  %v960_v20 = vld [vmem:[#allocation6 + $0xf98] sm:$0xff]  ;;  %v10642_v22 = vld [vmem:[#allocation7] sm:$0xff]  ;;  %v9268_v23 = vcombine.low %v951_v4, %v955_v8 }
 0x304   :  { %v964_v21 = vld [vmem:[#allocation6 + $0xfb8] sm:$0xff] }
 0x305   :  { %4033 = vmatpush1.bf16.msra.mxu0 %v9188_v50  ;;  %v928_v50 = vld [vmem:[#allocation6 + $0xe98] sm:$0xff] }
 0x306   :  { %4197 = vmatpush1.bf16.msra.mxu1 %v9190_v34  ;;  %4034 = vmatprep.subr.bf16.mxu0 %v9197_v14  ;;  %v932_v34 = vld [vmem:[#allocation6 + $0xeb8] sm:$0xff]  ;;  %v9236_v14 = vcombine.low %v919_v1, %v923_v28  ;;  %v971_v1 = vld [vmem:[#allocation6 + $0xff0] sm:$0xff]  ;;  %v982_v28 = vrot.slane %v10642_v22, %v10538_v47 }
 0x307   :  { %4198 = vmatprep.subr.bf16.mxu1 %v9199_v35  ;;  %v9238_v35 = vcombine.low %v920_v29, %v924_v37  ;;  %v9247_v38 = vcombine.high %v928_v50, %v932_v34  ;;  %v968_v29 = vld [vmem:[#allocation6 + $0xfd8] sm:$0xff] }
 0x308   :  { %v972_v37 = vld [vmem:[#allocation6 + $0xff8] sm:$0xff] }
 0x309   :  { %4035 = vmatpush1.bf16.msra.mxu0 %v9196_v57  ;;  %v936_v57 = vld [vmem:[#allocation6 + $0xed8] sm:$0xff] }
 0x30a   :  { %4199 = vmatpush1.bf16.msra.mxu1 %v9198_v41  ;;  %4036 = vmatprep.subr.bf16.mxu0 %v9205_v42  ;;  %v940_v41 = vld [vmem:[#allocation6 + $0xef8] sm:$0xff]  ;;  %v9244_v42 = vcombine.low %v927_v32, %v931_v33  ;;  %v4247_v32 = vld [vmem:[#allocation9] sm:$0xff] }
 0x30b   :  { %v10634_v59 = vpop.f32.mrb[8].mxu0  ;;  %v10636_v60 = vpop.f32.mrb[8].mxu1  ;;  %4200 = vmatprep.subr.bf16.mxu1 %v9207_v49  ;;  %v9246_v49 = vcombine.low %v928_v50, %v932_v34  ;;  %v9255_v16 = vcombine.high %v936_v57, %v940_v41  ;;  %v4251_v33 = vld [vmem:[#allocation9 + $0x20] sm:$0xff]  ;;  %v4248_v34 = vld [vmem:[#allocation9 + $0x8] sm:$0xff] }
 0x30c   :  { %v10638_v2 = vpop.f32.mrb[9].mxu0  ;;  %v10640_v3 = vpop.f32.mrb[9].mxu1 }
 0x30d   :  { %v3736_v9 = vpop.f32.mrb[10].mxu0  ;;  %v3900_v10 = vpop.f32.mrb[10].mxu1  ;;  %4037 = vmatpush1.bf16.msra.mxu0 %v9204_v56  ;;  %v944_v56 = vld [vmem:[#allocation6 + $0xf18] sm:$0xff]  ;;  %v9954_v50 = vadd.f32 %v10638_v2, %v982_v28  ;;  %v4291_v28 = vld [vmem:[#allocation9 + $0x160] sm:$0xff] }
 0x30e   :  { %4201 = vmatpush1.bf16.msra.mxu1 %v9206_v58  ;;  %v3737_v12 = vpop.f32.mrb[11].mxu0  ;;  %v3901_v13 = vpop.f32.mrb[11].mxu1  ;;  %4038 = vmatprep.subr.bf16.mxu0 %v9213_v5  ;;  %v948_v58 = vld [vmem:[#allocation6 + $0xf38] sm:$0xff]  ;;  %v9252_v5 = vcombine.low %v935_v6, %v939_v39 }
 0x30f   :  { %4202 = vmatprep.subr.bf16.mxu1 %v9215_v44  ;;  %v9254_v44 = vcombine.low %v936_v57, %v940_v41  ;;  %v9263_v52 = vcombine.high %v944_v56, %v948_v58  ;;  %v952_v9 = vld [vmem:[#allocation6 + $0xf58] sm:$0xff]  ;;  %v9262_v12 = vcombine.low %v944_v56, %v948_v58  ;;  %v9269_v13 = vcombine.high %v951_v4, %v955_v8  ;;  %v4255_v57 = vld [vmem:[#allocation9 + $0x40] sm:$0xff] }
 0x310   :  { %v956_v10 = vld [vmem:[#allocation6 + $0xf78] sm:$0xff]  ;;  %v4232_v39 = vmax.f32 %v9954_v50, 0.0  ;;  %v4259_v41 = vld [vmem:[#allocation9 + $0x60] sm:$0xff]  ;;  %v4296_v50 = vld [vmem:[#allocation9 + $0x188] sm:$0xff] }
 0x311   :  { %4039 = vmatpush1.bf16.msra.mxu0 %v9212_v61  ;;  %v9260_v61 = vcombine.low %v943_v54, %v947_v55  ;;  %v4263_v54 = vld [vmem:[#allocation9 + $0x80] sm:$0xff] }
 0x312   :  { %4203 = vmatpush1.bf16.msra.mxu1 %v9214_v17  ;;  %4040 = vmatprep.subr.bf16.mxu0 %v9221_v18  ;;  %v9271_v17 = vcombine.high %v952_v9, %v956_v10  ;;  %v959_v18 = vld [vmem:[#allocation6 + $0xf90] sm:$0xff]  ;;  %v4267_v55 = vld [vmem:[#allocation9 + $0xa0] sm:$0xff]  ;;  %v10647_v56 = vpack.c.bf16 %v4232_v39, %v4232_v39 }
 0x313   :  { %4204 = vmatprep.subr.bf16.mxu1 %v9223_v19  ;;  %v963_v19 = vld [vmem:[#allocation6 + $0xfb0] sm:$0xff]  ;;  %v9305_v4 = vcombine.high %v4263_v54, %v4267_v55  ;;  %v4307_v39 = vld [vmem:[#allocation9 + $0x1e0] sm:$0xff] }
 0x315   :  { %4041 = vmatpush1.bf16.msra.mxu0 %v9220_v24  ;;  %v9270_v24 = vcombine.low %v952_v9, %v956_v10  ;;  %v4271_v9 = vld [vmem:[#allocation9 + $0xc0] sm:$0xff] }
 0x316   :  { %4205 = vmatpush1.bf16.msra.mxu1 %v9222_v25  ;;  %4042 = vmatprep.subr.bf16.mxu0 %v9229_v26  ;;  %v9277_v25 = vcombine.high %v959_v18, %v963_v19  ;;  %v9279_v26 = vcombine.high %v960_v20, %v964_v21  ;;  %v4275_v10 = vld [vmem:[#allocation9 + $0xe0] sm:$0xff] }
 0x317   :  { %4206 = vmatprep.subr.bf16.mxu1 %v9231_v27  ;;  %v967_v27 = vld [vmem:[#allocation6 + $0xfd0] sm:$0xff] }
 0x319   :  { %4043 = vmatpush1.bf16.msra.mxu0 %v9228_v7  ;;  %v9276_v7 = vcombine.low %v959_v18, %v963_v19  ;;  %v4279_v19 = vld [vmem:[#allocation9 + $0x100] sm:$0xff] }
 0x31a   :  { %4207 = vmatpush1.bf16.msra.mxu1 %v9230_v30  ;;  %4044 = vmatprep.subr.bf16.mxu0 %v9237_v15  ;;  %v9278_v30 = vcombine.low %v960_v20, %v964_v21  ;;  %v9285_v15 = vcombine.high %v967_v27, %v971_v1  ;;  %v4283_v20 = vld [vmem:[#allocation9 + $0x120] sm:$0xff]  ;;  %v4280_v21 = vld [vmem:[#allocation9 + $0x108] sm:$0xff] }
 0x31b   :  { %4208 = vmatprep.subr.bf16.mxu1 %v9239_v31  ;;  %v9287_v31 = vcombine.high %v968_v29, %v972_v37 }
 0x31d   :  { %4045 = vmatpush1.bf16.msra.mxu0 %v9236_v14  ;;  %v4252_v14 = vld [vmem:[#allocation9 + $0x28] sm:$0xff] }
 0x31e   :  { %4209 = vmatpush1.bf16.msra.mxu1 %v9238_v35  ;;  %4046 = vmatprep.subr.bf16.mxu0 %v9245_v36  ;;  %v9284_v35 = vcombine.low %v967_v27, %v971_v1  ;;  %v9286_v36 = vcombine.low %v968_v29, %v972_v37  ;;  %v9291_v6 = vcombine.high %v4248_v34, %v4252_v14  ;;  %v4287_v1 = vld [vmem:[#allocation9 + $0x140] sm:$0xff]  ;;  %v4288_v29 = vld [vmem:[#allocation9 + $0x148] sm:$0xff] }
 0x31f   :  { %4210 = vmatprep.subr.bf16.mxu1 %v9247_v38  ;;  %v9289_v38 = vcombine.high %v4247_v32, %v4251_v33  ;;  %v9290_v2 = vcombine.low %v4248_v34, %v4252_v14  ;;  %v4292_v37 = vld [vmem:[#allocation9 + $0x168] sm:$0xff]  ;;  %v9328_v14 = vcombine.low %v4287_v1, %v4291_v28 }
 0x320   :  { %v4300_v34 = vld [vmem:[#allocation9 + $0x1a8] sm:$0xff] }
 0x321   :  { %4047 = vmatpush1.bf16.msra.mxu0 %v9244_v42  ;;  %v9288_v42 = vcombine.low %v4247_v32, %v4251_v33  ;;  %v4295_v32 = vld [vmem:[#allocation9 + $0x180] sm:$0xff] }
 0x322   :  { %4211 = vmatpush1.bf16.msra.mxu1 %v9246_v49  ;;  %4048 = vmatprep.subr.bf16.mxu0 %v9253_v51  ;;  %v4256_v49 = vld [vmem:[#allocation9 + $0x48] sm:$0xff]  ;;  %v4299_v33 = vld [vmem:[#allocation9 + $0x1a0] sm:$0xff] }
 0x323   :  { %4212 = vmatprep.subr.bf16.mxu1 %v9255_v16  ;;  %v4260_v51 = vld [vmem:[#allocation9 + $0x68] sm:$0xff]  ;;  %v9297_v16 = vcombine.high %v4255_v57, %v4259_v41 }
 0x324   :  { %v9299_v58 = vcombine.high %v4256_v49, %v4260_v51 }
 0x325   :  { %4049 = vmatpush1.bf16.msra.mxu0 %v9252_v5  ;;  %v4264_v5 = vld [vmem:[#allocation9 + $0x88] sm:$0xff] }
 0x326   :  { %4213 = vmatpush1.bf16.msra.mxu1 %v9254_v44  ;;  %4050 = vmatprep.subr.bf16.mxu0 %v9261_v63  ;;  %v4268_v44 = vld [vmem:[#allocation9 + $0xa8] sm:$0xff]  ;;  %v9296_v63 = vcombine.low %v4255_v57, %v4259_v41 }
 0x327   :  { %4214 = vmatprep.subr.bf16.mxu1 %v9263_v52  ;;  %v9298_v52 = vcombine.low %v4256_v49, %v4260_v51  ;;  %v9307_v8 = vcombine.high %v4264_v5, %v4268_v44  ;;  %v4304_v57 = vld [vmem:[#allocation9 + $0x1c8] sm:$0xff]  ;;  %v9338_v49 = vcombine.low %v4296_v50, %v4300_v34 }
 0x328   :  { %v4308_v41 = vld [vmem:[#allocation9 + $0x1e8] sm:$0xff] }
 0x329   :  { %4051 = vmatpush1.bf16.msra.mxu0 %v9260_v61  ;;  %v4272_v61 = vld [vmem:[#allocation9 + $0xc8] sm:$0xff] }
 0x32a   :  { %4215 = vmatpush1.bf16.msra.mxu1 %v9262_v12  ;;  %4052 = vmatprep.subr.bf16.mxu0 %v9269_v13  ;;  %v4276_v12 = vld [vmem:[#allocation9 + $0xe8] sm:$0xff]  ;;  %v9304_v13 = vcombine.low %v4263_v54, %v4267_v55  ;;  %v4315_v54 = vld [vmem:[#allocation9 + $0x220] sm:$0xff] }
 0x32b   :  { %4216 = vmatprep.subr.bf16.mxu1 %v9271_v17  ;;  %v9313_v17 = vcombine.high %v4271_v9, %v4275_v10  ;;  %v9315_v18 = vcombine.high %v4272_v61, %v4276_v12  ;;  %v4312_v55 = vld [vmem:[#allocation9 + $0x208] sm:$0xff] }
 0x32d   :  { %4053 = vmatpush1.bf16.msra.mxu0 %v9268_v23  ;;  %v4284_v23 = vld [vmem:[#allocation9 + $0x128] sm:$0xff] }
 0x32e   :  { %4217 = vmatpush1.bf16.msra.mxu1 %v9270_v24  ;;  %4054 = vmatprep.subr.bf16.mxu0 %v9277_v25  ;;  %v9312_v24 = vcombine.low %v4271_v9, %v4275_v10  ;;  %v9314_v25 = vcombine.low %v4272_v61, %v4276_v12  ;;  %v9323_v27 = vcombine.high %v4280_v21, %v4284_v23  ;;  %v4320_v9 = vld [vmem:[#allocation9 + $0x248] sm:$0xff] }
 0x32f   :  { %4218 = vmatprep.subr.bf16.mxu1 %v9279_v26  ;;  %v9321_v26 = vcombine.high %v4279_v19, %v4283_v20  ;;  %v4324_v10 = vld [vmem:[#allocation9 + $0x268] sm:$0xff] }
 0x331   :  { %4055 = vmatpush1.bf16.msra.mxu0 %v9276_v7  ;;  %v9320_v7 = vcombine.low %v4279_v19, %v4283_v20  ;;  %v4328_v19 = vld [vmem:[#allocation9 + $0x288] sm:$0xff] }
 0x332   :  { %4219 = vmatpush1.bf16.msra.mxu1 %v9278_v30  ;;  %4056 = vmatprep.subr.bf16.mxu0 %v9285_v15  ;;  %v9322_v30 = vcombine.low %v4280_v21, %v4284_v23  ;;  %v9329_v15 = vcombine.high %v4287_v1, %v4291_v28  ;;  %v4332_v20 = vld [vmem:[#allocation9 + $0x2a8] sm:$0xff]  ;;  %v9362_v23 = vcombine.low %v4320_v9, %v4324_v10 }
 0x333   :  { %4220 = vmatprep.subr.bf16.mxu1 %v9287_v31  ;;  %v9331_v31 = vcombine.high %v4288_v29, %v4292_v37  ;;  %v4336_v1 = vld [vmem:[#allocation9 + $0x2c8] sm:$0xff] }
 0x334   :  { %v4340_v28 = vld [vmem:[#allocation9 + $0x2e8] sm:$0xff] }
 0x335   :  { %4057 = vmatpush1.bf16.msra.mxu0 %v9284_v35  ;;  %v9330_v35 = vcombine.low %v4288_v29, %v4292_v37  ;;  %v9370_v37 = vcombine.low %v4328_v19, %v4332_v20 }
 0x336   :  { %4221 = vmatpush1.bf16.msra.mxu1 %v9286_v36  ;;  %7361 = vmatprep.subr.bf16.mxu0 %v9289_v38  ;;  %v9337_v36 = vcombine.high %v4295_v32, %v4299_v33  ;;  %v9339_v38 = vcombine.high %v4296_v50, %v4300_v34  ;;  %v9378_v34 = vcombine.low %v4336_v1, %v4340_v28 }
 0x337   :  { %7525 = vmatprep.subr.bf16.mxu1 %v9291_v6  ;;  %v4303_v6 = vld [vmem:[#allocation9 + $0x1c0] sm:$0xff] }
 0x338   :  { %4059 = vmatmul.mubr.bf16.vlgmr.msra.gmra.mrb[12].mxu0 %v10616_v46  ;;  %v9345_v51 = vcombine.high %v4303_v6, %v4307_v39 }
 0x339   :  { %4223 = vmatmul.mubr.bf16.vlgmr.msra.gmra.mrb[12].mxu1 %v10616_v46  ;;  %7362 = vmatpush1.bf16.msra.mxu0 %v9288_v42  ;;  %v9306_v46 = vcombine.low %v4264_v5, %v4268_v44  ;;  %v9336_v42 = vcombine.low %v4295_v32, %v4299_v33  ;;  %v9344_v5 = vcombine.low %v4303_v6, %v4307_v39  ;;  %v4344_v32 = vld [vmem:[#allocation9 + $0x308] sm:$0xff] }
 0x33a   :  { %7393 = vmatprep.mubr.bf16.mxu0 %v10647_v56  ;;  %7526 = vmatpush1.bf16.msra.mxu1 %v9290_v2  ;;  %v9347_v2 = vcombine.high %v4304_v57, %v4308_v41  ;;  %v9346_v44 = vcombine.low %v4304_v57, %v4308_v41  ;;  %v4348_v33 = vld [vmem:[#allocation9 + $0x328] sm:$0xff] }
 0x33b   :  { %7557 = vmatprep.mubr.bf16.mxu1 %v10647_v56  ;;  %7363 = vmatprep.subr.bf16.mxu0 %v9297_v16  ;;  %v4311_v16 = vld [vmem:[#allocation9 + $0x200] sm:$0xff]  ;;  %v4352_v6 = vld [vmem:[#allocation9 + $0x348] sm:$0xff]  ;;  %v9386_v41 = vcombine.low %v4344_v32, %v4348_v33 }
 0x33c   :  { %7527 = vmatprep.subr.bf16.mxu1 %v9299_v58  ;;  %v4316_v58 = vld [vmem:[#allocation9 + $0x228] sm:$0xff]  ;;  %v9352_v61 = vcombine.low %v4311_v16, %v4315_v54 }
 0x33d   :  { %7364 = vmatpush1.bf16.msra.mxu0 %v9296_v63  ;;  %v9353_v63 = vcombine.high %v4311_v16, %v4315_v54  ;;  %v9354_v12 = vcombine.low %v4312_v55, %v4316_v58  ;;  %v4356_v39 = vld [vmem:[#allocation9 + $0x368] sm:$0xff] }
 0x33e   :  { %7528 = vmatpush1.bf16.msra.mxu1 %v9298_v52  ;;  %7365 = vmatprep.subr.bf16.mxu0 %v9305_v4  ;;  %v9355_v52 = vcombine.high %v4312_v55, %v4316_v58  ;;  %v4319_v4 = vld [vmem:[#allocation9 + $0x240] sm:$0xff]  ;;  %v4360_v16 = vld [vmem:[#allocation9 + $0x388] sm:$0xff]  ;;  %v978_v58 = vrot.slane %v10642_v22, %v10533_v45 }
 0x33f   :  { %7529 = vmatprep.subr.bf16.mxu1 %v9307_v8  ;;  %v4323_v8 = vld [vmem:[#allocation9 + $0x260] sm:$0xff]  ;;  %v4364_v54 = vld [vmem:[#allocation9 + $0x3a8] sm:$0xff] }
 0x340   :  { %v9360_v21 = vcombine.low %v4319_v4, %v4323_v8 }
 0x341   :  { %7366 = vmatpush1.bf16.msra.mxu0 %v9304_v13  ;;  %v9361_v13 = vcombine.high %v4319_v4, %v4323_v8  ;;  %v4371_v4 = vld [vmem:[#allocation9 + $0x3e0] sm:$0xff]  ;;  %v990_v8 = vrot.slane %v10642_v22, %v10541_v48 }
 0x342   :  { %7530 = vmatpush1.bf16.msra.mxu1 %v9306_v46  ;;  %7367 = vmatprep.subr.bf16.mxu0 %v9313_v17  ;;  %v9363_v46 = vcombine.high %v4320_v9, %v4324_v10  ;;  %v4327_v17 = vld [vmem:[#allocation9 + $0x280] sm:$0xff]  ;;  %v4368_v9 = vld [vmem:[#allocation9 + $0x3c8] sm:$0xff] }
 0x343   :  { %7531 = vmatprep.subr.bf16.mxu1 %v9315_v18  ;;  %v4331_v18 = vld [vmem:[#allocation9 + $0x2a0] sm:$0xff]  ;;  %v4372_v10 = vld [vmem:[#allocation9 + $0x3e8] sm:$0xff] }
 0x344   :  { %v9368_v29 = vcombine.low %v4327_v17, %v4331_v18 }
 0x345   :  { %7368 = vmatpush1.bf16.msra.mxu0 %v9312_v24  ;;  %v9369_v24 = vcombine.high %v4327_v17, %v4331_v18  ;;  %v9411_v17 = vcombine.high %v4368_v9, %v4372_v10  ;;  %v4375_v18 = vld [vmem:[#allocation9 + $0x400] sm:$0xff] }
 0x346   :  { %7532 = vmatpush1.bf16.msra.mxu1 %v9314_v25  ;;  %7369 = vmatprep.subr.bf16.mxu0 %v9321_v26  ;;  %v9371_v25 = vcombine.high %v4328_v19, %v4332_v20  ;;  %v4335_v26 = vld [vmem:[#allocation9 + $0x2c0] sm:$0xff]  ;;  %v9956_v20 = vadd.f32 %v10640_v3, %v990_v8 }
 0x347   :  { %7533 = vmatprep.subr.bf16.mxu1 %v9323_v27  ;;  %v4339_v27 = vld [vmem:[#allocation9 + $0x2e0] sm:$0xff] }
 0x348   :  { %v9376_v50 = vcombine.low %v4335_v26, %v4339_v27  ;;  %v4379_v19 = vld [vmem:[#allocation9 + $0x420] sm:$0xff] }
 0x349   :  { %7370 = vmatpush1.bf16.msra.mxu0 %v9320_v7  ;;  %v9377_v7 = vcombine.high %v4335_v26, %v4339_v27  ;;  %v9410_v26 = vcombine.low %v4368_v9, %v4372_v10  ;;  %v9417_v27 = vcombine.high %v4375_v18, %v4379_v19  ;;  %v4415_v9 = vld [vmem:[#allocation9 + $0x540] sm:$0xff] }
 0x34a   :  { %7534 = vmatpush1.bf16.msra.mxu1 %v9322_v30  ;;  %7371 = vmatprep.subr.bf16.mxu0 %v9329_v15  ;;  %v9379_v30 = vcombine.high %v4336_v1, %v4340_v28  ;;  %v4343_v15 = vld [vmem:[#allocation9 + $0x300] sm:$0xff]  ;;  %v4234_v1 = vmax.f32 %v9956_v20, 0.0 }
 0x34b   :  { %7535 = vmatprep.subr.bf16.mxu1 %v9331_v31  ;;  %v4347_v31 = vld [vmem:[#allocation9 + $0x320] sm:$0xff] }
 0x34c   :  { %v9384_v57 = vcombine.low %v4343_v15, %v4347_v31  ;;  %v4383_v28 = vld [vmem:[#allocation9 + $0x440] sm:$0xff] }
 0x34d   :  { %7372 = vmatpush1.bf16.msra.mxu0 %v9328_v14  ;;  %v9385_v14 = vcombine.high %v4343_v15, %v4347_v31  ;;  %v4419_v10 = vld [vmem:[#allocation9 + $0x560] sm:$0xff] }
 0x34e   :  { %7536 = vmatpush1.bf16.msra.mxu1 %v9330_v35  ;;  %7373 = vmatprep.subr.bf16.mxu0 %v9337_v36  ;;  %v9387_v35 = vcombine.high %v4344_v32, %v4348_v33  ;;  %v4351_v36 = vld [vmem:[#allocation9 + $0x340] sm:$0xff] }
 0x34f   :  { %7537 = vmatprep.subr.bf16.mxu1 %v9339_v38  ;;  %v4355_v38 = vld [vmem:[#allocation9 + $0x360] sm:$0xff] }
 0x350   :  { %v9392_v55 = vcombine.low %v4351_v36, %v4355_v38  ;;  %v4391_v32 = vld [vmem:[#allocation9 + $0x480] sm:$0xff] }
 0x351   :  { %7374 = vmatpush1.bf16.msra.mxu0 %v9336_v42  ;;  %v9393_v42 = vcombine.high %v4351_v36, %v4355_v38  ;;  %v4395_v33 = vld [vmem:[#allocation9 + $0x4a0] sm:$0xff] }
 0x352   :  { %7538 = vmatpush1.bf16.msra.mxu1 %v9338_v49  ;;  %7375 = vmatprep.subr.bf16.mxu0 %v9345_v51  ;;  %v9395_v49 = vcombine.high %v4352_v6, %v4356_v39  ;;  %v4359_v51 = vld [vmem:[#allocation9 + $0x380] sm:$0xff] }
 0x353   :  { %7539 = vmatprep.subr.bf16.mxu1 %v9347_v2  ;;  %v4363_v2 = vld [vmem:[#allocation9 + $0x3a0] sm:$0xff] }
 0x354   :  { %v4427_v20 = vld [vmem:[#allocation9 + $0x5a0] sm:$0xff] }
 0x355   :  { %7376 = vmatpush1.bf16.msra.mxu0 %v9344_v5  ;;  %v9394_v5 = vcombine.low %v4352_v6, %v4356_v39  ;;  %v9433_v6 = vcombine.high %v4391_v32, %v4395_v33 }
 0x356   :  { %7540 = vmatpush1.bf16.msra.mxu1 %v9346_v44  ;;  %7377 = vmatprep.subr.bf16.mxu0 %v9353_v63  ;;  %v9401_v44 = vcombine.high %v4359_v51, %v4363_v2  ;;  %v9403_v63 = vcombine.high %v4360_v16, %v4364_v54 }
 0x357   :  { %7541 = vmatprep.subr.bf16.mxu1 %v9355_v52  ;;  %v4367_v52 = vld [vmem:[#allocation9 + $0x3c0] sm:$0xff] }
 0x359   :  { %7378 = vmatpush1.bf16.msra.mxu0 %v9352_v61  ;;  %v9400_v61 = vcombine.low %v4359_v51, %v4363_v2  ;;  %v9432_v51 = vcombine.low %v4391_v32, %v4395_v33  ;;  %v4443_v32 = vld [vmem:[#allocation9 + $0x620] sm:$0xff]  ;;  %v4440_v33 = vld [vmem:[#allocation9 + $0x608] sm:$0xff] }
 0x35a   :  { %7542 = vmatpush1.bf16.msra.mxu1 %v9354_v12  ;;  %7379 = vmatprep.subr.bf16.mxu0 %v9361_v13  ;;  %v9953_v12 = vadd.f32 %v10634_v59, %v978_v58  ;;  %v9402_v13 = vcombine.low %v4360_v16, %v4364_v54  ;;  %v4411_v58 = vld [vmem:[#allocation9 + $0x520] sm:$0xff] }
 0x35b   :  { %7543 = vmatprep.subr.bf16.mxu1 %v9363_v46  ;;  %v9409_v46 = vcombine.high %v4367_v52, %v4371_v4 }
 0x35d   :  { %7380 = vmatpush1.bf16.msra.mxu0 %v9360_v21  ;;  %v4376_v21 = vld [vmem:[#allocation9 + $0x408] sm:$0xff] }
 0x35e   :  { %7544 = vmatpush1.bf16.msra.mxu1 %v9362_v23  ;;  %7381 = vmatprep.subr.bf16.mxu0 %v9369_v24  ;;  %v4380_v23 = vld [vmem:[#allocation9 + $0x428] sm:$0xff]  ;;  %v9408_v24 = vcombine.low %v4367_v52, %v4371_v4 }
 0x35f   :  { %7545 = vmatprep.subr.bf16.mxu1 %v9371_v25  ;;  %v4231_v25 = vmax.f32 %v9953_v12, 0.0  ;;  %v9419_v59 = vcombine.high %v4376_v21, %v4380_v23  ;;  %v9418_v3 = vcombine.low %v4376_v21, %v4380_v23  ;;  %v4420_v12 = vld [vmem:[#allocation9 + $0x568] sm:$0xff] }
 0x360   :  { %v4424_v21 = vld [vmem:[#allocation9 + $0x588] sm:$0xff] }
 0x361   :  { %7382 = vmatpush1.bf16.msra.mxu0 %v9368_v29  ;;  %v4387_v29 = vld [vmem:[#allocation9 + $0x460] sm:$0xff]  ;;  %v10659_v15 = vpack.c.bf16 %v4231_v25, %v4231_v25  ;;  %v4428_v23 = vld [vmem:[#allocation9 + $0x5a8] sm:$0xff] }
 0x362   :  { %7546 = vmatpush1.bf16.msra.mxu1 %v9370_v37  ;;  %7383 = vmatprep.subr.bf16.mxu0 %v9377_v7  ;;  %v9416_v37 = vcombine.low %v4375_v18, %v4379_v19  ;;  %v4384_v7 = vld [vmem:[#allocation9 + $0x448] sm:$0xff]  ;;  %v9425_v31 = vcombine.high %v4383_v28, %v4387_v29  ;;  %v9424_v36 = vcombine.low %v4383_v28, %v4387_v29  ;;  %v4423_v19 = vld [vmem:[#allocation9 + $0x580] sm:$0xff] }
 0x363   :  { %7547 = vmatprep.subr.bf16.mxu1 %v9379_v30  ;;  %v4388_v30 = vld [vmem:[#allocation9 + $0x468] sm:$0xff] }
 0x364   :  { %v9426_v38 = vcombine.low %v4384_v7, %v4388_v30  ;;  %v4432_v28 = vld [vmem:[#allocation9 + $0x5c8] sm:$0xff] }
 0x365   :  { %7384 = vmatpush1.bf16.msra.mxu0 %v9376_v50  ;;  %v10661_v50 = vpack.c.bf16 %v4234_v1, %v4234_v1  ;;  %v4435_v1 = vld [vmem:[#allocation9 + $0x5e0] sm:$0xff]  ;;  %v4436_v29 = vld [vmem:[#allocation9 + $0x5e8] sm:$0xff] }
 0x366   :  { %7548 = vmatpush1.bf16.msra.mxu1 %v9378_v34  ;;  %7385 = vmatprep.subr.bf16.mxu0 %v9385_v14  ;;  %v9427_v34 = vcombine.high %v4384_v7, %v4388_v30  ;;  %v4392_v14 = vld [vmem:[#allocation9 + $0x488] sm:$0xff]  ;;  %v9466_v7 = vcombine.low %v4424_v21, %v4428_v23 }
 0x367   :  { %7549 = vmatprep.subr.bf16.mxu1 %v9387_v35  ;;  %v4396_v35 = vld [vmem:[#allocation9 + $0x4a8] sm:$0xff] }
 0x368   :  { %v9435_v39 = vcombine.high %v4392_v14, %v4396_v35  ;;  %v9434_v2 = vcombine.low %v4392_v14, %v4396_v35  ;;  %v9474_v35 = vcombine.low %v4432_v28, %v4436_v29 }
 0x369   :  { %7386 = vmatpush1.bf16.msra.mxu0 %v9384_v57  ;;  %v4399_v57 = vld [vmem:[#allocation9 + $0x4c0] sm:$0xff] }
 0x36a   :  { %7550 = vmatpush1.bf16.msra.mxu1 %v9386_v41  ;;  %7387 = vmatprep.subr.bf16.mxu0 %v9393_v42  ;;  %v4403_v41 = vld [vmem:[#allocation9 + $0x4e0] sm:$0xff]  ;;  %v4400_v42 = vld [vmem:[#allocation9 + $0x4c8] sm:$0xff] }
 0x36b   :  { %7551 = vmatprep.subr.bf16.mxu1 %v9395_v49  ;;  %v4404_v49 = vld [vmem:[#allocation9 + $0x4e8] sm:$0xff]  ;;  %v9441_v16 = vcombine.high %v4399_v57, %v4403_v41 }
 0x36c   :  { %v9443_v54 = vcombine.high %v4400_v42, %v4404_v49  ;;  %v9442_v52 = vcombine.low %v4400_v42, %v4404_v49 }
 0x36d   :  { %7388 = vmatpush1.bf16.msra.mxu0 %v9392_v55  ;;  %v4407_v55 = vld [vmem:[#allocation9 + $0x500] sm:$0xff] }
 0x36e   :  { %7552 = vmatpush1.bf16.msra.mxu1 %v9394_v5  ;;  %7389 = vmatprep.subr.bf16.mxu0 %v9401_v44  ;;  %v4408_v5 = vld [vmem:[#allocation9 + $0x508] sm:$0xff]  ;;  %v9449_v4 = vcombine.high %v4407_v55, %v4411_v58 }
 0x36f   :  { %7553 = vmatprep.subr.bf16.mxu1 %v9403_v63  ;;  %v4412_v44 = vld [vmem:[#allocation9 + $0x528] sm:$0xff]  ;;  %v9440_v63 = vcombine.low %v4399_v57, %v4403_v41 }
 0x370   :  { %v9451_v8 = vcombine.high %v4408_v5, %v4412_v44  ;;  %v4448_v57 = vld [vmem:[#allocation9 + $0x648] sm:$0xff] }
 0x371   :  { %7390 = vmatpush1.bf16.msra.mxu0 %v9400_v61  ;;  %v4416_v61 = vld [vmem:[#allocation9 + $0x548] sm:$0xff] }
 0x372   :  { %7554 = vmatpush1.bf16.msra.mxu1 %v9402_v13  ;;  %7391 = vmatprep.subr.bf16.mxu0 %v9409_v46  ;;  %v9448_v13 = vcombine.low %v4407_v55, %v4411_v58  ;;  %v9450_v46 = vcombine.low %v4408_v5, %v4412_v44  ;;  %v9459_v18 = vcombine.high %v4416_v61, %v4420_v12  ;;  %v4452_v41 = vld [vmem:[#allocation9 + $0x668] sm:$0xff] }
 0x373   :  { %7555 = vmatprep.subr.bf16.mxu1 %v9411_v17  ;;  %v9457_v17 = vcombine.high %v4415_v9, %v4419_v10  ;;  %v9458_v25 = vcombine.low %v4416_v61, %v4420_v12  ;;  %v4456_v55 = vld [vmem:[#allocation9 + $0x688] sm:$0xff]  ;;  %v9490_v44 = vcombine.low %v4448_v57, %v4452_v41 }
 0x374   :  { %v4460_v58 = vld [vmem:[#allocation9 + $0x6a8] sm:$0xff] }
 0x375   :  { %7392 = vmatpush1.bf16.msra.mxu0 %v9408_v24  ;;  %v9456_v24 = vcombine.low %v4415_v9, %v4419_v10  ;;  %v4464_v9 = vld [vmem:[#allocation9 + $0x6c8] sm:$0xff]  ;;  %v9498_v12 = vcombine.low %v4456_v55, %v4460_v58 }
 0x376   :  { %7556 = vmatpush1.bf16.msra.mxu1 %v9410_v26  ;;  %7402 = vmatprep.subr.bf16.mxu0 %v9417_v27  ;;  %v9465_v26 = vcombine.high %v4423_v19, %v4427_v20  ;;  %v9467_v27 = vcombine.high %v4424_v21, %v4428_v23  ;;  %v4468_v10 = vld [vmem:[#allocation9 + $0x6e8] sm:$0xff] }
 0x377   :  { %7566 = vmatprep.subr.bf16.mxu1 %v9419_v59  ;;  %v4431_v59 = vld [vmem:[#allocation9 + $0x5c0] sm:$0xff]  ;;  %v9506_v23 = vcombine.low %v4464_v9, %v4468_v10 }
 0x378   :  { %7394 = vmatmul.mubr.bf16.vlgmr.msra.gmra.mrb[16].mxu0 %v10659_v15  ;;  %v9473_v30 = vcombine.high %v4431_v59, %v4435_v1  ;;  %v9472_v14 = vcombine.low %v4431_v59, %v4435_v1  ;;  %v4480_v59 = vld [vmem:[#allocation9 + $0x748] sm:$0xff] }
 0x379   :  { %7558 = vmatmul.mubr.bf16.vlgmr.msra.gmra.mrb[16].mxu1 %v10659_v15  ;;  %7403 = vmatpush1.bf16.msra.mxu0 %v9416_v37  ;;  %v9464_v37 = vcombine.low %v4423_v19, %v4427_v20  ;;  %v4472_v19 = vld [vmem:[#allocation9 + $0x708] sm:$0xff] }
 0x37a   :  { %7434 = vmatprep.mubr.bf16.mxu0 %v10661_v50  ;;  %7567 = vmatpush1.bf16.msra.mxu1 %v9418_v3  ;;  %v9475_v3 = vcombine.high %v4432_v28, %v4436_v29  ;;  %v4476_v20 = vld [vmem:[#allocation9 + $0x728] sm:$0xff] }
 0x37b   :  { %7598 = vmatprep.mubr.bf16.mxu1 %v10661_v50  ;;  %7404 = vmatprep.subr.bf16.mxu0 %v9425_v31  ;;  %v4439_v31 = vld [vmem:[#allocation9 + $0x600] sm:$0xff]  ;;  %v4484_v1 = vld [vmem:[#allocation9 + $0x768] sm:$0xff]  ;;  %v9514_v29 = vcombine.low %v4472_v19, %v4476_v20 }
 0x37c   :  { %7568 = vmatprep.subr.bf16.mxu1 %v9427_v34  ;;  %v4444_v34 = vld [vmem:[#allocation9 + $0x628] sm:$0xff]  ;;  %v9480_v42 = vcombine.low %v4439_v31, %v4443_v32 }
 0x37d   :  { %7405 = vmatpush1.bf16.msra.mxu0 %v9424_v36  ;;  %v9481_v36 = vcombine.high %v4439_v31, %v4443_v32  ;;  %v9482_v49 = vcombine.low %v4440_v33, %v4444_v34  ;;  %v4488_v31 = vld [vmem:[#allocation9 + $0x788] sm:$0xff] }
 0x37e   :  { %7569 = vmatpush1.bf16.msra.mxu1 %v9426_v38  ;;  %7406 = vmatprep.subr.bf16.mxu0 %v9433_v6  ;;  %v9483_v38 = vcombine.high %v4440_v33, %v4444_v34  ;;  %v4447_v6 = vld [vmem:[#allocation9 + $0x640] sm:$0xff]  ;;  %v4492_v32 = vld [vmem:[#allocation9 + $0x7a8] sm:$0xff]  ;;  %v986_v34 = vrot.slane %v10642_v22, %v10568_v62 }
 0x37f   :  { %7570 = vmatprep.subr.bf16.mxu1 %v9435_v39  ;;  %v4451_v39 = vld [vmem:[#allocation9 + $0x660] sm:$0xff] }
 0x380   :  { %v9488_v5 = vcombine.low %v4447_v6, %v4451_v39 }
 0x381   :  { %7407 = vmatpush1.bf16.msra.mxu0 %v9432_v51  ;;  %v9489_v51 = vcombine.high %v4447_v6, %v4451_v39  ;;  %v4499_v6 = vld [vmem:[#allocation9 + $0x7e0] sm:$0xff]  ;;  %v4496_v39 = vld [vmem:[#allocation9 + $0x7c8] sm:$0xff] }
 0x382   :  { %7571 = vmatpush1.bf16.msra.mxu1 %v9434_v2  ;;  %7408 = vmatprep.subr.bf16.mxu0 %v9441_v16  ;;  %v9491_v2 = vcombine.high %v4448_v57, %v4452_v41  ;;  %v4455_v16 = vld [vmem:[#allocation9 + $0x680] sm:$0xff]  ;;  %v4500_v57 = vld [vmem:[#allocation9 + $0x7e8] sm:$0xff] }
 0x383   :  { %7572 = vmatprep.subr.bf16.mxu1 %v9443_v54  ;;  %v4459_v54 = vld [vmem:[#allocation9 + $0x6a0] sm:$0xff]  ;;  %v9539_v22 = vcombine.high %v4496_v39, %v4500_v57 }
 0x384   :  { %v9496_v61 = vcombine.low %v4455_v16, %v4459_v54 }
 0x385   :  { %7409 = vmatpush1.bf16.msra.mxu0 %v9440_v63  ;;  %v9497_v63 = vcombine.high %v4455_v16, %v4459_v54  ;;  %v4507_v16 = vld [vmem:[#allocation9 + $0x820] sm:$0xff]  ;;  %v4504_v54 = vld [vmem:[#allocation9 + $0x808] sm:$0xff] }
 0x386   :  { %7573 = vmatpush1.bf16.msra.mxu1 %v9442_v52  ;;  %7410 = vmatprep.subr.bf16.mxu0 %v9449_v4  ;;  %v9499_v52 = vcombine.high %v4456_v55, %v4460_v58  ;;  %v4463_v4 = vld [vmem:[#allocation9 + $0x6c0] sm:$0xff]  ;;  %v4508_v55 = vld [vmem:[#allocation9 + $0x828] sm:$0xff] }
 0x387   :  { %7574 = vmatprep.subr.bf16.mxu1 %v9451_v8  ;;  %v4467_v8 = vld [vmem:[#allocation9 + $0x6e0] sm:$0xff] }
 0x388   :  { %v9504_v21 = vcombine.low %v4463_v4, %v4467_v8 }
 0x389   :  { %7411 = vmatpush1.bf16.msra.mxu0 %v9448_v13  ;;  %v9505_v13 = vcombine.high %v4463_v4, %v4467_v8  ;;  %v4515_v4 = vld [vmem:[#allocation9 + $0x860] sm:$0xff]  ;;  %v4512_v8 = vld [vmem:[#allocation9 + $0x848] sm:$0xff] }
 0x38a   :  { %7575 = vmatpush1.bf16.msra.mxu1 %v9450_v46  ;;  %7412 = vmatprep.subr.bf16.mxu0 %v9457_v17  ;;  %v9507_v46 = vcombine.high %v4464_v9, %v4468_v10  ;;  %v4471_v17 = vld [vmem:[#allocation9 + $0x700] sm:$0xff]  ;;  %v4516_v9 = vld [vmem:[#allocation9 + $0x868] sm:$0xff] }
 0x38b   :  { %7576 = vmatprep.subr.bf16.mxu1 %v9459_v18  ;;  %v4475_v18 = vld [vmem:[#allocation9 + $0x720] sm:$0xff] }
 0x38c   :  { %v9512_v28 = vcombine.low %v4471_v17, %v4475_v18 }
 0x38d   :  { %7413 = vmatpush1.bf16.msra.mxu0 %v9456_v24  ;;  %v9513_v24 = vcombine.high %v4471_v17, %v4475_v18  ;;  %v4519_v17 = vld [vmem:[#allocation9 + $0x880] sm:$0xff] }
 0x38e   :  { %7577 = vmatpush1.bf16.msra.mxu1 %v9458_v25  ;;  %7414 = vmatprep.subr.bf16.mxu0 %v9465_v26  ;;  %v9515_v25 = vcombine.high %v4472_v19, %v4476_v20  ;;  %v4479_v26 = vld [vmem:[#allocation9 + $0x740] sm:$0xff]  ;;  %v4520_v19 = vld [vmem:[#allocation9 + $0x888] sm:$0xff] }
 0x38f   :  { %7578 = vmatprep.subr.bf16.mxu1 %v9467_v27  ;;  %v4483_v27 = vld [vmem:[#allocation9 + $0x760] sm:$0xff]  ;;  %v4524_v20 = vld [vmem:[#allocation9 + $0x8a8] sm:$0xff] }
 0x390   :  { %v9520_v33 = vcombine.low %v4479_v26, %v4483_v27  ;;  %v4523_v18 = vld [vmem:[#allocation9 + $0x8a0] sm:$0xff] }
 0x391   :  { %7415 = vmatpush1.bf16.msra.mxu0 %v9464_v37  ;;  %v9521_v37 = vcombine.high %v4479_v26, %v4483_v27  ;;  %v4527_v26 = vld [vmem:[#allocation9 + $0x8c0] sm:$0xff] }
 0x392   :  { %7579 = vmatpush1.bf16.msra.mxu1 %v9466_v7  ;;  %7416 = vmatprep.subr.bf16.mxu0 %v9473_v30  ;;  %v9523_v7 = vcombine.high %v4480_v59, %v4484_v1  ;;  %v4487_v30 = vld [vmem:[#allocation9 + $0x780] sm:$0xff] }
 0x393   :  { %7580 = vmatprep.subr.bf16.mxu1 %v9475_v3  ;;  %v4491_v3 = vld [vmem:[#allocation9 + $0x7a0] sm:$0xff] }
 0x394   :  { %v9528_v41 = vcombine.low %v4487_v30, %v4491_v3  ;;  %v4531_v27 = vld [vmem:[#allocation9 + $0x8e0] sm:$0xff] }
 0x395   :  { %7417 = vmatpush1.bf16.msra.mxu0 %v9472_v14  ;;  %v9522_v14 = vcombine.low %v4480_v59, %v4484_v1  ;;  %v4528_v59 = vld [vmem:[#allocation9 + $0x8c8] sm:$0xff] }
 0x396   :  { %7581 = vmatpush1.bf16.msra.mxu1 %v9474_v35  ;;  %7418 = vmatprep.subr.bf16.mxu0 %v9481_v36  ;;  %v9529_v35 = vcombine.high %v4487_v30, %v4491_v3  ;;  %v9531_v36 = vcombine.high %v4488_v31, %v4492_v32  ;;  %v4532_v1 = vld [vmem:[#allocation9 + $0x8e8] sm:$0xff]  ;;  %v4535_v30 = vld [vmem:[#allocation9 + $0x900] sm:$0xff] }
 0x397   :  { %7582 = vmatprep.subr.bf16.mxu1 %v9483_v38  ;;  %v4495_v38 = vld [vmem:[#allocation9 + $0x7c0] sm:$0xff] }
 0x398   :  { %v9536_v58 = vcombine.low %v4495_v38, %v4499_v6  ;;  %v4539_v3 = vld [vmem:[#allocation9 + $0x920] sm:$0xff] }
 0x399   :  { %7419 = vmatpush1.bf16.msra.mxu0 %v9480_v42  ;;  %v9955_v42 = vadd.f32 %v10636_v60, %v986_v34  ;;  %v4511_v60 = vld [vmem:[#allocation9 + $0x840] sm:$0xff]  ;;  %v9570_v34 = vcombine.low %v4528_v59, %v4532_v1 }
 0x39a   :  { %7583 = vmatpush1.bf16.msra.mxu1 %v9482_v49  ;;  %7420 = vmatprep.subr.bf16.mxu0 %v9489_v51  ;;  %v9530_v49 = vcombine.low %v4488_v31, %v4492_v32  ;;  %v9537_v51 = vcombine.high %v4495_v38, %v4499_v6  ;;  %v4536_v31 = vld [vmem:[#allocation9 + $0x908] sm:$0xff]  ;;  %v4547_v38 = vld [vmem:[#allocation9 + $0x960] sm:$0xff] }
 0x39b   :  { %7584 = vmatprep.subr.bf16.mxu1 %v9491_v2  ;;  %v4503_v2 = vld [vmem:[#allocation9 + $0x800] sm:$0xff]  ;;  %v4540_v32 = vld [vmem:[#allocation9 + $0x928] sm:$0xff] }
 0x39c   :  { %v9544_v10 = vcombine.low %v4503_v2, %v4507_v16  ;;  %v4544_v6 = vld [vmem:[#allocation9 + $0x948] sm:$0xff] }
 0x39d   :  { %7421 = vmatpush1.bf16.msra.mxu0 %v9488_v5  ;;  %v4233_v5 = vmax.f32 %v9955_v42, 0.0 }
 0x39e   :  { %7585 = vmatpush1.bf16.msra.mxu1 %v9490_v44  ;;  %7422 = vmatprep.subr.bf16.mxu0 %v9497_v63  ;;  %v9538_v44 = vcombine.low %v4496_v39, %v4500_v57  ;;  %v9545_v63 = vcombine.high %v4503_v2, %v4507_v16  ;;  %v4548_v39 = vld [vmem:[#allocation9 + $0x968] sm:$0xff]  ;;  %v9576_v57 = vcombine.low %v4535_v30, %v4539_v3 }
 0x39f   :  { %7586 = vmatprep.subr.bf16.mxu1 %v9499_v52  ;;  %v9547_v52 = vcombine.high %v4504_v54, %v4508_v55  ;;  %v4552_v2 = vld [vmem:[#allocation9 + $0x988] sm:$0xff] }
 0x3a0   :  { %v4556_v16 = vld [vmem:[#allocation9 + $0x9a8] sm:$0xff] }
 0x3a1   :  { %7423 = vmatpush1.bf16.msra.mxu0 %v9496_v61  ;;  %v10670_v61 = vpack.c.bf16 %v4233_v5, %v4233_v5  ;;  %v9595_v5 = vcombine.high %v4552_v2, %v4556_v16 }
 0x3a2   :  { %7587 = vmatpush1.bf16.msra.mxu1 %v9498_v12  ;;  %7424 = vmatprep.subr.bf16.mxu0 %v9505_v13  ;;  %v9546_v12 = vcombine.low %v4504_v54, %v4508_v55  ;;  %v9553_v13 = vcombine.high %v4511_v60, %v4515_v4  ;;  %v9586_v55 = vcombine.low %v4544_v6, %v4548_v39 }
 0x3a3   :  { %7588 = vmatprep.subr.bf16.mxu1 %v9507_v46  ;;  %v9555_v46 = vcombine.high %v4512_v8, %v4516_v9 }
 0x3a5   :  { %7425 = vmatpush1.bf16.msra.mxu0 %v9504_v21  ;;  %v9552_v21 = vcombine.low %v4511_v60, %v4515_v4  ;;  %v4564_v60 = vld [vmem:[#allocation9 + $0x9e8] sm:$0xff] }
 0x3a6   :  { %7589 = vmatpush1.bf16.msra.mxu1 %v9506_v23  ;;  %7426 = vmatprep.subr.bf16.mxu0 %v9513_v24  ;;  %v9554_v23 = vcombine.low %v4512_v8, %v4516_v9  ;;  %v9561_v24 = vcombine.high %v4519_v17, %v4523_v18  ;;  %v9594_v8 = vcombine.low %v4552_v2, %v4556_v16 }
 0x3a7   :  { %7590 = vmatprep.subr.bf16.mxu1 %v9515_v25  ;;  %v9563_v25 = vcombine.high %v4520_v19, %v4524_v20 }
 0x3a9   :  { %7427 = vmatpush1.bf16.msra.mxu0 %v9512_v28  ;;  %v9560_v28 = vcombine.low %v4519_v17, %v4523_v18  ;;  %v4572_v17 = vld [vmem:[#allocation9 + $0xa28] sm:$0xff] }
 0x3aa   :  { %7591 = vmatpush1.bf16.msra.mxu1 %v9514_v29  ;;  %7428 = vmatprep.subr.bf16.mxu0 %v9521_v37  ;;  %v9562_v29 = vcombine.low %v4520_v19, %v4524_v20  ;;  %v9569_v37 = vcombine.high %v4527_v26, %v4531_v27 }
 0x3ab   :  { %7592 = vmatprep.subr.bf16.mxu1 %v9523_v7  ;;  %v9571_v7 = vcombine.high %v4528_v59, %v4532_v1 }
 0x3ad   :  { %7429 = vmatpush1.bf16.msra.mxu0 %v9520_v33  ;;  %v9568_v33 = vcombine.low %v4527_v26, %v4531_v27  ;;  %v4580_v26 = vld [vmem:[#allocation9 + $0xa68] sm:$0xff] }
 0x3ae   :  { %7593 = vmatpush1.bf16.msra.mxu1 %v9522_v14  ;;  %7430 = vmatprep.subr.bf16.mxu0 %v9529_v35  ;;  %v9577_v14 = vcombine.high %v4535_v30, %v4539_v3  ;;  %v9579_v35 = vcombine.high %v4536_v31, %v4540_v32  ;;  %v4588_v30 = vld [vmem:[#allocation9 + $0xaa8] sm:$0xff] }
 0x3af   :  { %7594 = vmatprep.subr.bf16.mxu1 %v9531_v36  ;;  %v4543_v36 = vld [vmem:[#allocation9 + $0x940] sm:$0xff] }
 0x3b0   :  { %v9585_v42 = vcombine.high %v4543_v36, %v4547_v38  ;;  %v9584_v54 = vcombine.low %v4543_v36, %v4547_v38  ;;  %v4596_v36 = vld [vmem:[#allocation9 + $0xae8] sm:$0xff] }
 0x3b1   :  { %7431 = vmatpush1.bf16.msra.mxu0 %v9528_v41  ;;  %v9578_v41 = vcombine.low %v4536_v31, %v4540_v32 }
 0x3b2   :  { %7595 = vmatpush1.bf16.msra.mxu1 %v9530_v49  ;;  %7432 = vmatprep.subr.bf16.mxu0 %v9537_v51  ;;  %v9587_v49 = vcombine.high %v4544_v6, %v4548_v39  ;;  %v4551_v51 = vld [vmem:[#allocation9 + $0x980] sm:$0xff] }
 0x3b3   :  { %7596 = vmatprep.subr.bf16.mxu1 %v9539_v22  ;;  %v4555_v22 = vld [vmem:[#allocation9 + $0x9a0] sm:$0xff] }
 0x3b4   :  { %v9592_v4 = vcombine.low %v4551_v51, %v4555_v22 }
 0x3b5   :  { %7433 = vmatpush1.bf16.msra.mxu0 %v9536_v58  ;;  %v9593_v58 = vcombine.high %v4551_v51, %v4555_v22  ;;  %v4604_v51 = vld [vmem:[#allocation9 + $0xb28] sm:$0xff] }
 0x3b6   :  { %7597 = vmatpush1.bf16.msra.mxu1 %v9538_v44  ;;  %7443 = vmatprep.subr.bf16.mxu0 %v9545_v63  ;;  %v4559_v44 = vld [vmem:[#allocation9 + $0x9c0] sm:$0xff] }
 0x3b7   :  { %7607 = vmatprep.subr.bf16.mxu1 %v9547_v52  ;;  %v4563_v63 = vld [vmem:[#allocation9 + $0x9e0] sm:$0xff]  ;;  %v4560_v52 = vld [vmem:[#allocation9 + $0x9c8] sm:$0xff] }
 0x3b8   :  { %7435 = vmatmul.mubr.bf16.vlgmr.msra.gmra.mrb[16].mxu0 %v10670_v61  ;;  %v9601_v9 = vcombine.high %v4559_v44, %v4563_v63  ;;  %v9600_v18 = vcombine.low %v4559_v44, %v4563_v63  ;;  %v9602_v19 = vcombine.low %v4560_v52, %v4564_v60  ;;  %v4612_v44 = vld [vmem:[#allocation9 + $0xb68] sm:$0xff] }
 0x3b9   :  { %7599 = vmatmul.mubr.bf16.vlgmr.msra.gmra.mrb[16].mxu1 %v10670_v61  ;;  %7444 = vmatpush1.bf16.msra.mxu0 %v9544_v10  ;;  %v9603_v10 = vcombine.high %v4560_v52, %v4564_v60 }
 0x3ba   :  { %7608 = vmatpush1.bf16.msra.mxu1 %v9546_v12  ;;  %7445 = vmatprep.subr.bf16.mxu0 %v9553_v13  ;;  %v4567_v12 = vld [vmem:[#allocation9 + $0xa00] sm:$0xff] }
 0x3bb   :  { %7609 = vmatprep.subr.bf16.mxu1 %v9555_v46  ;;  %v4571_v13 = vld [vmem:[#allocation9 + $0xa20] sm:$0xff]  ;;  %v4568_v46 = vld [vmem:[#allocation9 + $0xa08] sm:$0xff] }
 0x3bc   :  { %v9609_v20 = vcombine.high %v4567_v12, %v4571_v13  ;;  %v9608_v27 = vcombine.low %v4567_v12, %v4571_v13  ;;  %v9610_v59 = vcombine.low %v4568_v46, %v4572_v17  ;;  %v4620_v12 = vld [vmem:[#allocation9 + $0xba8] sm:$0xff] }
 0x3bd   :  { %7446 = vmatpush1.bf16.msra.mxu0 %v9552_v21  ;;  %v9611_v21 = vcombine.high %v4568_v46, %v4572_v17 }
 0x3be   :  { %7610 = vmatpush1.bf16.msra.mxu1 %v9554_v23  ;;  %7447 = vmatprep.subr.bf16.mxu0 %v9561_v24  ;;  %v4575_v23 = vld [vmem:[#allocation9 + $0xa40] sm:$0xff] }
 0x3bf   :  { %7611 = vmatprep.subr.bf16.mxu1 %v9563_v25  ;;  %v4579_v24 = vld [vmem:[#allocation9 + $0xa60] sm:$0xff]  ;;  %v4576_v25 = vld [vmem:[#allocation9 + $0xa48] sm:$0xff] }
 0x3c0   :  { %v9617_v1 = vcombine.high %v4575_v23, %v4579_v24  ;;  %v9616_v3 = vcombine.low %v4575_v23, %v4579_v24  ;;  %v9618_v31 = vcombine.low %v4576_v25, %v4580_v26  ;;  %v4628_v23 = vld [vmem:[#allocation9 + $0xbe8] sm:$0xff] }
 0x3c1   :  { %7448 = vmatpush1.bf16.msra.mxu0 %v9560_v28  ;;  %v9619_v28 = vcombine.high %v4576_v25, %v4580_v26 }
 0x3c2   :  { %7612 = vmatpush1.bf16.msra.mxu1 %v9562_v29  ;;  %7449 = vmatprep.subr.bf16.mxu0 %v9569_v37  ;;  %v4583_v29 = vld [vmem:[#allocation9 + $0xa80] sm:$0xff] }
 0x3c3   :  { %7613 = vmatprep.subr.bf16.mxu1 %v9571_v7  ;;  %v4587_v37 = vld [vmem:[#allocation9 + $0xaa0] sm:$0xff]  ;;  %v4584_v7 = vld [vmem:[#allocation9 + $0xa88] sm:$0xff] }
 0x3c4   :  { %v9625_v32 = vcombine.high %v4583_v29, %v4587_v37  ;;  %v9624_v38 = vcombine.low %v4583_v29, %v4587_v37  ;;  %v9626_v6 = vcombine.low %v4584_v7, %v4588_v30  ;;  %v4636_v29 = vld [vmem:[#allocation9 + $0xc28] sm:$0xff] }
 0x3c5   :  { %7450 = vmatpush1.bf16.msra.mxu0 %v9568_v33  ;;  %v9627_v33 = vcombine.high %v4584_v7, %v4588_v30 }
 0x3c6   :  { %7614 = vmatpush1.bf16.msra.mxu1 %v9570_v34  ;;  %7451 = vmatprep.subr.bf16.mxu0 %v9577_v14  ;;  %v4591_v34 = vld [vmem:[#allocation9 + $0xac0] sm:$0xff] }
 0x3c7   :  { %7615 = vmatprep.subr.bf16.mxu1 %v9579_v35  ;;  %v4595_v14 = vld [vmem:[#allocation9 + $0xae0] sm:$0xff]  ;;  %v4592_v35 = vld [vmem:[#allocation9 + $0xac8] sm:$0xff] }
 0x3c8   :  { %v9633_v39 = vcombine.high %v4591_v34, %v4595_v14  ;;  %v9632_v22 = vcombine.low %v4591_v34, %v4595_v14  ;;  %v9634_v2 = vcombine.low %v4592_v35, %v4596_v36 }
 0x3c9   :  { %7452 = vmatpush1.bf16.msra.mxu0 %v9576_v57  ;;  %v9635_v57 = vcombine.high %v4592_v35, %v4596_v36 }
 0x3ca   :  { %7616 = vmatpush1.bf16.msra.mxu1 %v9578_v41  ;;  %7453 = vmatprep.subr.bf16.mxu0 %v9585_v42  ;;  %v4599_v41 = vld [vmem:[#allocation9 + $0xb00] sm:$0xff] }
 0x3cb   :  { %7617 = vmatprep.subr.bf16.mxu1 %v9587_v49  ;;  %v4603_v42 = vld [vmem:[#allocation9 + $0xb20] sm:$0xff]  ;;  %v4600_v49 = vld [vmem:[#allocation9 + $0xb08] sm:$0xff] }
 0x3cc   :  { %v9641_v16 = vcombine.high %v4599_v41, %v4603_v42  ;;  %v9640_v63 = vcombine.low %v4599_v41, %v4603_v42  ;;  %v9642_v52 = vcombine.low %v4600_v49, %v4604_v51 }
 0x3cd   :  { %7454 = vmatpush1.bf16.msra.mxu0 %v9584_v54  ;;  %v9643_v54 = vcombine.high %v4600_v49, %v4604_v51 }
 0x3ce   :  { %7618 = vmatpush1.bf16.msra.mxu1 %v9586_v55  ;;  %7455 = vmatprep.subr.bf16.mxu0 %v9593_v58  ;;  %v4607_v55 = vld [vmem:[#allocation9 + $0xb40] sm:$0xff] }
 0x3cf   :  { %7619 = vmatprep.subr.bf16.mxu1 %v9595_v5  ;;  %v4611_v58 = vld [vmem:[#allocation9 + $0xb60] sm:$0xff]  ;;  %v4608_v5 = vld [vmem:[#allocation9 + $0xb48] sm:$0xff] }
 0x3d0   :  { %v9649_v60 = vcombine.high %v4607_v55, %v4611_v58  ;;  %v9648_v13 = vcombine.low %v4607_v55, %v4611_v58  ;;  %v9650_v46 = vcombine.low %v4608_v5, %v4612_v44  ;;  %v4643_v55 = vld [vmem:[#allocation9 + $0xc60] sm:$0xff]  ;;  %v4640_v58 = vld [vmem:[#allocation9 + $0xc48] sm:$0xff] }
 0x3d1   :  { %7456 = vmatpush1.bf16.msra.mxu0 %v9592_v4  ;;  %v9651_v4 = vcombine.high %v4608_v5, %v4612_v44  ;;  %v4644_v5 = vld [vmem:[#allocation9 + $0xc68] sm:$0xff] }
 0x3d2   :  { %7620 = vmatpush1.bf16.msra.mxu1 %v9594_v8  ;;  %7457 = vmatprep.subr.bf16.mxu0 %v9601_v9  ;;  %v4615_v8 = vld [vmem:[#allocation9 + $0xb80] sm:$0xff] }
 0x3d3   :  { %7621 = vmatprep.subr.bf16.mxu1 %v9603_v10  ;;  %v4619_v9 = vld [vmem:[#allocation9 + $0xba0] sm:$0xff]  ;;  %v4616_v10 = vld [vmem:[#allocation9 + $0xb88] sm:$0xff] }
 0x3d4   :  { %v9657_v17 = vcombine.high %v4615_v8, %v4619_v9  ;;  %v9656_v24 = vcombine.low %v4615_v8, %v4619_v9  ;;  %v9658_v25 = vcombine.low %v4616_v10, %v4620_v12  ;;  %v9683_v9 = vcombine.high %v4640_v58, %v4644_v5 }
 0x3d5   :  { %7458 = vmatpush1.bf16.msra.mxu0 %v9600_v18  ;;  %v9659_v18 = vcombine.high %v4616_v10, %v4620_v12  ;;  %v4651_v10 = vld [vmem:[#allocation9 + $0xca0] sm:$0xff]  ;;  %v4648_v12 = vld [vmem:[#allocation9 + $0xc88] sm:$0xff] }
 0x3d6   :  { %7622 = vmatpush1.bf16.msra.mxu1 %v9602_v19  ;;  %7459 = vmatprep.subr.bf16.mxu0 %v9609_v20  ;;  %v4623_v19 = vld [vmem:[#allocation9 + $0xbc0] sm:$0xff] }
 0x3d7   :  { %7623 = vmatprep.subr.bf16.mxu1 %v9611_v21  ;;  %v4627_v20 = vld [vmem:[#allocation9 + $0xbe0] sm:$0xff]  ;;  %v4624_v21 = vld [vmem:[#allocation9 + $0xbc8] sm:$0xff] }
 0x3d8   :  { %v9665_v26 = vcombine.high %v4623_v19, %v4627_v20  ;;  %v9664_v37 = vcombine.low %v4623_v19, %v4627_v20  ;;  %v9666_v7 = vcombine.low %v4624_v21, %v4628_v23 }
 0x3d9   :  { %7460 = vmatpush1.bf16.msra.mxu0 %v9608_v27  ;;  %v9667_v27 = vcombine.high %v4624_v21, %v4628_v23  ;;  %v4655_v21 = vld [vmem:[#allocation9 + $0xcc0] sm:$0xff] }
 0x3da   :  { %7624 = vmatpush1.bf16.msra.mxu1 %v9610_v59  ;;  %7461 = vmatprep.subr.bf16.mxu0 %v9617_v1  ;;  %v4631_v59 = vld [vmem:[#allocation9 + $0xc00] sm:$0xff] }
 0x3db   :  { %7625 = vmatprep.subr.bf16.mxu1 %v9619_v28  ;;  %v4635_v1 = vld [vmem:[#allocation9 + $0xc20] sm:$0xff]  ;;  %v4632_v28 = vld [vmem:[#allocation9 + $0xc08] sm:$0xff] }
 0x3dc   :  { %v9673_v30 = vcombine.high %v4631_v59, %v4635_v1  ;;  %v4659_v23 = vld [vmem:[#allocation9 + $0xce0] sm:$0xff] }
 0x3dd   :  { %7462 = vmatpush1.bf16.msra.mxu0 %v9616_v3  ;;  %v9675_v3 = vcombine.high %v4632_v28, %v4636_v29 }
 0x3de   :  { %7626 = vmatpush1.bf16.msra.mxu1 %v9618_v31  ;;  %7463 = vmatprep.subr.bf16.mxu0 %v9625_v32  ;;  %v10674_v31 = vld [vmem:[#allocation7] sm:$0xff] }
 0x3df   :  { %7627 = vmatprep.subr.bf16.mxu1 %v9627_v33  ;;  %v994_v32 = vrot.slane %v10674_v31, %v10592_v53  ;;  %v998_v33 = vrot.slane %v10674_v31, %v10575_v11  ;;  %v1006_v34 = vrot.slane %v10674_v31, %v10595_v0 }
 0x3e1   :  { %7464 = vmatpush1.bf16.msra.mxu0 %v9624_v38 }
 0x3e2   :  { %7628 = vmatpush1.bf16.msra.mxu1 %v9626_v6  ;;  %7465 = vmatprep.subr.bf16.mxu0 %v9633_v39 }
 0x3e3   :  { %7629 = vmatprep.subr.bf16.mxu1 %v9635_v57 }
 0x3e5   :  { %7466 = vmatpush1.bf16.msra.mxu0 %v9632_v22 }
 0x3e6   :  { %7630 = vmatpush1.bf16.msra.mxu1 %v9634_v2  ;;  %7467 = vmatprep.subr.bf16.mxu0 %v9641_v16  ;;  %v4639_v16 = vld [vmem:[#allocation9 + $0xc40] sm:$0xff] }
 0x3e7   :  { %7631 = vmatprep.subr.bf16.mxu1 %v9643_v54  ;;  %v9681_v8 = vcombine.high %v4639_v16, %v4643_v55 }
 0x3e9   :  { %7468 = vmatpush1.bf16.msra.mxu0 %v9640_v63  ;;  %v9672_v63 = vcombine.low %v4631_v59, %v4635_v1  ;;  %v9697_v59 = vcombine.high %v4655_v21, %v4659_v23 }
 0x3ea   :  { %7632 = vmatpush1.bf16.msra.mxu1 %v9642_v52  ;;  %7469 = vmatprep.subr.bf16.mxu0 %v9649_v60  ;;  %v9674_v52 = vcombine.low %v4632_v28, %v4636_v29  ;;  %v4663_v28 = vld [vmem:[#allocation9 + $0xd00] sm:$0xff] }
 0x3eb   :  { %7633 = vmatprep.subr.bf16.mxu1 %v9651_v4  ;;  %v4647_v4 = vld [vmem:[#allocation9 + $0xc80] sm:$0xff] }
 0x3ec   :  { %v9689_v19 = vcombine.high %v4647_v4, %v4651_v10  ;;  %v4667_v29 = vld [vmem:[#allocation9 + $0xd20] sm:$0xff] }
 0x3ed   :  { %7470 = vmatpush1.bf16.msra.mxu0 %v9648_v13  ;;  %v4652_v13 = vld [vmem:[#allocation9 + $0xca8] sm:$0xff] }
 0x3ee   :  { %7634 = vmatpush1.bf16.msra.mxu1 %v9650_v46  ;;  %7471 = vmatprep.subr.bf16.mxu0 %v9657_v17  ;;  %v9680_v17 = vcombine.low %v4639_v16, %v4643_v55  ;;  %v9691_v20 = vcombine.high %v4648_v12, %v4652_v13 }
 0x3ef   :  { %7635 = vmatprep.subr.bf16.mxu1 %v9659_v18  ;;  %v9682_v18 = vcombine.low %v4640_v58, %v4644_v5  ;;  %v4687_v58 = vld [vmem:[#allocation9 + $0xdc0] sm:$0xff] }
 0x3f0   :  { %v4691_v5 = vld [vmem:[#allocation9 + $0xde0] sm:$0xff] }
 0x3f1   :  { %7472 = vmatpush1.bf16.msra.mxu0 %v9656_v24  ;;  %v4656_v24 = vld [vmem:[#allocation9 + $0xcc8] sm:$0xff] }
 0x3f2   :  { %7636 = vmatpush1.bf16.msra.mxu1 %v9658_v25  ;;  %7473 = vmatprep.subr.bf16.mxu0 %v9665_v26  ;;  %v4660_v25 = vld [vmem:[#allocation9 + $0xce8] sm:$0xff]  ;;  %v9688_v26 = vcombine.low %v4647_v4, %v4651_v10 }
 0x3f3   :  { %7637 = vmatprep.subr.bf16.mxu1 %v9667_v27  ;;  %v9690_v27 = vcombine.low %v4648_v12, %v4652_v13  ;;  %v9699_v1 = vcombine.high %v4656_v24, %v4660_v25  ;;  %v4695_v12 = vld [vmem:[#allocation9 + $0xe00] sm:$0xff] }
 0x3f4   :  { %v4699_v13 = vld [vmem:[#allocation9 + $0xe20] sm:$0xff] }
 0x3f5   :  { %7474 = vmatpush1.bf16.msra.mxu0 %v9664_v37  ;;  %v4664_v37 = vld [vmem:[#allocation9 + $0xd08] sm:$0xff] }
 0x3f6   :  { %7638 = vmatpush1.bf16.msra.mxu1 %v9666_v7  ;;  %7484 = vmatprep.subr.bf16.mxu0 %v9673_v30  ;;  %v4668_v7 = vld [vmem:[#allocation9 + $0xd28] sm:$0xff]  ;;  %v9696_v30 = vcombine.low %v4655_v21, %v4659_v23  ;;  %v9737_v21 = vcombine.high %v4695_v12, %v4699_v13 }
 0x3f7   :  { %7648 = vmatprep.subr.bf16.mxu1 %v9675_v3  ;;  %v9698_v3 = vcombine.low %v4656_v24, %v4660_v25  ;;  %v4703_v24 = vld [vmem:[#allocation9 + $0xe40] sm:$0xff] }
 0x3f8   :  { %v4707_v25 = vld [vmem:[#allocation9 + $0xe60] sm:$0xff] }
 0x40b   :  { %v4060_v14 = vpop.f32.mrb[12].mxu0 }
 0x40c   :  { %v9957_v35 = vadd.f32 %v4060_v14, %v994_v32  ;;  %v10682_v36 = vpop.f32.mrb[12].mxu1  ;;  %v4062_v38 = vpop.f32.mrb[13].mxu0  ;;  %v9705_v32 = vcombine.high %v4663_v28, %v4667_v29  ;;  %v4675_v14 = vld [vmem:[#allocation9 + $0xd60] sm:$0xff] }
 0x40d   :  { %v9958_v6 = vadd.f32 %v4062_v38, %v998_v33  ;;  %v4226_v39 = vpop.f32.mrb[13].mxu1  ;;  %v4064_v57 = vpop.f32.mrb[14].mxu0  ;;  %v9707_v33 = vcombine.high %v4664_v37, %v4668_v7  ;;  %v4676_v38 = vld [vmem:[#allocation9 + $0xd68] sm:$0xff] }
 0x40e   :  { %v4235_v41 = vmax.f32 %v9957_v35, 0.0  ;;  %v9960_v42 = vadd.f32 %v4226_v39, %v1006_v34  ;;  %v4228_v49 = vpop.f32.mrb[14].mxu1  ;;  %v4065_v51 = vpop.f32.mrb[15].mxu0  ;;  %v4671_v34 = vld [vmem:[#allocation9 + $0xd40] sm:$0xff]  ;;  %v4672_v35 = vld [vmem:[#allocation9 + $0xd48] sm:$0xff]  ;;  %v9706_v39 = vcombine.low %v4664_v37, %v4668_v7 }
 0x40f   :  { %v4236_v22 = vmax.f32 %v9958_v6, 0.0  ;;  %v4229_v2 = vpop.f32.mrb[15].mxu1  ;;  %v9704_v6 = vcombine.low %v4663_v28, %v4667_v29  ;;  %v9713_v57 = vcombine.high %v4671_v34, %v4675_v14  ;;  %v4683_v49 = vld [vmem:[#allocation9 + $0xda0] sm:$0xff]  ;;  %v4680_v51 = vld [vmem:[#allocation9 + $0xd88] sm:$0xff]  ;;  %v9714_v16 = vcombine.low %v4672_v35, %v4676_v38 }
 0x410   :  { %v4238_v54 = vmax.f32 %v9960_v42, 0.0  ;;  %v10686_v60 = vpack.c.bf16 %v4235_v41, %v4235_v41  ;;  %v9715_v41 = vcombine.high %v4672_v35, %v4676_v38  ;;  %v4679_v42 = vld [vmem:[#allocation9 + $0xd80] sm:$0xff]  ;;  %v9712_v2 = vcombine.low %v4671_v34, %v4675_v14 }
 0x411   :  { %v10684_v44 = vpack.c.bf16 %v4236_v22, %v4236_v22  ;;  %v4684_v22 = vld [vmem:[#allocation9 + $0xda8] sm:$0xff]  ;;  %v9720_v4 = vcombine.low %v4679_v42, %v4683_v49  ;;  %v9745_v28 = vcombine.high %v4703_v24, %v4707_v25  ;;  %v4711_v37 = vld [vmem:[#allocation9 + $0xe80] sm:$0xff] }
 0x412   :  { %v10690_v46 = vpack.c.bf16 %v4238_v54, %v4238_v54  ;;  %v9721_v54 = vcombine.high %v4679_v42, %v4683_v49  ;;  %v9723_v55 = vcombine.high %v4680_v51, %v4684_v22  ;;  %v4715_v7 = vld [vmem:[#allocation9 + $0xea0] sm:$0xff] }
 0x413   :  { %7475 = vmatprep.mubr.bf16.mxu0 %v10684_v44  ;;  %7639 = vmatprep.mubr.bf16.mxu1 %v10684_v44  ;;  %v9753_v34 = vcombine.high %v4711_v37, %v4715_v7  ;;  %v4719_v35 = vld [vmem:[#allocation9 + $0xec0] sm:$0xff] }
 0x414   :  { %7476 = vmatmul.mubr.bf16.vlgmr.msra.gmra.mrb[16].mxu0 %v10686_v60  ;;  %7640 = vmatmul.mubr.bf16.vlgmr.msra.gmra.mrb[16].mxu1 %v10686_v60  ;;  %v4723_v38 = vld [vmem:[#allocation9 + $0xee0] sm:$0xff] }
 0x415   :  { %7485 = vmatpush1.bf16.msra.mxu0 %v9672_v63  ;;  %7649 = vmatpush1.bf16.msra.mxu1 %v9674_v52  ;;  %v4688_v63 = vld [vmem:[#allocation9 + $0xdc8] sm:$0xff]  ;;  %v9761_v42 = vcombine.high %v4719_v35, %v4723_v38 }
 0x416   :  { %7516 = vmatprep.mubr.bf16.mxu0 %v10690_v46  ;;  %7680 = vmatprep.mubr.bf16.mxu1 %v10690_v46  ;;  %v4692_v52 = vld [vmem:[#allocation9 + $0xde8] sm:$0xff] }
 0x417   :  { %7486 = vmatprep.subr.bf16.mxu0 %v9681_v8  ;;  %7650 = vmatprep.subr.bf16.mxu1 %v9683_v9  ;;  %v9722_v8 = vcombine.low %v4680_v51, %v4684_v22  ;;  %v9729_v9 = vcombine.high %v4687_v58, %v4691_v5  ;;  %v9731_v10 = vcombine.high %v4688_v63, %v4692_v52  ;;  %v4727_v51 = vld [vmem:[#allocation9 + $0xf00] sm:$0xff] }
 0x418   :  { %v4731_v22 = vld [vmem:[#allocation9 + $0xf20] sm:$0xff] }
 0x419   :  { %7487 = vmatpush1.bf16.msra.mxu0 %v9680_v17  ;;  %7651 = vmatpush1.bf16.msra.mxu1 %v9682_v18  ;;  %v4696_v17 = vld [vmem:[#allocation9 + $0xe08] sm:$0xff] }
 0x41a   :  { %7488 = vmatprep.subr.bf16.mxu0 %v9689_v19  ;;  %7652 = vmatprep.subr.bf16.mxu1 %v9691_v20  ;;  %v4700_v18 = vld [vmem:[#allocation9 + $0xe28] sm:$0xff]  ;;  %v9728_v19 = vcombine.low %v4687_v58, %v4691_v5  ;;  %v9730_v20 = vcombine.low %v4688_v63, %v4692_v52  ;;  %v9769_v58 = vcombine.high %v4727_v51, %v4731_v22  ;;  %v4735_v63 = vld [vmem:[#allocation9 + $0xf40] sm:$0xff] }
 0x41b   :  { %v9739_v23 = vcombine.high %v4696_v17, %v4700_v18  ;;  %v4739_v52 = vld [vmem:[#allocation9 + $0xf60] sm:$0xff] }
 0x41d   :  { %7489 = vmatpush1.bf16.msra.mxu0 %v9688_v26  ;;  %7653 = vmatpush1.bf16.msra.mxu1 %v9690_v27  ;;  %v4704_v26 = vld [vmem:[#allocation9 + $0xe48] sm:$0xff] }
 0x41e   :  { %7490 = vmatprep.subr.bf16.mxu0 %v9697_v59  ;;  %7654 = vmatprep.subr.bf16.mxu1 %v9699_v1  ;;  %v4708_v27 = vld [vmem:[#allocation9 + $0xe68] sm:$0xff]  ;;  %v9736_v59 = vcombine.low %v4695_v12, %v4699_v13  ;;  %v9738_v1 = vcombine.low %v4696_v17, %v4700_v18  ;;  %v9777_v12 = vcombine.high %v4735_v63, %v4739_v52  ;;  %v4743_v17 = vld [vmem:[#allocation9 + $0xf80] sm:$0xff] }
 0x41f   :  { %v9747_v29 = vcombine.high %v4704_v26, %v4708_v27  ;;  %v4747_v18 = vld [vmem:[#allocation9 + $0xfa0] sm:$0xff] }
 0x421   :  { %7491 = vmatpush1.bf16.msra.mxu0 %v9696_v30  ;;  %7655 = vmatpush1.bf16.msra.mxu1 %v9698_v3  ;;  %v4712_v30 = vld [vmem:[#allocation9 + $0xe88] sm:$0xff] }
 0x422   :  { %7492 = vmatprep.subr.bf16.mxu0 %v9705_v32  ;;  %7656 = vmatprep.subr.bf16.mxu1 %v9707_v33  ;;  %v4716_v3 = vld [vmem:[#allocation9 + $0xea8] sm:$0xff]  ;;  %v9744_v32 = vcombine.low %v4703_v24, %v4707_v25  ;;  %v9746_v33 = vcombine.low %v4704_v26, %v4708_v27  ;;  %v1002_v24 = vrot.slane %v10674_v31, %v10612_v40  ;;  %v4751_v27 = vld [vmem:[#allocation9 + $0xfc0] sm:$0xff]  ;;  %v4253_v31 = vld [vmem:[#allocation9 + $0x30] sm:$0xff] }
 0x423   :  { %v9755_v14 = vcombine.high %v4712_v30, %v4716_v3  ;;  %v9785_v25 = vcombine.high %v4743_v17, %v4747_v18 }
 0x425   :  { %7493 = vmatpush1.bf16.msra.mxu0 %v9704_v6  ;;  %7657 = vmatpush1.bf16.msra.mxu1 %v9706_v39  ;;  %v4720_v6 = vld [vmem:[#allocation9 + $0xec8] sm:$0xff] }
 0x426   :  { %7494 = vmatprep.subr.bf16.mxu0 %v9713_v57  ;;  %7658 = vmatprep.subr.bf16.mxu1 %v9715_v41  ;;  %v4724_v39 = vld [vmem:[#allocation9 + $0xee8] sm:$0xff]  ;;  %v9752_v57 = vcombine.low %v4711_v37, %v4715_v7  ;;  %v9754_v41 = vcombine.low %v4712_v30, %v4716_v3  ;;  %v9959_v7 = vadd.f32 %v10682_v36, %v1002_v24  ;;  %v4258_v36 = vld [vmem:[#allocation9 + $0x58] sm:$0xff] }
 0x427   :  { %v9763_v49 = vcombine.high %v4720_v6, %v4724_v39  ;;  %v4286_v24 = vld [vmem:[#allocation9 + $0x138] sm:$0xff] }
 0x429   :  { %7495 = vmatpush1.bf16.msra.mxu0 %v9712_v2  ;;  %7659 = vmatpush1.bf16.msra.mxu1 %v9714_v16  ;;  %v4728_v2 = vld [vmem:[#allocation9 + $0xf08] sm:$0xff] }
 0x42a   :  { %7496 = vmatprep.subr.bf16.mxu0 %v9721_v54  ;;  %7660 = vmatprep.subr.bf16.mxu1 %v9723_v55  ;;  %v4732_v16 = vld [vmem:[#allocation9 + $0xf28] sm:$0xff]  ;;  %v9760_v54 = vcombine.low %v4719_v35, %v4723_v38  ;;  %v9762_v55 = vcombine.low %v4720_v6, %v4724_v39  ;;  %v4237_v38 = vmax.f32 %v9959_v7, 0.0 }
 0x42b   :  { %v9771_v5 = vcombine.high %v4728_v2, %v4732_v16 }
 0x42d   :  { %7497 = vmatpush1.bf16.msra.mxu0 %v9720_v4  ;;  %7661 = vmatpush1.bf16.msra.mxu1 %v9722_v8  ;;  %v4736_v4 = vld [vmem:[#allocation9 + $0xf48] sm:$0xff] }
 0x42e   :  { %7498 = vmatprep.subr.bf16.mxu0 %v9729_v9  ;;  %7662 = vmatprep.subr.bf16.mxu1 %v9731_v10  ;;  %v4740_v8 = vld [vmem:[#allocation9 + $0xf68] sm:$0xff]  ;;  %v9768_v9 = vcombine.low %v4727_v51, %v4731_v22  ;;  %v9770_v10 = vcombine.low %v4728_v2, %v4732_v16  ;;  %v10699_v51 = vpack.c.bf16 %v4237_v38, %v4237_v38 }
 0x42f   :  { %v9779_v13 = vcombine.high %v4736_v4, %v4740_v8 }
 0x431   :  { %7499 = vmatpush1.bf16.msra.mxu0 %v9728_v19  ;;  %7663 = vmatpush1.bf16.msra.mxu1 %v9730_v20  ;;  %v4744_v19 = vld [vmem:[#allocation9 + $0xf88] sm:$0xff] }
 0x432   :  { %7500 = vmatprep.subr.bf16.mxu0 %v9737_v21  ;;  %7664 = vmatprep.subr.bf16.mxu1 %v9739_v23  ;;  %v4748_v20 = vld [vmem:[#allocation9 + $0xfa8] sm:$0xff]  ;;  %v9776_v21 = vcombine.low %v4735_v63, %v4739_v52  ;;  %v9778_v23 = vcombine.low %v4736_v4, %v4740_v8 }
 0x433   :  { %v9787_v26 = vcombine.high %v4744_v19, %v4748_v20  ;;  %v9786_v37 = vcombine.low %v4744_v19, %v4748_v20 }
 0x435   :  { %7501 = vmatpush1.bf16.msra.mxu0 %v9736_v59  ;;  %7665 = vmatpush1.bf16.msra.mxu1 %v9738_v1  ;;  %v4755_v59 = vld [vmem:[#allocation9 + $0xfe0] sm:$0xff]  ;;  %v4752_v1 = vld [vmem:[#allocation9 + $0xfc8] sm:$0xff] }
 0x436   :  { %7502 = vmatprep.subr.bf16.mxu0 %v9745_v28  ;;  %7666 = vmatprep.subr.bf16.mxu1 %v9747_v29  ;;  %v4756_v28 = vld [vmem:[#allocation9 + $0xfe8] sm:$0xff]  ;;  %v9784_v29 = vcombine.low %v4743_v17, %v4747_v18  ;;  %v9793_v30 = vcombine.high %v4751_v27, %v4755_v59 }
 0x437   :  { %v9795_v3 = vcombine.high %v4752_v1, %v4756_v28  ;;  %v9794_v35 = vcombine.low %v4752_v1, %v4756_v28  ;;  %v4289_v1 = vld [vmem:[#allocation9 + $0x150] sm:$0xff] }
 0x438   :  { %v4293_v28 = vld [vmem:[#allocation9 + $0x170] sm:$0xff] }
 0x439   :  { %7503 = vmatpush1.bf16.msra.mxu0 %v9744_v32  ;;  %7667 = vmatpush1.bf16.msra.mxu1 %v9746_v33  ;;  %v4249_v32 = vld [vmem:[#allocation9 + $0x10] sm:$0xff]  ;;  %v4250_v33 = vld [vmem:[#allocation9 + $0x18] sm:$0xff] }
 0x43a   :  { %7504 = vmatprep.subr.bf16.mxu0 %v9753_v34  ;;  %7668 = vmatprep.subr.bf16.mxu1 %v9755_v14  ;;  %v4254_v34 = vld [vmem:[#allocation9 + $0x38] sm:$0xff]  ;;  %v9792_v14 = vcombine.low %v4751_v27, %v4755_v59  ;;  %v9293_v6 = vcombine.high %v4249_v32, %v4253_v31 }
 0x43b   :  { %v9295_v39 = vcombine.high %v4250_v33, %v4254_v34  ;;  %v9294_v22 = vcombine.low %v4250_v33, %v4254_v34  ;;  %v4301_v33 = vld [vmem:[#allocation9 + $0x1b0] sm:$0xff]  ;;  %v4298_v34 = vld [vmem:[#allocation9 + $0x198] sm:$0xff] }
 0x43d   :  { %7505 = vmatpush1.bf16.msra.mxu0 %v9752_v57  ;;  %7669 = vmatpush1.bf16.msra.mxu1 %v9754_v41  ;;  %v4257_v57 = vld [vmem:[#allocation9 + $0x50] sm:$0xff] }
 0x43e   :  { %7506 = vmatprep.subr.bf16.mxu0 %v9761_v42  ;;  %7670 = vmatprep.subr.bf16.mxu1 %v9763_v49  ;;  %v4261_v41 = vld [vmem:[#allocation9 + $0x70] sm:$0xff]  ;;  %v4262_v42 = vld [vmem:[#allocation9 + $0x78] sm:$0xff]  ;;  %v9292_v49 = vcombine.low %v4249_v32, %v4253_v31 }
 0x43f   :  { %v9301_v2 = vcombine.high %v4257_v57, %v4261_v41  ;;  %v9303_v16 = vcombine.high %v4258_v36, %v4262_v42  ;;  %v9300_v63 = vcombine.low %v4257_v57, %v4261_v41  ;;  %v9302_v52 = vcombine.low %v4258_v36, %v4262_v42  ;;  %v4297_v31 = vld [vmem:[#allocation9 + $0x190] sm:$0xff]  ;;  %v4306_v36 = vld [vmem:[#allocation9 + $0x1d8] sm:$0xff] }
 0x440   :  { %v4305_v57 = vld [vmem:[#allocation9 + $0x1d0] sm:$0xff]  ;;  %v4310_v42 = vld [vmem:[#allocation9 + $0x1f8] sm:$0xff] }
 0x441   :  { %7507 = vmatpush1.bf16.msra.mxu0 %v9760_v54  ;;  %7671 = vmatpush1.bf16.msra.mxu1 %v9762_v55  ;;  %v4265_v54 = vld [vmem:[#allocation9 + $0x90] sm:$0xff] }
 0x442   :  { %7508 = vmatprep.subr.bf16.mxu0 %v9769_v58  ;;  %7672 = vmatprep.subr.bf16.mxu1 %v9771_v5  ;;  %v4269_v55 = vld [vmem:[#allocation9 + $0xb0] sm:$0xff]  ;;  %v4266_v58 = vld [vmem:[#allocation9 + $0x98] sm:$0xff] }
 0x443   :  { %v4270_v5 = vld [vmem:[#allocation9 + $0xb8] sm:$0xff]  ;;  %v9309_v4 = vcombine.high %v4265_v54, %v4269_v55  ;;  %v9308_v17 = vcombine.low %v4265_v54, %v4269_v55  ;;  %v4309_v41 = vld [vmem:[#allocation9 + $0x1f0] sm:$0xff] }
 0x444   :  { %v9311_v8 = vcombine.high %v4266_v58, %v4270_v5  ;;  %v9310_v18 = vcombine.low %v4266_v58, %v4270_v5  ;;  %v4313_v54 = vld [vmem:[#allocation9 + $0x210] sm:$0xff]  ;;  %v4314_v58 = vld [vmem:[#allocation9 + $0x218] sm:$0xff] }
 0x445   :  { %7509 = vmatpush1.bf16.msra.mxu0 %v9768_v9  ;;  %7673 = vmatpush1.bf16.msra.mxu1 %v9770_v10  ;;  %v4273_v9 = vld [vmem:[#allocation9 + $0xd0] sm:$0xff]  ;;  %v4318_v5 = vld [vmem:[#allocation9 + $0x238] sm:$0xff] }
 0x446   :  { %7510 = vmatprep.subr.bf16.mxu0 %v9777_v12  ;;  %7674 = vmatprep.subr.bf16.mxu1 %v9779_v13  ;;  %v4277_v10 = vld [vmem:[#allocation9 + $0xf0] sm:$0xff]  ;;  %v4274_v12 = vld [vmem:[#allocation9 + $0xd8] sm:$0xff] }
 0x447   :  { %v4278_v13 = vld [vmem:[#allocation9 + $0xf8] sm:$0xff]  ;;  %v9317_v19 = vcombine.high %v4273_v9, %v4277_v10  ;;  %v4317_v55 = vld [vmem:[#allocation9 + $0x230] sm:$0xff] }
 0x448   :  { %v9319_v20 = vcombine.high %v4274_v12, %v4278_v13 }
 0x449   :  { %7511 = vmatpush1.bf16.msra.mxu0 %v9776_v21  ;;  %7675 = vmatpush1.bf16.msra.mxu1 %v9778_v23  ;;  %v4281_v21 = vld [vmem:[#allocation9 + $0x110] sm:$0xff] }
 0x44a   :  { %7512 = vmatprep.subr.bf16.mxu0 %v9785_v25  ;;  %7676 = vmatprep.subr.bf16.mxu1 %v9787_v26  ;;  %v4285_v23 = vld [vmem:[#allocation9 + $0x130] sm:$0xff]  ;;  %v9316_v25 = vcombine.low %v4273_v9, %v4277_v10  ;;  %v9318_v26 = vcombine.low %v4274_v12, %v4278_v13  ;;  %v4322_v12 = vld [vmem:[#allocation9 + $0x258] sm:$0xff] }
 0x44b   :  { %v9325_v27 = vcombine.high %v4281_v21, %v4285_v23  ;;  %v9324_v7 = vcombine.low %v4281_v21, %v4285_v23  ;;  %v4321_v9 = vld [vmem:[#allocation9 + $0x250] sm:$0xff]  ;;  %v4326_v13 = vld [vmem:[#allocation9 + $0x278] sm:$0xff] }
 0x44c   :  { %v4325_v10 = vld [vmem:[#allocation9 + $0x270] sm:$0xff] }
 0x44d   :  { %7513 = vmatpush1.bf16.msra.mxu0 %v9784_v29  ;;  %7677 = vmatpush1.bf16.msra.mxu1 %v9786_v37  ;;  %v4290_v29 = vld [vmem:[#allocation9 + $0x158] sm:$0xff]  ;;  %v4329_v21 = vld [vmem:[#allocation9 + $0x290] sm:$0xff] }
 0x44e   :  { %7514 = vmatprep.subr.bf16.mxu0 %v9793_v30  ;;  %7678 = vmatprep.subr.bf16.mxu1 %v9795_v3  ;;  %v4294_v37 = vld [vmem:[#allocation9 + $0x178] sm:$0xff]  ;;  %v9333_v3 = vcombine.high %v4289_v1, %v4293_v28  ;;  %v4333_v23 = vld [vmem:[#allocation9 + $0x2b0] sm:$0xff] }
 0x44f   :  { %v9335_v32 = vcombine.high %v4290_v29, %v4294_v37  ;;  %v9334_v38 = vcombine.low %v4290_v29, %v4294_v37  ;;  %v4338_v29 = vld [vmem:[#allocation9 + $0x2d8] sm:$0xff] }
 0x450   :  { %v4342_v37 = vld [vmem:[#allocation9 + $0x2f8] sm:$0xff] }
 0x451   :  { %7515 = vmatpush1.bf16.msra.mxu0 %v9792_v14  ;;  %7679 = vmatpush1.bf16.msra.mxu1 %v9794_v35  ;;  %v4302_v14 = vld [vmem:[#allocation9 + $0x1b8] sm:$0xff]  ;;  %v9332_v35 = vcombine.low %v4289_v1, %v4293_v28  ;;  %v4337_v1 = vld [vmem:[#allocation9 + $0x2d0] sm:$0xff] }
 0x452   :  { %7689 = vmatprep.subr.bf16.mxu0 %v9293_v6  ;;  %7853 = vmatprep.subr.bf16.mxu1 %v9295_v39  ;;  %v9341_v6 = vcombine.high %v4297_v31, %v4301_v33  ;;  %v9343_v39 = vcombine.high %v4298_v34, %v4302_v14  ;;  %v4341_v28 = vld [vmem:[#allocation9 + $0x2f0] sm:$0xff] }
 0x454   :  { %7517 = vmatmul.mubr.bf16.vlgmr.msra.gmra.mrb[16].mxu0 %v10699_v51  ;;  %7681 = vmatmul.mubr.bf16.vlgmr.msra.gmra.mrb[16].mxu1 %v10699_v51 }
 0x455   :  { %7690 = vmatpush1.bf16.msra.mxu0 %v9292_v49  ;;  %7721 = vmatprep.mubr.bf16.mxu0 %v10647_v56  ;;  %v9340_v49 = vcombine.low %v4297_v31, %v4301_v33  ;;  %v4345_v31 = vld [vmem:[#allocation9 + $0x310] sm:$0xff] }
 0x456   :  { %7854 = vmatpush1.bf16.msra.mxu1 %v9294_v22  ;;  %7885 = vmatprep.mubr.bf16.mxu1 %v10647_v56  ;;  %v4282_v56 = vld [vmem:[#allocation9 + $0x118] sm:$0xff]  ;;  %v9342_v22 = vcombine.low %v4298_v34, %v4302_v14  ;;  %v4349_v33 = vld [vmem:[#allocation9 + $0x330] sm:$0xff] }
 0x457   :  { %7691 = vmatprep.subr.bf16.mxu0 %v9301_v2  ;;  %7855 = vmatprep.subr.bf16.mxu1 %v9303_v16  ;;  %v9327_v59 = vcombine.high %v4282_v56, %v4286_v24  ;;  %v9326_v30 = vcombine.low %v4282_v56, %v4286_v24  ;;  %v9349_v2 = vcombine.high %v4305_v57, %v4309_v41  ;;  %v4330_v56 = vld [vmem:[#allocation9 + $0x298] sm:$0xff] }
 0x458   :  { %v9351_v16 = vcombine.high %v4306_v36, %v4310_v42  ;;  %v4334_v24 = vld [vmem:[#allocation9 + $0x2b8] sm:$0xff] }
 0x459   :  { %7692 = vmatpush1.bf16.msra.mxu0 %v9300_v63  ;;  %v9348_v63 = vcombine.low %v4305_v57, %v4309_v41  ;;  %v4346_v34 = vld [vmem:[#allocation9 + $0x318] sm:$0xff]  ;;  %v4353_v57 = vld [vmem:[#allocation9 + $0x350] sm:$0xff] }
 0x45a   :  { %7856 = vmatpush1.bf16.msra.mxu1 %v9302_v52  ;;  %7693 = vmatprep.subr.bf16.mxu0 %v9309_v4  ;;  %v9350_v52 = vcombine.low %v4306_v36, %v4310_v42  ;;  %v9357_v4 = vcombine.high %v4313_v54, %v4317_v55  ;;  %v4350_v14 = vld [vmem:[#allocation9 + $0x338] sm:$0xff]  ;;  %v4357_v41 = vld [vmem:[#allocation9 + $0x370] sm:$0xff] }
 0x45b   :  { %7857 = vmatprep.subr.bf16.mxu1 %v9311_v8  ;;  %v9359_v8 = vcombine.high %v4314_v58, %v4318_v5  ;;  %v4354_v36 = vld [vmem:[#allocation9 + $0x358] sm:$0xff] }
 0x45c   :  { %v4358_v42 = vld [vmem:[#allocation9 + $0x378] sm:$0xff] }
 0x45d   :  { %7694 = vmatpush1.bf16.msra.mxu0 %v9308_v17  ;;  %v9356_v17 = vcombine.low %v4313_v54, %v4317_v55  ;;  %v4361_v54 = vld [vmem:[#allocation9 + $0x390] sm:$0xff] }
 0x45e   :  { %7858 = vmatpush1.bf16.msra.mxu1 %v9310_v18  ;;  %7695 = vmatprep.subr.bf16.mxu0 %v9317_v19  ;;  %v9358_v18 = vcombine.low %v4314_v58, %v4318_v5  ;;  %v9365_v19 = vcombine.high %v4321_v9, %v4325_v10  ;;  %v4365_v55 = vld [vmem:[#allocation9 + $0x3b0] sm:$0xff]  ;;  %v4362_v58 = vld [vmem:[#allocation9 + $0x398] sm:$0xff] }
 0x45f   :  { %7859 = vmatprep.subr.bf16.mxu1 %v9319_v20  ;;  %v9367_v20 = vcombine.high %v4322_v12, %v4326_v13  ;;  %v4366_v5 = vld [vmem:[#allocation9 + $0x3b8] sm:$0xff] }
 0x461   :  { %7696 = vmatpush1.bf16.msra.mxu0 %v9316_v25  ;;  %v9364_v25 = vcombine.low %v4321_v9, %v4325_v10  ;;  %v4369_v9 = vld [vmem:[#allocation9 + $0x3d0] sm:$0xff] }
 0x462   :  { %7860 = vmatpush1.bf16.msra.mxu1 %v9318_v26  ;;  %7697 = vmatprep.subr.bf16.mxu0 %v9325_v27  ;;  %v9366_v26 = vcombine.low %v4322_v12, %v4326_v13  ;;  %v9373_v27 = vcombine.high %v4329_v21, %v4333_v23  ;;  %v4373_v10 = vld [vmem:[#allocation9 + $0x3f0] sm:$0xff]  ;;  %v4370_v12 = vld [vmem:[#allocation9 + $0x3d8] sm:$0xff] }
 0x463   :  { %7861 = vmatprep.subr.bf16.mxu1 %v9327_v59  ;;  %v9375_v59 = vcombine.high %v4330_v56, %v4334_v24  ;;  %v4374_v13 = vld [vmem:[#allocation9 + $0x3f8] sm:$0xff] }
 0x465   :  { %7698 = vmatpush1.bf16.msra.mxu0 %v9324_v7  ;;  %v9372_v7 = vcombine.low %v4329_v21, %v4333_v23  ;;  %v4377_v21 = vld [vmem:[#allocation9 + $0x410] sm:$0xff] }
 0x466   :  { %7862 = vmatpush1.bf16.msra.mxu1 %v9326_v30  ;;  %7699 = vmatprep.subr.bf16.mxu0 %v9333_v3  ;;  %v9374_v30 = vcombine.low %v4330_v56, %v4334_v24  ;;  %v9381_v3 = vcombine.high %v4337_v1, %v4341_v28  ;;  %v4381_v23 = vld [vmem:[#allocation9 + $0x430] sm:$0xff]  ;;  %v4378_v56 = vld [vmem:[#allocation9 + $0x418] sm:$0xff] }
 0x467   :  { %7863 = vmatprep.subr.bf16.mxu1 %v9335_v32  ;;  %v9383_v32 = vcombine.high %v4338_v29, %v4342_v37  ;;  %v4382_v24 = vld [vmem:[#allocation9 + $0x438] sm:$0xff] }
 0x469   :  { %7700 = vmatpush1.bf16.msra.mxu0 %v9332_v35  ;;  %v9380_v35 = vcombine.low %v4337_v1, %v4341_v28  ;;  %v4385_v1 = vld [vmem:[#allocation9 + $0x450] sm:$0xff] }
 0x46a   :  { %7864 = vmatpush1.bf16.msra.mxu1 %v9334_v38  ;;  %7701 = vmatprep.subr.bf16.mxu0 %v9341_v6  ;;  %v9382_v38 = vcombine.low %v4338_v29, %v4342_v37  ;;  %v9389_v6 = vcombine.high %v4345_v31, %v4349_v33  ;;  %v4389_v28 = vld [vmem:[#allocation9 + $0x470] sm:$0xff]  ;;  %v9420_v29 = vcombine.low %v4377_v21, %v4381_v23  ;;  %v4386_v37 = vld [vmem:[#allocation9 + $0x458] sm:$0xff] }
 0x46b   :  { %7865 = vmatprep.subr.bf16.mxu1 %v9343_v39  ;;  %v9391_v39 = vcombine.high %v4346_v34, %v4350_v14 }
 0x46d   :  { %7702 = vmatpush1.bf16.msra.mxu0 %v9340_v49  ;;  %v9388_v49 = vcombine.low %v4345_v31, %v4349_v33  ;;  %v4397_v31 = vld [vmem:[#allocation9 + $0x4b0] sm:$0xff] }
 0x46e   :  { %7866 = vmatpush1.bf16.msra.mxu1 %v9342_v22  ;;  %7703 = vmatprep.subr.bf16.mxu0 %v9349_v2  ;;  %v9390_v22 = vcombine.low %v4346_v34, %v4350_v14  ;;  %v9397_v2 = vcombine.high %v4353_v57, %v4357_v41  ;;  %v4394_v34 = vld [vmem:[#allocation9 + $0x498] sm:$0xff] }
 0x46f   :  { %7867 = vmatprep.subr.bf16.mxu1 %v9351_v16  ;;  %v9399_v16 = vcombine.high %v4354_v36, %v4358_v42  ;;  %v4398_v14 = vld [vmem:[#allocation9 + $0x4b8] sm:$0xff] }
 0x471   :  { %7704 = vmatpush1.bf16.msra.mxu0 %v9348_v63  ;;  %v9396_v63 = vcombine.low %v4353_v57, %v4357_v41  ;;  %v4401_v57 = vld [vmem:[#allocation9 + $0x4d0] sm:$0xff] }
 0x472   :  { %7868 = vmatpush1.bf16.msra.mxu1 %v9350_v52  ;;  %7705 = vmatprep.subr.bf16.mxu0 %v9357_v4  ;;  %v9398_v52 = vcombine.low %v4354_v36, %v4358_v42  ;;  %v9405_v4 = vcombine.high %v4361_v54, %v4365_v55  ;;  %v4405_v41 = vld [vmem:[#allocation9 + $0x4f0] sm:$0xff]  ;;  %v4402_v36 = vld [vmem:[#allocation9 + $0x4d8] sm:$0xff] }
 0x473   :  { %7869 = vmatprep.subr.bf16.mxu1 %v9359_v8  ;;  %v9407_v8 = vcombine.high %v4362_v58, %v4366_v5  ;;  %v4406_v42 = vld [vmem:[#allocation9 + $0x4f8] sm:$0xff] }
 0x475   :  { %7706 = vmatpush1.bf16.msra.mxu0 %v9356_v17  ;;  %v9404_v17 = vcombine.low %v4361_v54, %v4365_v55  ;;  %v4413_v54 = vld [vmem:[#allocation9 + $0x530] sm:$0xff]  ;;  %v4410_v55 = vld [vmem:[#allocation9 + $0x518] sm:$0xff] }
 0x476   :  { %7870 = vmatpush1.bf16.msra.mxu1 %v9358_v18  ;;  %7707 = vmatprep.subr.bf16.mxu0 %v9365_v19  ;;  %v9406_v18 = vcombine.low %v4362_v58, %v4366_v5  ;;  %v9413_v19 = vcombine.high %v4369_v9, %v4373_v10  ;;  %v4414_v58 = vld [vmem:[#allocation9 + $0x538] sm:$0xff]  ;;  %v9446_v5 = vcombine.low %v4402_v36, %v4406_v42 }
 0x477   :  { %7871 = vmatprep.subr.bf16.mxu1 %v9367_v20  ;;  %v9415_v20 = vcombine.high %v4370_v12, %v4374_v13 }
 0x479   :  { %7708 = vmatpush1.bf16.msra.mxu0 %v9364_v25  ;;  %v9412_v25 = vcombine.low %v4369_v9, %v4373_v10  ;;  %v4418_v9 = vld [vmem:[#allocation9 + $0x558] sm:$0xff] }
 0x47a   :  { %7872 = vmatpush1.bf16.msra.mxu1 %v9366_v26  ;;  %7709 = vmatprep.subr.bf16.mxu0 %v9373_v27  ;;  %v9414_v26 = vcombine.low %v4370_v12, %v4374_v13  ;;  %v9421_v27 = vcombine.high %v4377_v21, %v4381_v23  ;;  %v4422_v10 = vld [vmem:[#allocation9 + $0x578] sm:$0xff]  ;;  %v9454_v13 = vcombine.low %v4410_v55, %v4414_v58 }
 0x47b   :  { %7873 = vmatprep.subr.bf16.mxu1 %v9375_v59  ;;  %v9423_v59 = vcombine.high %v4378_v56, %v4382_v24  ;;  %v4426_v21 = vld [vmem:[#allocation9 + $0x598] sm:$0xff] }
 0x47c   :  { %v4430_v23 = vld [vmem:[#allocation9 + $0x5b8] sm:$0xff] }
 0x47d   :  { %7710 = vmatpush1.bf16.msra.mxu0 %v9372_v7  ;;  %v4390_v7 = vld [vmem:[#allocation9 + $0x478] sm:$0xff] }
 0x47e   :  { %7874 = vmatpush1.bf16.msra.mxu1 %v9374_v30  ;;  %7711 = vmatprep.subr.bf16.mxu0 %v9381_v3  ;;  %v9422_v30 = vcombine.low %v4378_v56, %v4382_v24  ;;  %v9429_v3 = vcombine.high %v4385_v1, %v4389_v28  ;;  %v9431_v33 = vcombine.high %v4386_v37, %v4390_v7 }
 0x47f   :  { %7875 = vmatprep.subr.bf16.mxu1 %v9383_v32  ;;  %v4393_v32 = vld [vmem:[#allocation9 + $0x490] sm:$0xff]  ;;  %v9462_v24 = vcombine.low %v4418_v9, %v4422_v10 }
 0x481   :  { %7712 = vmatpush1.bf16.msra.mxu0 %v9380_v35  ;;  %v9428_v35 = vcombine.low %v4385_v1, %v4389_v28  ;;  %v4434_v1 = vld [vmem:[#allocation9 + $0x5d8] sm:$0xff] }
 0x482   :  { %7876 = vmatpush1.bf16.msra.mxu1 %v9382_v38  ;;  %7713 = vmatprep.subr.bf16.mxu0 %v9389_v6  ;;  %v9430_v38 = vcombine.low %v4386_v37, %v4390_v7  ;;  %v9437_v6 = vcombine.high %v4393_v32, %v4397_v31  ;;  %v4438_v28 = vld [vmem:[#allocation9 + $0x5f8] sm:$0xff]  ;;  %v9470_v37 = vcombine.low %v4426_v21, %v4430_v23 }
 0x483   :  { %7877 = vmatprep.subr.bf16.mxu1 %v9391_v39  ;;  %v9439_v39 = vcombine.high %v4394_v34, %v4398_v14 }
 0x485   :  { %7714 = vmatpush1.bf16.msra.mxu0 %v9388_v49  ;;  %v9436_v49 = vcombine.low %v4393_v32, %v4397_v31  ;;  %v4445_v32 = vld [vmem:[#allocation9 + $0x630] sm:$0xff]  ;;  %v4442_v31 = vld [vmem:[#allocation9 + $0x618] sm:$0xff] }
 0x486   :  { %7878 = vmatpush1.bf16.msra.mxu1 %v9390_v22  ;;  %7715 = vmatprep.subr.bf16.mxu0 %v9397_v2  ;;  %v9445_v22 = vcombine.high %v4401_v57, %v4405_v41  ;;  %v9447_v2 = vcombine.high %v4402_v36, %v4406_v42 }
 0x487   :  { %7879 = vmatprep.subr.bf16.mxu1 %v9399_v16  ;;  %v4409_v16 = vld [vmem:[#allocation9 + $0x510] sm:$0xff] }
 0x488   :  { %v9452_v12 = vcombine.low %v4409_v16, %v4413_v54 }
 0x489   :  { %7716 = vmatpush1.bf16.msra.mxu0 %v9396_v63  ;;  %v9453_v63 = vcombine.high %v4409_v16, %v4413_v54  ;;  %v4458_v16 = vld [vmem:[#allocation9 + $0x698] sm:$0xff] }
 0x48a   :  { %7880 = vmatpush1.bf16.msra.mxu1 %v9398_v52  ;;  %7717 = vmatprep.subr.bf16.mxu0 %v9405_v4  ;;  %v9455_v52 = vcombine.high %v4410_v55, %v4414_v58  ;;  %v4417_v4 = vld [vmem:[#allocation9 + $0x550] sm:$0xff]  ;;  %v4462_v54 = vld [vmem:[#allocation9 + $0x6b8] sm:$0xff] }
 0x48b   :  { %7881 = vmatprep.subr.bf16.mxu1 %v9407_v8  ;;  %v4421_v8 = vld [vmem:[#allocation9 + $0x570] sm:$0xff] }
 0x48c   :  { %v9460_v56 = vcombine.low %v4417_v4, %v4421_v8 }
 0x48d   :  { %7718 = vmatpush1.bf16.msra.mxu0 %v9404_v17  ;;  %v9461_v17 = vcombine.high %v4417_v4, %v4421_v8  ;;  %v4466_v4 = vld [vmem:[#allocation9 + $0x6d8] sm:$0xff] }
 0x48e   :  { %7882 = vmatpush1.bf16.msra.mxu1 %v9406_v18  ;;  %7719 = vmatprep.subr.bf16.mxu0 %v9413_v19  ;;  %v9463_v18 = vcombine.high %v4418_v9, %v4422_v10  ;;  %v4425_v19 = vld [vmem:[#allocation9 + $0x590] sm:$0xff]  ;;  %v4470_v8 = vld [vmem:[#allocation9 + $0x6f8] sm:$0xff]  ;;  %v9502_v10 = vcombine.low %v4458_v16, %v4462_v54 }
 0x48f   :  { %7883 = vmatprep.subr.bf16.mxu1 %v9415_v20  ;;  %v4429_v20 = vld [vmem:[#allocation9 + $0x5b0] sm:$0xff] }
 0x491   :  { %7720 = vmatpush1.bf16.msra.mxu0 %v9412_v25  ;;  %v9469_v25 = vcombine.high %v4425_v19, %v4429_v20 }
 0x492   :  { %7884 = vmatpush1.bf16.msra.mxu1 %v9414_v26  ;;  %7730 = vmatprep.subr.bf16.mxu0 %v9421_v27  ;;  %v9471_v26 = vcombine.high %v4426_v21, %v4430_v23  ;;  %v4433_v27 = vld [vmem:[#allocation9 + $0x5d0] sm:$0xff]  ;;  %v9510_v23 = vcombine.low %v4466_v4, %v4470_v8 }
 0x493   :  { %7894 = vmatprep.subr.bf16.mxu1 %v9423_v59  ;;  %v4437_v59 = vld [vmem:[#allocation9 + $0x5f0] sm:$0xff] }
 0x494   :  { %7722 = vmatmul.mubr.bf16.vlgmr.msra.gmra.mrb[20].mxu0 %v10659_v15  ;;  %v9477_v7 = vcombine.high %v4433_v27, %v4437_v59 }
 0x495   :  { %7886 = vmatmul.mubr.bf16.vlgmr.msra.gmra.mrb[20].mxu1 %v10659_v15  ;;  %7731 = vmatpush1.bf16.msra.mxu0 %v9420_v29  ;;  %v9438_v15 = vcombine.low %v4394_v34, %v4398_v14  ;;  %v9468_v29 = vcombine.low %v4425_v19, %v4429_v20  ;;  %v9476_v34 = vcombine.low %v4433_v27, %v4437_v59  ;;  %v4474_v19 = vld [vmem:[#allocation9 + $0x718] sm:$0xff] }
 0x496   :  { %7762 = vmatprep.mubr.bf16.mxu0 %v10661_v50  ;;  %7895 = vmatpush1.bf16.msra.mxu1 %v9422_v30  ;;  %v9479_v30 = vcombine.high %v4434_v1, %v4438_v28  ;;  %v9478_v14 = vcombine.low %v4434_v1, %v4438_v28  ;;  %v4478_v20 = vld [vmem:[#allocation9 + $0x738] sm:$0xff] }
 0x497   :  { %7926 = vmatprep.mubr.bf16.mxu1 %v10661_v50  ;;  %7732 = vmatprep.subr.bf16.mxu0 %v9429_v3  ;;  %v9444_v50 = vcombine.low %v4401_v57, %v4405_v41  ;;  %v4441_v3 = vld [vmem:[#allocation9 + $0x610] sm:$0xff]  ;;  %v4450_v57 = vld [vmem:[#allocation9 + $0x658] sm:$0xff]  ;;  %v9518_v28 = vcombine.low %v4474_v19, %v4478_v20 }
 0x498   :  { %7896 = vmatprep.subr.bf16.mxu1 %v9431_v33  ;;  %v4446_v33 = vld [vmem:[#allocation9 + $0x638] sm:$0xff]  ;;  %v9484_v36 = vcombine.low %v4441_v3, %v4445_v32 }
 0x499   :  { %7733 = vmatpush1.bf16.msra.mxu0 %v9428_v35  ;;  %v9485_v35 = vcombine.high %v4441_v3, %v4445_v32  ;;  %v4454_v41 = vld [vmem:[#allocation9 + $0x678] sm:$0xff]  ;;  %v9486_v42 = vcombine.low %v4442_v31, %v4446_v33 }
 0x49a   :  { %7897 = vmatpush1.bf16.msra.mxu1 %v9430_v38  ;;  %7734 = vmatprep.subr.bf16.mxu0 %v9437_v6  ;;  %v9487_v38 = vcombine.high %v4442_v31, %v4446_v33  ;;  %v4449_v6 = vld [vmem:[#allocation9 + $0x650] sm:$0xff]  ;;  %v9494_v58 = vcombine.low %v4450_v57, %v4454_v41  ;;  %v4482_v27 = vld [vmem:[#allocation9 + $0x758] sm:$0xff] }
 0x49b   :  { %7898 = vmatprep.subr.bf16.mxu1 %v9439_v39  ;;  %v4453_v39 = vld [vmem:[#allocation9 + $0x670] sm:$0xff]  ;;  %v4486_v59 = vld [vmem:[#allocation9 + $0x778] sm:$0xff] }
 0x49c   :  { %v9492_v55 = vcombine.low %v4449_v6, %v4453_v39  ;;  %v4490_v3 = vld [vmem:[#allocation9 + $0x798] sm:$0xff]  ;;  %v9526_v33 = vcombine.low %v4482_v27, %v4486_v59 }
 0x49d   :  { %7735 = vmatpush1.bf16.msra.mxu0 %v9436_v49  ;;  %v9493_v49 = vcombine.high %v4449_v6, %v4453_v39  ;;  %v4494_v32 = vld [vmem:[#allocation9 + $0x7b8] sm:$0xff] }
 0x49e   :  { %7899 = vmatpush1.bf16.msra.mxu1 %v9438_v15  ;;  %7736 = vmatprep.subr.bf16.mxu0 %v9445_v22  ;;  %v9495_v15 = vcombine.high %v4450_v57, %v4454_v41  ;;  %v4457_v22 = vld [vmem:[#allocation9 + $0x690] sm:$0xff]  ;;  %v4498_v6 = vld [vmem:[#allocation9 + $0x7d8] sm:$0xff]  ;;  %v9534_v41 = vcombine.low %v4490_v3, %v4494_v32 }
 0x49f   :  { %7900 = vmatprep.subr.bf16.mxu1 %v9447_v2  ;;  %v4461_v2 = vld [vmem:[#allocation9 + $0x6b0] sm:$0xff]  ;;  %v4502_v39 = vld [vmem:[#allocation9 + $0x7f8] sm:$0xff] }
 0x4a0   :  { %v9500_v9 = vcombine.low %v4457_v22, %v4461_v2 }
 0x4a1   :  { %7737 = vmatpush1.bf16.msra.mxu0 %v9444_v50  ;;  %v9501_v50 = vcombine.high %v4457_v22, %v4461_v2  ;;  %v4506_v22 = vld [vmem:[#allocation9 + $0x818] sm:$0xff] }
 0x4a2   :  { %7901 = vmatpush1.bf16.msra.mxu1 %v9446_v5  ;;  %7738 = vmatprep.subr.bf16.mxu0 %v9453_v63  ;;  %v9503_v5 = vcombine.high %v4458_v16, %v4462_v54  ;;  %v4465_v63 = vld [vmem:[#allocation9 + $0x6d0] sm:$0xff]  ;;  %v4510_v2 = vld [vmem:[#allocation9 + $0x838] sm:$0xff]  ;;  %v9542_v54 = vcombine.low %v4498_v6, %v4502_v39 }
 0x4a3   :  { %7902 = vmatprep.subr.bf16.mxu1 %v9455_v52  ;;  %v4469_v52 = vld [vmem:[#allocation9 + $0x6f0] sm:$0xff] }
 0x4a4   :  { %v9508_v21 = vcombine.low %v4465_v63, %v4469_v52 }
 0x4a5   :  { %7739 = vmatpush1.bf16.msra.mxu0 %v9452_v12  ;;  %v9509_v12 = vcombine.high %v4465_v63, %v4469_v52  ;;  %v4514_v52 = vld [vmem:[#allocation9 + $0x858] sm:$0xff] }
 0x4a6   :  { %7903 = vmatpush1.bf16.msra.mxu1 %v9454_v13  ;;  %7740 = vmatprep.subr.bf16.mxu0 %v9461_v17  ;;  %v9511_v13 = vcombine.high %v4466_v4, %v4470_v8  ;;  %v4473_v17 = vld [vmem:[#allocation9 + $0x710] sm:$0xff]  ;;  %v4518_v4 = vld [vmem:[#allocation9 + $0x878] sm:$0xff]  ;;  %v9550_v8 = vcombine.low %v4506_v22, %v4510_v2 }
 0x4a7   :  { %7904 = vmatprep.subr.bf16.mxu1 %v9463_v18  ;;  %v4477_v18 = vld [vmem:[#allocation9 + $0x730] sm:$0xff] }
 0x4a8   :  { %v9516_v1 = vcombine.low %v4473_v17, %v4477_v18 }
 0x4a9   :  { %7741 = vmatpush1.bf16.msra.mxu0 %v9460_v56  ;;  %v9517_v56 = vcombine.high %v4473_v17, %v4477_v18  ;;  %v4522_v17 = vld [vmem:[#allocation9 + $0x898] sm:$0xff] }
 0x4aa   :  { %7905 = vmatpush1.bf16.msra.mxu1 %v9462_v24  ;;  %7742 = vmatprep.subr.bf16.mxu0 %v9469_v25  ;;  %v9519_v24 = vcombine.high %v4474_v19, %v4478_v20  ;;  %v4481_v25 = vld [vmem:[#allocation9 + $0x750] sm:$0xff]  ;;  %v4526_v18 = vld [vmem:[#allocation9 + $0x8b8] sm:$0xff]  ;;  %v9558_v20 = vcombine.low %v4514_v52, %v4518_v4 }
 0x4ab   :  { %7906 = vmatprep.subr.bf16.mxu1 %v9471_v26  ;;  %v4485_v26 = vld [vmem:[#allocation9 + $0x770] sm:$0xff] }
 0x4ac   :  { %v9524_v31 = vcombine.low %v4481_v25, %v4485_v26 }
 0x4ad   :  { %7743 = vmatpush1.bf16.msra.mxu0 %v9468_v29  ;;  %v9525_v29 = vcombine.high %v4481_v25, %v4485_v26  ;;  %v4530_v25 = vld [vmem:[#allocation9 + $0x8d8] sm:$0xff] }
 0x4ae   :  { %7907 = vmatpush1.bf16.msra.mxu1 %v9470_v37  ;;  %7744 = vmatprep.subr.bf16.mxu0 %v9477_v7  ;;  %v9527_v37 = vcombine.high %v4482_v27, %v4486_v59  ;;  %v4489_v7 = vld [vmem:[#allocation9 + $0x790] sm:$0xff]  ;;  %v4534_v26 = vld [vmem:[#allocation9 + $0x8f8] sm:$0xff] }
 0x4af   :  { %7908 = vmatprep.subr.bf16.mxu1 %v9479_v30  ;;  %v4493_v30 = vld [vmem:[#allocation9 + $0x7b0] sm:$0xff] }
 0x4b0   :  { %v9532_v57 = vcombine.low %v4489_v7, %v4493_v30 }
 0x4b1   :  { %7745 = vmatpush1.bf16.msra.mxu0 %v9476_v34  ;;  %v9533_v34 = vcombine.high %v4489_v7, %v4493_v30  ;;  %v4542_v7 = vld [vmem:[#allocation9 + $0x938] sm:$0xff]  ;;  %v9574_v30 = vcombine.low %v4530_v25, %v4534_v26 }
 0x4b2   :  { %7909 = vmatpush1.bf16.msra.mxu1 %v9478_v14  ;;  %7746 = vmatprep.subr.bf16.mxu0 %v9485_v35  ;;  %v9535_v14 = vcombine.high %v4490_v3, %v4494_v32  ;;  %v4497_v35 = vld [vmem:[#allocation9 + $0x7d0] sm:$0xff] }
 0x4b3   :  { %7910 = vmatprep.subr.bf16.mxu1 %v9487_v38  ;;  %v4501_v38 = vld [vmem:[#allocation9 + $0x7f0] sm:$0xff] }
 0x4b4   :  { %v9540_v16 = vcombine.low %v4497_v35, %v4501_v38 }
 0x4b5   :  { %7747 = vmatpush1.bf16.msra.mxu0 %v9484_v36  ;;  %v9541_v36 = vcombine.high %v4497_v35, %v4501_v38 }
 0x4b6   :  { %7911 = vmatpush1.bf16.msra.mxu1 %v9486_v42  ;;  %7748 = vmatprep.subr.bf16.mxu0 %v9493_v49  ;;  %v9543_v42 = vcombine.high %v4498_v6, %v4502_v39  ;;  %v4505_v49 = vld [vmem:[#allocation9 + $0x810] sm:$0xff] }
 0x4b7   :  { %7912 = vmatprep.subr.bf16.mxu1 %v9495_v15  ;;  %v4509_v15 = vld [vmem:[#allocation9 + $0x830] sm:$0xff] }
 0x4b8   :  { %v9548_v63 = vcombine.low %v4505_v49, %v4509_v15 }
 0x4b9   :  { %7749 = vmatpush1.bf16.msra.mxu0 %v9492_v55  ;;  %v9549_v55 = vcombine.high %v4505_v49, %v4509_v15 }
 0x4ba   :  { %7913 = vmatpush1.bf16.msra.mxu1 %v9494_v58  ;;  %7750 = vmatprep.subr.bf16.mxu0 %v9501_v50  ;;  %v9551_v58 = vcombine.high %v4506_v22, %v4510_v2  ;;  %v4513_v50 = vld [vmem:[#allocation9 + $0x850] sm:$0xff] }
 0x4bb   :  { %7914 = vmatprep.subr.bf16.mxu1 %v9503_v5  ;;  %v4517_v5 = vld [vmem:[#allocation9 + $0x870] sm:$0xff] }
 0x4bc   :  { %v9556_v19 = vcombine.low %v4513_v50, %v4517_v5 }
 0x4bd   :  { %7751 = vmatpush1.bf16.msra.mxu0 %v9500_v9  ;;  %v9557_v9 = vcombine.high %v4513_v50, %v4517_v5 }
 0x4be   :  { %7915 = vmatpush1.bf16.msra.mxu1 %v9502_v10  ;;  %7752 = vmatprep.subr.bf16.mxu0 %v9509_v12  ;;  %v4521_v10 = vld [vmem:[#allocation9 + $0x890] sm:$0xff] }
 0x4bf   :  { %7916 = vmatprep.subr.bf16.mxu1 %v9511_v13  ;;  %v4525_v12 = vld [vmem:[#allocation9 + $0x8b0] sm:$0xff]  ;;  %v9559_v13 = vcombine.high %v4514_v52, %v4518_v4 }
 0x4c0   :  { %v9564_v27 = vcombine.low %v4521_v10, %v4525_v12  ;;  %v4569_v4 = vld [vmem:[#allocation9 + $0xa10] sm:$0xff] }
 0x4c1   :  { %7753 = vmatpush1.bf16.msra.mxu0 %v9508_v21  ;;  %v9565_v21 = vcombine.high %v4521_v10, %v4525_v12  ;;  %v4574_v10 = vld [vmem:[#allocation9 + $0xa38] sm:$0xff] }
 0x4c2   :  { %7917 = vmatpush1.bf16.msra.mxu1 %v9510_v23  ;;  %7754 = vmatprep.subr.bf16.mxu0 %v9517_v56  ;;  %v9567_v23 = vcombine.high %v4522_v17, %v4526_v18  ;;  %v4529_v56 = vld [vmem:[#allocation9 + $0x8d0] sm:$0xff] }
 0x4c3   :  { %7918 = vmatprep.subr.bf16.mxu1 %v9519_v24  ;;  %v4533_v24 = vld [vmem:[#allocation9 + $0x8f0] sm:$0xff] }
 0x4c4   :  { %v9573_v59 = vcombine.high %v4529_v56, %v4533_v24 }
 0x4c5   :  { %7755 = vmatpush1.bf16.msra.mxu0 %v9516_v1  ;;  %v9575_v1 = vcombine.high %v4530_v25, %v4534_v26 }
 0x4c6   :  { %7919 = vmatpush1.bf16.msra.mxu1 %v9518_v28  ;;  %7756 = vmatprep.subr.bf16.mxu0 %v9525_v29  ;;  %v4537_v28 = vld [vmem:[#allocation9 + $0x910] sm:$0xff] }
 0x4c7   :  { %7920 = vmatprep.subr.bf16.mxu1 %v9527_v37  ;;  %v4541_v29 = vld [vmem:[#allocation9 + $0x930] sm:$0xff]  ;;  %v4538_v37 = vld [vmem:[#allocation9 + $0x918] sm:$0xff] }
 0x4c8   :  { %v9581_v3 = vcombine.high %v4537_v28, %v4541_v29  ;;  %v9583_v32 = vcombine.high %v4538_v37, %v4542_v7  ;;  %v9580_v35 = vcombine.low %v4537_v28, %v4541_v29  ;;  %v9582_v38 = vcombine.low %v4538_v37, %v4542_v7 }
 0x4c9   :  { %7757 = vmatpush1.bf16.msra.mxu0 %v9524_v31  ;;  %v4545_v31 = vld [vmem:[#allocation9 + $0x950] sm:$0xff] }
 0x4ca   :  { %7921 = vmatpush1.bf16.msra.mxu1 %v9526_v33  ;;  %7758 = vmatprep.subr.bf16.mxu0 %v9533_v34  ;;  %v4549_v33 = vld [vmem:[#allocation9 + $0x970] sm:$0xff]  ;;  %v4546_v34 = vld [vmem:[#allocation9 + $0x958] sm:$0xff] }
 0x4cb   :  { %7922 = vmatprep.subr.bf16.mxu1 %v9535_v14  ;;  %v4550_v14 = vld [vmem:[#allocation9 + $0x978] sm:$0xff]  ;;  %v9589_v6 = vcombine.high %v4545_v31, %v4549_v33  ;;  %v9588_v49 = vcombine.low %v4545_v31, %v4549_v33 }
 0x4cc   :  { %v9591_v39 = vcombine.high %v4546_v34, %v4550_v14  ;;  %v9590_v15 = vcombine.low %v4546_v34, %v4550_v14 }
 0x4cd   :  { %7759 = vmatpush1.bf16.msra.mxu0 %v9532_v57  ;;  %v4553_v57 = vld [vmem:[#allocation9 + $0x990] sm:$0xff] }
 0x4ce   :  { %7923 = vmatpush1.bf16.msra.mxu1 %v9534_v41  ;;  %7760 = vmatprep.subr.bf16.mxu0 %v9541_v36  ;;  %v4557_v41 = vld [vmem:[#allocation9 + $0x9b0] sm:$0xff]  ;;  %v4554_v36 = vld [vmem:[#allocation9 + $0x998] sm:$0xff] }
 0x4cf   :  { %7924 = vmatprep.subr.bf16.mxu1 %v9543_v42  ;;  %v4558_v42 = vld [vmem:[#allocation9 + $0x9b8] sm:$0xff]  ;;  %v9597_v22 = vcombine.high %v4553_v57, %v4557_v41  ;;  %v9596_v50 = vcombine.low %v4553_v57, %v4557_v41 }
 0x4d0   :  { %v9599_v2 = vcombine.high %v4554_v36, %v4558_v42  ;;  %v9598_v5 = vcombine.low %v4554_v36, %v4558_v42 }
 0x4d1   :  { %7761 = vmatpush1.bf16.msra.mxu0 %v9540_v16  ;;  %v4561_v16 = vld [vmem:[#allocation9 + $0x9d0] sm:$0xff] }
 0x4d2   :  { %7925 = vmatpush1.bf16.msra.mxu1 %v9542_v54  ;;  %7771 = vmatprep.subr.bf16.mxu0 %v9549_v55  ;;  %v4565_v54 = vld [vmem:[#allocation9 + $0x9f0] sm:$0xff]  ;;  %v4562_v55 = vld [vmem:[#allocation9 + $0x9d8] sm:$0xff] }
 0x4d3   :  { %7935 = vmatprep.subr.bf16.mxu1 %v9551_v58  ;;  %v4566_v58 = vld [vmem:[#allocation9 + $0x9f8] sm:$0xff]  ;;  %v9604_v12 = vcombine.low %v4561_v16, %v4565_v54 }
 0x4d4   :  { %7763 = vmatmul.mubr.bf16.vlgmr.msra.gmra.mrb[20].mxu0 %v10670_v61  ;;  %v9607_v52 = vcombine.high %v4562_v55, %v4566_v58 }
 0x4d5   :  { %7927 = vmatmul.mubr.bf16.vlgmr.msra.gmra.mrb[20].mxu1 %v10670_v61  ;;  %7772 = vmatpush1.bf16.msra.mxu0 %v9548_v63  ;;  %v9566_v61 = vcombine.low %v4522_v17, %v4526_v18  ;;  %v9605_v63 = vcombine.high %v4561_v16, %v4565_v54 }
 0x4d6   :  { %7803 = vmatprep.mubr.bf16.mxu0 %v10684_v44  ;;  %7936 = vmatpush1.bf16.msra.mxu1 %v9550_v8  ;;  %v4573_v8 = vld [vmem:[#allocation9 + $0xa30] sm:$0xff] }
 0x4d7   :  { %7967 = vmatprep.mubr.bf16.mxu1 %v10684_v44  ;;  %7773 = vmatprep.subr.bf16.mxu0 %v9557_v9  ;;  %v9572_v44 = vcombine.low %v4529_v56, %v4533_v24  ;;  %v4570_v9 = vld [vmem:[#allocation9 + $0xa18] sm:$0xff]  ;;  %v9613_v17 = vcombine.high %v4569_v4, %v4573_v8  ;;  %v9612_v56 = vcombine.low %v4569_v4, %v4573_v8 }
 0x4d8   :  { %7937 = vmatprep.subr.bf16.mxu1 %v9559_v13  ;;  %v9606_v13 = vcombine.low %v4562_v55, %v4566_v58  ;;  %v9615_v18 = vcombine.high %v4570_v9, %v4574_v10  ;;  %v9614_v24 = vcombine.low %v4570_v9, %v4574_v10 }
 0x4d9   :  { %7774 = vmatpush1.bf16.msra.mxu0 %v9556_v19  ;;  %v4577_v19 = vld [vmem:[#allocation9 + $0xa50] sm:$0xff] }
 0x4da   :  { %7938 = vmatpush1.bf16.msra.mxu1 %v9558_v20  ;;  %7775 = vmatprep.subr.bf16.mxu0 %v9565_v21  ;;  %v4581_v20 = vld [vmem:[#allocation9 + $0xa70] sm:$0xff]  ;;  %v4578_v21 = vld [vmem:[#allocation9 + $0xa58] sm:$0xff] }
 0x4db   :  { %7939 = vmatprep.subr.bf16.mxu1 %v9567_v23  ;;  %v4582_v23 = vld [vmem:[#allocation9 + $0xa78] sm:$0xff]  ;;  %v9621_v25 = vcombine.high %v4577_v19, %v4581_v20  ;;  %v9620_v28 = vcombine.low %v4577_v19, %v4581_v20 }
 0x4dc   :  { %v9623_v26 = vcombine.high %v4578_v21, %v4582_v23  ;;  %v9622_v29 = vcombine.low %v4578_v21, %v4582_v23 }
 0x4dd   :  { %7776 = vmatpush1.bf16.msra.mxu0 %v9564_v27  ;;  %v4585_v27 = vld [vmem:[#allocation9 + $0xa90] sm:$0xff] }
 0x4de   :  { %7940 = vmatpush1.bf16.msra.mxu1 %v9566_v61  ;;  %7777 = vmatprep.subr.bf16.mxu0 %v9573_v59  ;;  %v4589_v61 = vld [vmem:[#allocation9 + $0xab0] sm:$0xff]  ;;  %v4586_v59 = vld [vmem:[#allocation9 + $0xa98] sm:$0xff] }
 0x4df   :  { %7941 = vmatprep.subr.bf16.mxu1 %v9575_v1  ;;  %v4590_v1 = vld [vmem:[#allocation9 + $0xab8] sm:$0xff]  ;;  %v9629_v37 = vcombine.high %v4585_v27, %v4589_v61  ;;  %v9628_v31 = vcombine.low %v4585_v27, %v4589_v61 }
 0x4e0   :  { %v9631_v7 = vcombine.high %v4586_v59, %v4590_v1  ;;  %v9630_v33 = vcombine.low %v4586_v59, %v4590_v1 }
 0x4e1   :  { %7778 = vmatpush1.bf16.msra.mxu0 %v9572_v44  ;;  %v4593_v44 = vld [vmem:[#allocation9 + $0xad0] sm:$0xff] }
 0x4e2   :  { %7942 = vmatpush1.bf16.msra.mxu1 %v9574_v30  ;;  %7779 = vmatprep.subr.bf16.mxu0 %v9581_v3  ;;  %v4597_v30 = vld [vmem:[#allocation9 + $0xaf0] sm:$0xff]  ;;  %v4594_v3 = vld [vmem:[#allocation9 + $0xad8] sm:$0xff] }
 0x4e3   :  { %7943 = vmatprep.subr.bf16.mxu1 %v9583_v32  ;;  %v4598_v32 = vld [vmem:[#allocation9 + $0xaf8] sm:$0xff]  ;;  %v9637_v34 = vcombine.high %v4593_v44, %v4597_v30  ;;  %v9636_v57 = vcombine.low %v4593_v44, %v4597_v30 }
 0x4e4   :  { %v9639_v14 = vcombine.high %v4594_v3, %v4598_v32  ;;  %v9638_v41 = vcombine.low %v4594_v3, %v4598_v32  ;;  %v4646_v44 = vld [vmem:[#allocation9 + $0xc78] sm:$0xff]  ;;  %v4649_v32 = vld [vmem:[#allocation9 + $0xc90] sm:$0xff] }
 0x4e5   :  { %7780 = vmatpush1.bf16.msra.mxu0 %v9580_v35  ;;  %v4601_v35 = vld [vmem:[#allocation9 + $0xb10] sm:$0xff] }
 0x4e6   :  { %7944 = vmatpush1.bf16.msra.mxu1 %v9582_v38  ;;  %7781 = vmatprep.subr.bf16.mxu0 %v9589_v6  ;;  %v4605_v38 = vld [vmem:[#allocation9 + $0xb30] sm:$0xff]  ;;  %v4602_v6 = vld [vmem:[#allocation9 + $0xb18] sm:$0xff] }
 0x4e7   :  { %7945 = vmatprep.subr.bf16.mxu1 %v9591_v39  ;;  %v4606_v39 = vld [vmem:[#allocation9 + $0xb38] sm:$0xff]  ;;  %v9645_v36 = vcombine.high %v4601_v35, %v4605_v38  ;;  %v9644_v16 = vcombine.low %v4601_v35, %v4605_v38 }
 0x4e8   :  { %v9647_v42 = vcombine.high %v4602_v6, %v4606_v39  ;;  %v9646_v54 = vcombine.low %v4602_v6, %v4606_v39 }
 0x4e9   :  { %7782 = vmatpush1.bf16.msra.mxu0 %v9588_v49  ;;  %v4609_v49 = vld [vmem:[#allocation9 + $0xb50] sm:$0xff] }
 0x4ea   :  { %7946 = vmatpush1.bf16.msra.mxu1 %v9590_v15  ;;  %7783 = vmatprep.subr.bf16.mxu0 %v9597_v22  ;;  %v4613_v15 = vld [vmem:[#allocation9 + $0xb70] sm:$0xff]  ;;  %v4610_v22 = vld [vmem:[#allocation9 + $0xb58] sm:$0xff] }
 0x4eb   :  { %7947 = vmatprep.subr.bf16.mxu1 %v9599_v2  ;;  %v4614_v2 = vld [vmem:[#allocation9 + $0xb78] sm:$0xff]  ;;  %v9653_v55 = vcombine.high %v4609_v49, %v4613_v15  ;;  %v9652_v4 = vcombine.low %v4609_v49, %v4613_v15 }
 0x4ec   :  { %v9655_v58 = vcombine.high %v4610_v22, %v4614_v2  ;;  %v9654_v8 = vcombine.low %v4610_v22, %v4614_v2  ;;  %v4665_v2 = vld [vmem:[#allocation9 + $0xd10] sm:$0xff] }
 0x4ed   :  { %7784 = vmatpush1.bf16.msra.mxu0 %v9596_v50  ;;  %v4617_v50 = vld [vmem:[#allocation9 + $0xb90] sm:$0xff] }
 0x4ee   :  { %7948 = vmatpush1.bf16.msra.mxu1 %v9598_v5  ;;  %7785 = vmatprep.subr.bf16.mxu0 %v9605_v63  ;;  %v4621_v5 = vld [vmem:[#allocation9 + $0xbb0] sm:$0xff]  ;;  %v4618_v63 = vld [vmem:[#allocation9 + $0xb98] sm:$0xff] }
 0x4ef   :  { %7949 = vmatprep.subr.bf16.mxu1 %v9607_v52  ;;  %v4622_v52 = vld [vmem:[#allocation9 + $0xbb8] sm:$0xff]  ;;  %v9661_v9 = vcombine.high %v4617_v50, %v4621_v5  ;;  %v9660_v19 = vcombine.low %v4617_v50, %v4621_v5 }
 0x4f0   :  { %v9663_v10 = vcombine.high %v4618_v63, %v4622_v52  ;;  %v9662_v20 = vcombine.low %v4618_v63, %v4622_v52  ;;  %v4673_v63 = vld [vmem:[#allocation9 + $0xd50] sm:$0xff] }
 0x4f1   :  { %7786 = vmatpush1.bf16.msra.mxu0 %v9604_v12  ;;  %v4625_v12 = vld [vmem:[#allocation9 + $0xbd0] sm:$0xff] }
 0x4f2   :  { %7950 = vmatpush1.bf16.msra.mxu1 %v9606_v13  ;;  %7787 = vmatprep.subr.bf16.mxu0 %v9613_v17  ;;  %v4629_v13 = vld [vmem:[#allocation9 + $0xbf0] sm:$0xff]  ;;  %v4626_v17 = vld [vmem:[#allocation9 + $0xbd8] sm:$0xff] }
 0x4f3   :  { %7951 = vmatprep.subr.bf16.mxu1 %v9615_v18  ;;  %v4630_v18 = vld [vmem:[#allocation9 + $0xbf8] sm:$0xff]  ;;  %v9669_v21 = vcombine.high %v4625_v12, %v4629_v13  ;;  %v9668_v27 = vcombine.low %v4625_v12, %v4629_v13  ;;  %v4677_v52 = vld [vmem:[#allocation9 + $0xd70] sm:$0xff] }
 0x4f4   :  { %v9671_v23 = vcombine.high %v4626_v17, %v4630_v18  ;;  %v9670_v61 = vcombine.low %v4626_v17, %v4630_v18  ;;  %v9717_v12 = vcombine.high %v4673_v63, %v4677_v52  ;;  %v4681_v17 = vld [vmem:[#allocation9 + $0xd90] sm:$0xff] }
 0x4f5   :  { %7788 = vmatpush1.bf16.msra.mxu0 %v9612_v56  ;;  %v4633_v56 = vld [vmem:[#allocation9 + $0xc10] sm:$0xff] }
 0x4f6   :  { %7952 = vmatpush1.bf16.msra.mxu1 %v9614_v24  ;;  %7789 = vmatprep.subr.bf16.mxu0 %v9621_v25  ;;  %v4637_v24 = vld [vmem:[#allocation9 + $0xc30] sm:$0xff]  ;;  %v4634_v25 = vld [vmem:[#allocation9 + $0xc18] sm:$0xff] }
 0x4f7   :  { %7953 = vmatprep.subr.bf16.mxu1 %v9623_v26  ;;  %v4638_v26 = vld [vmem:[#allocation9 + $0xc38] sm:$0xff]  ;;  %v9677_v59 = vcombine.high %v4633_v56, %v4637_v24  ;;  %v4685_v18 = vld [vmem:[#allocation9 + $0xdb0] sm:$0xff] }
 0x4f8   :  { %v9679_v1 = vcombine.high %v4634_v25, %v4638_v26  ;;  %v9678_v30 = vcombine.low %v4634_v25, %v4638_v26 }
 0x4f9   :  { %7790 = vmatpush1.bf16.msra.mxu0 %v9620_v28  ;;  %v4641_v28 = vld [vmem:[#allocation9 + $0xc50] sm:$0xff] }
 0x4fa   :  { %7954 = vmatpush1.bf16.msra.mxu1 %v9622_v29  ;;  %7791 = vmatprep.subr.bf16.mxu0 %v9629_v37  ;;  %v4645_v29 = vld [vmem:[#allocation9 + $0xc70] sm:$0xff]  ;;  %v9676_v37 = vcombine.low %v4633_v56, %v4637_v24  ;;  %v9725_v56 = vcombine.high %v4681_v17, %v4685_v18 }
 0x4fb   :  { %7955 = vmatprep.subr.bf16.mxu1 %v9631_v7  ;;  %v4642_v7 = vld [vmem:[#allocation9 + $0xc58] sm:$0xff]  ;;  %v9685_v3 = vcombine.high %v4641_v28, %v4645_v29  ;;  %v9684_v35 = vcombine.low %v4641_v28, %v4645_v29 }
 0x4fc   :  { %v9686_v38 = vcombine.low %v4642_v7, %v4646_v44  ;;  %v4690_v28 = vld [vmem:[#allocation9 + $0xdd8] sm:$0xff] }
 0x4fd   :  { %7792 = vmatpush1.bf16.msra.mxu0 %v9628_v31  ;;  %v4653_v31 = vld [vmem:[#allocation9 + $0xcb0] sm:$0xff]  ;;  %v4694_v29 = vld [vmem:[#allocation9 + $0xdf8] sm:$0xff] }
 0x4fe   :  { %7956 = vmatpush1.bf16.msra.mxu1 %v9630_v33  ;;  %7793 = vmatprep.subr.bf16.mxu0 %v9637_v34  ;;  %v9687_v33 = vcombine.high %v4642_v7, %v4646_v44  ;;  %v4650_v34 = vld [vmem:[#allocation9 + $0xc98] sm:$0xff]  ;;  %v9693_v6 = vcombine.high %v4649_v32, %v4653_v31  ;;  %v9692_v49 = vcombine.low %v4649_v32, %v4653_v31 }
 0x4ff   :  { %7957 = vmatprep.subr.bf16.mxu1 %v9639_v14  ;;  %v4654_v14 = vld [vmem:[#allocation9 + $0xcb8] sm:$0xff]  ;;  %v9724_v44 = vcombine.low %v4681_v17, %v4685_v18 }
 0x500   :  { %v9695_v39 = vcombine.high %v4650_v34, %v4654_v14 }
 0x501   :  { %7794 = vmatpush1.bf16.msra.mxu0 %v9636_v57  ;;  %v4657_v57 = vld [vmem:[#allocation9 + $0xcd0] sm:$0xff] }
 0x502   :  { %7958 = vmatpush1.bf16.msra.mxu1 %v9638_v41  ;;  %7795 = vmatprep.subr.bf16.mxu0 %v9645_v36  ;;  %v4661_v41 = vld [vmem:[#allocation9 + $0xcf0] sm:$0xff]  ;;  %v4658_v36 = vld [vmem:[#allocation9 + $0xcd8] sm:$0xff] }
 0x503   :  { %7959 = vmatprep.subr.bf16.mxu1 %v9647_v42  ;;  %v4662_v42 = vld [vmem:[#allocation9 + $0xcf8] sm:$0xff]  ;;  %v9701_v15 = vcombine.high %v4657_v57, %v4661_v41 }
 0x504   :  { %v9703_v22 = vcombine.high %v4658_v36, %v4662_v42 }
 0x505   :  { %7796 = vmatpush1.bf16.msra.mxu0 %v9644_v16  ;;  %v4669_v16 = vld [vmem:[#allocation9 + $0xd30] sm:$0xff] }
 0x506   :  { %7960 = vmatpush1.bf16.msra.mxu1 %v9646_v54  ;;  %7797 = vmatprep.subr.bf16.mxu0 %v9653_v55  ;;  %v4666_v54 = vld [vmem:[#allocation9 + $0xd18] sm:$0xff]  ;;  %v9709_v50 = vcombine.high %v4665_v2, %v4669_v16 }
 0x507   :  { %7961 = vmatprep.subr.bf16.mxu1 %v9655_v58  ;;  %v4670_v55 = vld [vmem:[#allocation9 + $0xd38] sm:$0xff]  ;;  %v9702_v58 = vcombine.low %v4658_v36, %v4662_v42  ;;  %v4705_v36 = vld [vmem:[#allocation9 + $0xe50] sm:$0xff] }
 0x508   :  { %v9711_v5 = vcombine.high %v4666_v54, %v4670_v55  ;;  %v4709_v42 = vld [vmem:[#allocation9 + $0xe70] sm:$0xff] }
 0x509   :  { %7798 = vmatpush1.bf16.msra.mxu0 %v9652_v4  ;;  %v4674_v4 = vld [vmem:[#allocation9 + $0xd58] sm:$0xff] }
 0x50a   :  { %7962 = vmatpush1.bf16.msra.mxu1 %v9654_v8  ;;  %7799 = vmatprep.subr.bf16.mxu0 %v9661_v9  ;;  %v4678_v8 = vld [vmem:[#allocation9 + $0xd78] sm:$0xff]  ;;  %v9708_v9 = vcombine.low %v4665_v2, %v4669_v16  ;;  %v9749_v2 = vcombine.high %v4705_v36, %v4709_v42 }
 0x50b   :  { %7963 = vmatprep.subr.bf16.mxu1 %v9663_v10  ;;  %v9710_v10 = vcombine.low %v4666_v54, %v4670_v55  ;;  %v9719_v13 = vcombine.high %v4674_v4, %v4678_v8  ;;  %v4713_v54 = vld [vmem:[#allocation9 + $0xe90] sm:$0xff] }
 0x50c   :  { %v4717_v55 = vld [vmem:[#allocation9 + $0xeb0] sm:$0xff] }
 0x50d   :  { %7800 = vmatpush1.bf16.msra.mxu0 %v9660_v19  ;;  %v4682_v19 = vld [vmem:[#allocation9 + $0xd98] sm:$0xff] }
 0x50e   :  { %7964 = vmatpush1.bf16.msra.mxu1 %v9662_v20  ;;  %7801 = vmatprep.subr.bf16.mxu0 %v9669_v21  ;;  %v4686_v20 = vld [vmem:[#allocation9 + $0xdb8] sm:$0xff]  ;;  %v9716_v21 = vcombine.low %v4673_v63, %v4677_v52  ;;  %v9757_v63 = vcombine.high %v4713_v54, %v4717_v55 }
 0x50f   :  { %7965 = vmatprep.subr.bf16.mxu1 %v9671_v23  ;;  %v9718_v23 = vcombine.low %v4674_v4, %v4678_v8  ;;  %v9727_v26 = vcombine.high %v4682_v19, %v4686_v20  ;;  %v9726_v32 = vcombine.low %v4682_v19, %v4686_v20  ;;  %v4721_v4 = vld [vmem:[#allocation9 + $0xed0] sm:$0xff] }
 0x510   :  { %v4725_v8 = vld [vmem:[#allocation9 + $0xef0] sm:$0xff] }
 0x511   :  { %7802 = vmatpush1.bf16.msra.mxu0 %v9668_v27  ;;  %v4689_v27 = vld [vmem:[#allocation9 + $0xdd0] sm:$0xff]  ;;  %v9765_v17 = vcombine.high %v4721_v4, %v4725_v8 }
 0x512   :  { %7966 = vmatpush1.bf16.msra.mxu1 %v9670_v61  ;;  %7812 = vmatprep.subr.bf16.mxu0 %v9677_v59  ;;  %v4693_v61 = vld [vmem:[#allocation9 + $0xdf0] sm:$0xff] }
 0x513   :  { %7976 = vmatprep.subr.bf16.mxu1 %v9679_v1  ;;  %v9733_v31 = vcombine.high %v4689_v27, %v4693_v61  ;;  %v4729_v19 = vld [vmem:[#allocation9 + $0xf10] sm:$0xff] }
 0x514   :  { %7804 = vmatmul.mubr.bf16.vlgmr.msra.gmra.mrb[20].mxu0 %v10686_v60  ;;  %v4733_v20 = vld [vmem:[#allocation9 + $0xf30] sm:$0xff] }
 0x515   :  { %7968 = vmatmul.mubr.bf16.vlgmr.msra.gmra.mrb[20].mxu1 %v10686_v60  ;;  %7813 = vmatpush1.bf16.msra.mxu0 %v9676_v37  ;;  %v9694_v60 = vcombine.low %v4650_v34, %v4654_v14  ;;  %v4697_v34 = vld [vmem:[#allocation9 + $0xe10] sm:$0xff] }
 0x516   :  { %7844 = vmatprep.mubr.bf16.mxu0 %v10690_v46  ;;  %7977 = vmatpush1.bf16.msra.mxu1 %v9678_v30  ;;  %v4701_v14 = vld [vmem:[#allocation9 + $0xe30] sm:$0xff] }
 0x517   :  { %8008 = vmatprep.mubr.bf16.mxu1 %v10690_v46  ;;  %7814 = vmatprep.subr.bf16.mxu0 %v9685_v3  ;;  %v9700_v46 = vcombine.low %v4657_v57, %v4661_v41  ;;  %v9741_v57 = vcombine.high %v4697_v34, %v4701_v14 }
 0x518   :  { %7978 = vmatprep.subr.bf16.mxu1 %v9687_v33  ;;  %v9735_v33 = vcombine.high %v4690_v28, %v4694_v29 }
 0x519   :  { %7815 = vmatpush1.bf16.msra.mxu0 %v9684_v35  ;;  %v4698_v35 = vld [vmem:[#allocation9 + $0xe18] sm:$0xff] }
 0x51a   :  { %7979 = vmatpush1.bf16.msra.mxu1 %v9686_v38  ;;  %7816 = vmatprep.subr.bf16.mxu0 %v9693_v6  ;;  %v4702_v38 = vld [vmem:[#allocation9 + $0xe38] sm:$0xff]  ;;  %v9732_v6 = vcombine.low %v4689_v27, %v4693_v61  ;;  %v9773_v27 = vcombine.high %v4729_v19, %v4733_v20 }
 0x51b   :  { %7980 = vmatprep.subr.bf16.mxu1 %v9695_v39  ;;  %v9734_v39 = vcombine.low %v4690_v28, %v4694_v29  ;;  %v9743_v41 = vcombine.high %v4698_v35, %v4702_v38  ;;  %v4737_v28 = vld [vmem:[#allocation9 + $0xf50] sm:$0xff] }
 0x51c   :  { %v4741_v29 = vld [vmem:[#allocation9 + $0xf70] sm:$0xff] }
 0x51d   :  { %7817 = vmatpush1.bf16.msra.mxu0 %v9692_v49  ;;  %v4706_v49 = vld [vmem:[#allocation9 + $0xe58] sm:$0xff] }
 0x51e   :  { %7981 = vmatpush1.bf16.msra.mxu1 %v9694_v60  ;;  %7818 = vmatprep.subr.bf16.mxu0 %v9701_v15  ;;  %v4710_v60 = vld [vmem:[#allocation9 + $0xe78] sm:$0xff]  ;;  %v9740_v15 = vcombine.low %v4697_v34, %v4701_v14 }
 0x51f   :  { %7982 = vmatprep.subr.bf16.mxu1 %v9703_v22  ;;  %v9742_v22 = vcombine.low %v4698_v35, %v4702_v38  ;;  %v9751_v16 = vcombine.high %v4706_v49, %v4710_v60  ;;  %v4746_v34 = vld [vmem:[#allocation9 + $0xf98] sm:$0xff]  ;;  %v10725_v35 = vld [vmem:[#allocation10] sm:$0xff]  ;;  %v9780_v38 = vcombine.low %v4737_v28, %v4741_v29 }
 0x520   :  { %v4750_v14 = vld [vmem:[#allocation9 + $0xfb8] sm:$0xff] }
 0x521   :  { %7819 = vmatpush1.bf16.msra.mxu0 %v9700_v46  ;;  %v4714_v46 = vld [vmem:[#allocation9 + $0xe98] sm:$0xff] }
 0x522   :  { %7983 = vmatpush1.bf16.msra.mxu1 %v9702_v58  ;;  %7820 = vmatprep.subr.bf16.mxu0 %v9709_v50  ;;  %v4718_v58 = vld [vmem:[#allocation9 + $0xeb8] sm:$0xff]  ;;  %v9748_v50 = vcombine.low %v4705_v36, %v4709_v42  ;;  %v4757_v36 = vld [vmem:[#allocation9 + $0xff0] sm:$0xff]  ;;  %v4768_v42 = vrot.slane %v10725_v35, %v10538_v47 }
 0x523   :  { %7984 = vmatprep.subr.bf16.mxu1 %v9711_v5  ;;  %v9750_v5 = vcombine.low %v4706_v49, %v4710_v60  ;;  %v9759_v52 = vcombine.high %v4714_v46, %v4718_v58  ;;  %v4754_v49 = vld [vmem:[#allocation9 + $0xfd8] sm:$0xff] }
 0x524   :  { %v4758_v60 = vld [vmem:[#allocation9 + $0xff8] sm:$0xff] }
 0x525   :  { %7821 = vmatpush1.bf16.msra.mxu0 %v9708_v9  ;;  %v4722_v9 = vld [vmem:[#allocation9 + $0xed8] sm:$0xff]  ;;  %v9798_v47 = vcombine.low %v4754_v49, %v4758_v60 }
 0x526   :  { %7985 = vmatpush1.bf16.msra.mxu1 %v9710_v10  ;;  %7822 = vmatprep.subr.bf16.mxu0 %v9717_v12  ;;  %v4726_v10 = vld [vmem:[#allocation9 + $0xef8] sm:$0xff]  ;;  %v9756_v12 = vcombine.low %v4713_v54, %v4717_v55  ;;  %v9799_v54 = vcombine.high %v4754_v49, %v4758_v60  ;;  %v10113_v49 = vld [vmem:[#allocation12 + $0x180] sm:$0xff]   ;;  %v10114_v60 = vld [vmem:[#allocation12 + $0x148] sm:$0xff]  }
 0x527   :  { %v10717_v24 = vpop.f32.mrb[16].mxu0  ;;  %v10719_v25 = vpop.f32.mrb[16].mxu1  ;;  %7986 = vmatprep.subr.bf16.mxu1 %v9719_v13  ;;  %v9758_v13 = vcombine.low %v4714_v46, %v4718_v58  ;;  %v9767_v18 = vcombine.high %v4722_v9, %v4726_v10 }
 0x528   :  { %v10721_v59 = vpop.f32.mrb[17].mxu0  ;;  %v10723_v1 = vpop.f32.mrb[17].mxu1 }
 0x529   :  { %v7522_v37 = vpop.f32.mrb[18].mxu0  ;;  %v7686_v7 = vpop.f32.mrb[18].mxu1  ;;  %7823 = vmatpush1.bf16.msra.mxu0 %v9716_v21  ;;  %v4730_v21 = vld [vmem:[#allocation9 + $0xf18] sm:$0xff]  ;;  %v9962_v55 = vadd.f32 %v10721_v59, %v4768_v42 }
 0x52a   :  { %7987 = vmatpush1.bf16.msra.mxu1 %v9718_v23  ;;  %v7523_v30 = vpop.f32.mrb[19].mxu0  ;;  %v7687_v3 = vpop.f32.mrb[19].mxu1  ;;  %7824 = vmatprep.subr.bf16.mxu0 %v9725_v56  ;;  %v4734_v23 = vld [vmem:[#allocation9 + $0xf38] sm:$0xff]  ;;  %v9764_v56 = vcombine.low %v4721_v4, %v4725_v8  ;;  %v10081_v4 = vld [vmem:[#allocation12 + $0x80] sm:$0xff]   ;;  %v10082_v8 = vld [vmem:[#allocation12 + $0x48] sm:$0xff]  }
 0x52b   :  { %7988 = vmatprep.subr.bf16.mxu1 %v9727_v26  ;;  %v9766_v26 = vcombine.low %v4722_v9, %v4726_v10  ;;  %v9775_v61 = vcombine.high %v4730_v21, %v4734_v23  ;;  %v4738_v37 = vld [vmem:[#allocation9 + $0xf58] sm:$0xff]  ;;  %v9774_v30 = vcombine.low %v4730_v21, %v4734_v23  ;;  %v9781_v3 = vcombine.high %v4737_v28, %v4741_v29  ;;  %v10084_v10 = vld [vmem:[#allocation12 + $0x8] sm:$0xff]   ;;  %v10091_v21 = vld [vmem:[#allocation12 + $0xd8] sm:$0xff]  }
 0x52c   :  { %v4742_v7 = vld [vmem:[#allocation9 + $0xf78] sm:$0xff]  ;;  %v10093_v23 = vld [vmem:[#allocation12 + $0x98] sm:$0xff]   ;;  %v10098_v28 = vld [vmem:[#allocation12 + $0x68] sm:$0xff]  }
 0x52d   :  { %7825 = vmatpush1.bf16.msra.mxu0 %v9724_v44  ;;  %v9772_v44 = vcombine.low %v4729_v19, %v4733_v20  ;;  %v10089_v19 = vld [vmem:[#allocation12 + $0x90] sm:$0xff]   ;;  %v10090_v20 = vld [vmem:[#allocation12 + $0x58] sm:$0xff]   ;;  %v10099_v29 = vld [vmem:[#allocation12 + $0xe8] sm:$0xff]  }
 0x52e   :  { %7989 = vmatpush1.bf16.msra.mxu1 %v9726_v32  ;;  %7826 = vmatprep.subr.bf16.mxu0 %v9733_v31  ;;  %v9783_v32 = vcombine.high %v4738_v37, %v4742_v7  ;;  %v4745_v31 = vld [vmem:[#allocation9 + $0xf90] sm:$0xff] }
 0x52f   :  { %7990 = vmatprep.subr.bf16.mxu1 %v9735_v33  ;;  %v4749_v33 = vld [vmem:[#allocation9 + $0xfb0] sm:$0xff] }
 0x531   :  { %7827 = vmatpush1.bf16.msra.mxu0 %v9732_v6  ;;  %v9782_v6 = vcombine.low %v4738_v37, %v4742_v7  ;;  %v10100_v37 = vld [vmem:[#allocation12 + $0x28] sm:$0xff]   ;;  %v4764_v7 = vrot.slane %v10725_v35, %v10533_v45  ;;  %v10107_v45 = vld [vmem:[#allocation12 + $0xf8] sm:$0xff]  }
 0x532   :  { %7991 = vmatpush1.bf16.msra.mxu1 %v9734_v39  ;;  %7828 = vmatprep.subr.bf16.mxu0 %v9741_v57  ;;  %v9789_v39 = vcombine.high %v4745_v31, %v4749_v33  ;;  %v9791_v57 = vcombine.high %v4746_v34, %v4750_v14 }
 0x533   :  { %7992 = vmatprep.subr.bf16.mxu1 %v9743_v41  ;;  %v4753_v41 = vld [vmem:[#allocation9 + $0xfd0] sm:$0xff] }
 0x534   :  { %v9796_v58 = vcombine.low %v4753_v41, %v4757_v36 }
 0x535   :  { %7829 = vmatpush1.bf16.msra.mxu0 %v9740_v15  ;;  %v4776_v15 = vrot.slane %v10725_v35, %v10541_v48  ;;  %v10079_v48 = vld [vmem:[#allocation12 + $0xc0] sm:$0xff]  }
 0x536   :  { %7993 = vmatpush1.bf16.msra.mxu1 %v9742_v22  ;;  %7830 = vmatprep.subr.bf16.mxu0 %v9749_v2  ;;  %v9788_v22 = vcombine.low %v4745_v31, %v4749_v33  ;;  %v9790_v2 = vcombine.low %v4746_v34, %v4750_v14  ;;  %v10104_v31 = vld [vmem:[#allocation12 + $0x30] sm:$0xff]   ;;  %v9961_v33 = vadd.f32 %v10717_v24, %v4764_v7  ;;  %v10106_v14 = vld [vmem:[#allocation12 + $0x78] sm:$0xff]   ;;  %v10112_v24 = vld [vmem:[#allocation12 + $0x100] sm:$0xff]  }
 0x537   :  { %7994 = vmatprep.subr.bf16.mxu1 %v9751_v16  ;;  %v9797_v16 = vcombine.high %v4753_v41, %v4757_v36  ;;  %v9964_v46 = vadd.f32 %v10723_v1, %v4776_v15  ;;  %v10083_v1 = vld [vmem:[#allocation12 + $0xc8] sm:$0xff]   ;;  %v10105_v34 = vld [vmem:[#allocation12 + $0xb0] sm:$0xff]   ;;  %v10111_v36 = vld [vmem:[#allocation12 + $0x1c0] sm:$0xff]  }
 0x538   :  { %v10115_v15 = vld [vmem:[#allocation12 + $0x1c8] sm:$0xff]  }
 0x539   :  { %7831 = vmatpush1.bf16.msra.mxu0 %v9748_v50  ;;  %v10078_v50 = vld [vmem:[#allocation12 + $0x40] sm:$0xff]  }
 0x53a   :  { %7995 = vmatpush1.bf16.msra.mxu1 %v9750_v5  ;;  %7832 = vmatprep.subr.bf16.mxu0 %v9757_v63  ;;  %v8018_v5 = vmax.f32 %v9962_v55, 0.0  ;;  %v8020_v63 = vmax.f32 %v9964_v46, 0.0  ;;  %v10120_v55 = vld [vmem:[#allocation12 + $0x110] sm:$0xff]  }
 0x53b   :  { %7996 = vmatprep.subr.bf16.mxu1 %v9759_v52  ;;  %v10080_v52 = vld [vmem:[#allocation12] sm:$0xff]   ;;  %v10121_v46 = vld [vmem:[#allocation12 + $0x190] sm:$0xff]  }
 0x53c   :  { %v8026_v59 = vpack.c.bf16 %v8018_v5, %v8018_v5  ;;  %v8028_v9 = vpack.c.bf16 %v8020_v63, %v8020_v63  ;;  %v10126_v5 = vld [vmem:[#allocation12 + $0x160] sm:$0xff]  }
 0x53d   :  { %7833 = vmatpush1.bf16.msra.mxu0 %v9756_v12  ;;  %v10085_v12 = vld [vmem:[#allocation12 + $0x88] sm:$0xff]   ;;  %v10127_v63 = vld [vmem:[#allocation12 + $0x1e0] sm:$0xff]  }
 0x53e   :  { %7997 = vmatpush1.bf16.msra.mxu1 %v9758_v13  ;;  %7834 = vmatprep.subr.bf16.mxu0 %v9765_v17  ;;  %v10086_v13 = vld [vmem:[#allocation12 + $0x50] sm:$0xff]  }
 0x53f   :  { %7998 = vmatprep.subr.bf16.mxu1 %v9767_v18  ;;  %v10087_v17 = vld [vmem:[#allocation12 + $0xd0] sm:$0xff]  }
 0x540   :  { %v10088_v18 = vld [vmem:[#allocation12 + $0x10] sm:$0xff]  }
 0x541   :  { %7835 = vmatpush1.bf16.msra.mxu0 %v9764_v56  ;;  %v10094_v56 = vld [vmem:[#allocation12 + $0x60] sm:$0xff]  }
 0x542   :  { %7999 = vmatpush1.bf16.msra.mxu1 %v9766_v26  ;;  %7836 = vmatprep.subr.bf16.mxu0 %v9773_v27  ;;  %v10095_v26 = vld [vmem:[#allocation12 + $0xe0] sm:$0xff]  }
 0x543   :  { %8000 = vmatprep.subr.bf16.mxu1 %v9775_v61  ;;  %v10096_v27 = vld [vmem:[#allocation12 + $0x20] sm:$0xff]  }
 0x544   :  { %v10097_v61 = vld [vmem:[#allocation12 + $0xa0] sm:$0xff]  }
 0x545   :  { %7837 = vmatpush1.bf16.msra.mxu0 %v9772_v44  ;;  %v10101_v44 = vld [vmem:[#allocation12 + $0xa8] sm:$0xff]  }
 0x546   :  { %8001 = vmatpush1.bf16.msra.mxu1 %v9774_v30  ;;  %7838 = vmatprep.subr.bf16.mxu0 %v9781_v3  ;;  %v10102_v30 = vld [vmem:[#allocation12 + $0x70] sm:$0xff]   ;;  %v4772_v3 = vrot.slane %v10725_v35, %v10568_v62  ;;  %v10109_v62 = vld [vmem:[#allocation12 + $0xb8] sm:$0xff]  }
 0x547   :  { %8002 = vmatprep.subr.bf16.mxu1 %v9783_v32  ;;  %v10103_v32 = vld [vmem:[#allocation12 + $0xf0] sm:$0xff]  }
 0x549   :  { %7839 = vmatpush1.bf16.msra.mxu0 %v9780_v38  ;;  %v9963_v38 = vadd.f32 %v10719_v25, %v4772_v3 }
 0x54a   :  { %8003 = vmatpush1.bf16.msra.mxu1 %v9782_v6  ;;  %7840 = vmatprep.subr.bf16.mxu0 %v9789_v39  ;;  %v10108_v6 = vld [vmem:[#allocation12 + $0x38] sm:$0xff]   ;;  %v8017_v39 = vmax.f32 %v9961_v33, 0.0 }
 0x54b   :  { %8004 = vmatprep.subr.bf16.mxu1 %v9791_v57  ;;  %v10110_v57 = vld [vmem:[#allocation12 + $0x140] sm:$0xff]   ;;  %v8019_v41 = vmax.f32 %v9963_v38, 0.0 }
 0x54c   :  { %v8025_v42 = vpack.c.bf16 %v8017_v39, %v8017_v39  ;;  %v9800_v39 = vld [vmem:[#allocation13] ss:$0 sm:$0xff] }
 0x54d   :  { %7841 = vmatpush1.bf16.msra.mxu0 %v9788_v22  ;;  %v8027_v25 = vpack.c.bf16 %v8019_v41, %v8019_v41  ;;  %v10116_v22 = vld [vmem:[#allocation12 + $0x108] sm:$0xff]  }
 0x54e   :  { %8005 = vmatpush1.bf16.msra.mxu1 %v9790_v2  ;;  %7842 = vmatprep.subr.bf16.mxu0 %v9797_v16  ;;  %v10117_v2 = vld [vmem:[#allocation12 + $0x188] sm:$0xff]   ;;  %v10118_v16 = vld [vmem:[#allocation12 + $0x150] sm:$0xff]  }
 0x54f   :  { %8006 = vmatprep.subr.bf16.mxu1 %v9799_v54  ;;  %v10119_v54 = vld [vmem:[#allocation12 + $0x1d0] sm:$0xff]  }
 0x551   :  { %7843 = vmatpush1.bf16.msra.mxu0 %v9796_v58  ;;  %v10122_v58 = vld [vmem:[#allocation12 + $0x158] sm:$0xff]  }
 0x552   :  { %8007 = vmatpush1.bf16.msra.mxu1 %v9798_v47  ;;  %9865 = vmatprep.subr.bf16.mxu0 %v10078_v50  ;;  %v10123_v47 = vld [vmem:[#allocation12 + $0x1d8] sm:$0xff]  }
 0x553   :  { %9887 = vmatprep.subr.bf16.mxu1 %v10079_v48  ;;  %v10124_v50 = vld [vmem:[#allocation12 + $0x118] sm:$0xff]  }
 0x554   :  { %7845 = vmatmul.mubr.bf16.vlgmr.msra.gmra.mrb[20].mxu0 %v10699_v51  ;;  %v10125_v48 = vld [vmem:[#allocation12 + $0x198] sm:$0xff]  }
 0x555   :  { %8009 = vmatmul.mubr.bf16.vlgmr.msra.gmra.mrb[20].mxu1 %v10699_v51  ;;  %9866 = vmatpush3.bf16.msra.mxu0 %v10080_v52  ;;  %v10092_v51 = vld [vmem:[#allocation12 + $0x18] sm:$0xff]   ;;  %v10128_v52 = vld [vmem:[#allocation12 + $0x120] sm:$0xff]  }
 0x556   :  { %8584 = vmatprep.mubr.bf16.mxu0 %v8026_v59  ;;  %9888 = vmatpush3.bf16.msra.mxu1 %v10081_v4  ;;  %v10129_v4 = vld [vmem:[#allocation12 + $0x1a0] sm:$0xff]   ;;  %v10131_v59 = vld [vmem:[#allocation12 + $0x1e8] sm:$0xff]  }
 0x557   :  { %8624 = vmatprep.mubr.bf16.mxu1 %v8028_v9  ;;  %9867 = vmatprep.subr.bf16.mxu0 %v10082_v8  ;;  %v10130_v8 = vld [vmem:[#allocation12 + $0x168] sm:$0xff]  }
 0x558   :  { %9889 = vmatprep.subr.bf16.mxu1 %v10083_v1  ;;  %v10132_v1 = vld [vmem:[#allocation12 + $0x128] sm:$0xff]  }
 0x559   :  { %9868 = vmatpush3.bf16.msra.mxu0 %v10084_v10  ;;  %v10133_v9 = vld [vmem:[#allocation12 + $0x1a8] sm:$0xff]   ;;  %v10134_v10 = vld [vmem:[#allocation12 + $0x170] sm:$0xff]  }
 0x55a   :  { %9890 = vmatpush3.bf16.msra.mxu1 %v10085_v12  ;;  %9869 = vmatprep.subr.bf16.mxu0 %v10086_v13  ;;  %v10135_v12 = vld [vmem:[#allocation12 + $0x1f0] sm:$0xff]  }
 0x55b   :  { %9891 = vmatprep.subr.bf16.mxu1 %v10087_v17  ;;  %v10136_v13 = vld [vmem:[#allocation12 + $0x130] sm:$0xff]  }
 0x55c   :  { %v10137_v17 = vld [vmem:[#allocation12 + $0x1b0] sm:$0xff]  }
 0x55d   :  { %9870 = vmatpush3.bf16.msra.mxu0 %v10088_v18  ;;  %v10138_v18 = vld [vmem:[#allocation12 + $0x178] sm:$0xff]  }
 0x55e   :  { %9892 = vmatpush3.bf16.msra.mxu1 %v10089_v19  ;;  %9871 = vmatprep.subr.bf16.mxu0 %v10090_v20  ;;  %v10139_v19 = vld [vmem:[#allocation12 + $0x1f8] sm:$0xff]  }
 0x55f   :  { %9893 = vmatprep.subr.bf16.mxu1 %v10091_v21  ;;  %v10140_v20 = vld [vmem:[#allocation12 + $0x138] sm:$0xff]  }
 0x560   :  { %v10141_v21 = vld [vmem:[#allocation12 + $0x1b8] sm:$0xff]  }
 0x561   :  { %9872 = vmatpush3.bf16.msra.mxu0 %v10092_v51  ;;  %v4780_v51 = vrot.slane %v10725_v35, %v10592_v53 }
 0x562   :  { %9894 = vmatpush3.bf16.msra.mxu1 %v10093_v23  ;;  %9873 = vmatprep.subr.bf16.mxu0 %v10094_v56  ;;  %v4788_v23 = vrot.slane %v10725_v35, %v10612_v40  ;;  %v4784_v56 = vrot.slane %v10725_v35, %v10575_v11 }
 0x563   :  { %9895 = vmatprep.subr.bf16.mxu1 %v10095_v26  ;;  %v4792_v26 = vrot.slane %v10725_v35, %v10595_v0 }
 0x565   :  { %9874 = vmatpush3.bf16.msra.mxu0 %v10096_v27 }
 0x566   :  { %9896 = vmatpush3.bf16.msra.mxu1 %v10097_v61  ;;  %9875 = vmatprep.subr.bf16.mxu0 %v10098_v28 }
 0x567   :  { %9897 = vmatprep.subr.bf16.mxu1 %v10099_v29 }
 0x569   :  { %9876 = vmatpush3.bf16.msra.mxu0 %v10100_v37 }
 0x56a   :  { %9898 = vmatpush3.bf16.msra.mxu1 %v10101_v44  ;;  %9877 = vmatprep.subr.bf16.mxu0 %v10102_v30 }
 0x56b   :  { %9899 = vmatprep.subr.bf16.mxu1 %v10103_v32 }
 0x56d   :  { %9878 = vmatpush3.bf16.msra.mxu0 %v10104_v31 }
 0x56e   :  { %9900 = vmatpush3.bf16.msra.mxu1 %v10105_v34  ;;  %9879 = vmatprep.subr.bf16.mxu0 %v10106_v14 }
 0x56f   :  { %9901 = vmatprep.subr.bf16.mxu1 %v10107_v45 }
 0x571   :  { %9880 = vmatpush3.bf16.msra.mxu0 %v10108_v6 }
 0x572   :  { %9902 = vmatpush3.bf16.msra.mxu1 %v10109_v62  ;;  %9909 = vmatprep.subr.bf16.mxu0 %v10110_v57 }
 0x573   :  { %9931 = vmatprep.subr.bf16.mxu1 %v10111_v36 }
 0x574   :  { %8585 = vmatmul.mubr.bf16.vlgmr.msra.gmra.mrb[24].mxu0 %v8025_v42 }
 0x575   :  { %8625 = vmatmul.mubr.bf16.vlgmr.msra.gmra.mrb[24].mxu1 %v8027_v25  ;;  %9910 = vmatpush3.bf16.msra.mxu0 %v10112_v24 }
 0x576   :  { %9932 = vmatpush3.bf16.msra.mxu1 %v10113_v49  ;;  %9911 = vmatprep.subr.bf16.mxu0 %v10114_v60 }
 0x577   :  { %9933 = vmatprep.subr.bf16.mxu1 %v10115_v15 }
 0x579   :  { %9912 = vmatpush3.bf16.msra.mxu0 %v10116_v22 }
 0x57a   :  { %9934 = vmatpush3.bf16.msra.mxu1 %v10117_v2  ;;  %9913 = vmatprep.subr.bf16.mxu0 %v10118_v16 }
 0x57b   :  { %9935 = vmatprep.subr.bf16.mxu1 %v10119_v54  ;;  %v8714_v54 = vand.u32 127, %v157_v43 }
 0x57d   :  { %9914 = vmatpush3.bf16.msra.mxu0 %v10120_v55  ;;  %vm8715_vm1 = vcmp.lt.s32.totalorder %v8714_v54, 8 }
 0x57e   :  { %9936 = vmatpush3.bf16.msra.mxu1 %v10121_v46  ;;  %9915 = vmatprep.subr.bf16.mxu0 %v10122_v58 }
 0x57f   :  { %9937 = vmatprep.subr.bf16.mxu1 %v10123_v47 }
 0x581   :  { %9916 = vmatpush3.bf16.msra.mxu0 %v10124_v50 }
 0x582   :  { %9938 = vmatpush3.bf16.msra.mxu1 %v10125_v48  ;;  %9917 = vmatprep.subr.bf16.mxu0 %v10126_v5 }
 0x583   :  { %9939 = vmatprep.subr.bf16.mxu1 %v10127_v63 }
 0x585   :  { %9918 = vmatpush3.bf16.msra.mxu0 %v10128_v52 }
 0x586   :  { %9940 = vmatpush3.bf16.msra.mxu1 %v10129_v4  ;;  %9919 = vmatprep.subr.bf16.mxu0 %v10130_v8 }
 0x587   :  { %9941 = vmatprep.subr.bf16.mxu1 %v10131_v59 }
 0x589   :  { %9920 = vmatpush3.bf16.msra.mxu0 %v10132_v1 }
 0x58a   :  { %9942 = vmatpush3.bf16.msra.mxu1 %v10133_v9  ;;  %9921 = vmatprep.subr.bf16.mxu0 %v10134_v10 }
 0x58b   :  { %9943 = vmatprep.subr.bf16.mxu1 %v10135_v12 }
 0x58d   :  { %9922 = vmatpush3.bf16.msra.mxu0 %v10136_v13 }
 0x58e   :  { %9944 = vmatpush3.bf16.msra.mxu1 %v10137_v17  ;;  %9923 = vmatprep.subr.bf16.mxu0 %v10138_v18 }
 0x58f   :  { %9945 = vmatprep.subr.bf16.mxu1 %v10139_v19 }
 0x591   :  { %9924 = vmatpush3.bf16.msra.mxu0 %v10140_v20 }
 0x592   :  { %9946 = vmatpush3.bf16.msra.mxu1 %v10141_v21 }
 0x627   :  { %v7846_v27 = vpop.f32.mrb[20].mxu0 }
 0x628   :  { %v9965_v61 = vadd.f32 %v7846_v27, %v4780_v51  ;;  %v8010_v28 = vpop.f32.mrb[20].mxu1  ;;  %v7848_v29 = vpop.f32.mrb[21].mxu0 }
 0x629   :  { %v9967_v37 = vadd.f32 %v8010_v28, %v4788_v23  ;;  %v9966_v7 = vadd.f32 %v7848_v29, %v4784_v56  ;;  %v8012_v44 = vpop.f32.mrb[21].mxu1  ;;  %v7850_v30 = vpop.f32.mrb[22].mxu0 }
 0x62a   :  { %v8021_v3 = vmax.f32 %v9965_v61, 0.0  ;;  %v9968_v32 = vadd.f32 %v8012_v44, %v4792_v26  ;;  %v8014_v53 = vpop.f32.mrb[22].mxu1  ;;  %v7851_v31 = vpop.f32.mrb[23].mxu0 }
 0x62b   :  { %v8023_v33 = vmax.f32 %v9967_v37, 0.0  ;;  %v8022_v40 = vmax.f32 %v9966_v7, 0.0  ;;  %v8015_v34 = vpop.f32.mrb[23].mxu1 }
 0x62c   :  { %v8024_v14 = vmax.f32 %v9968_v32, 0.0  ;;  %v8029_v38 = vpack.c.bf16 %v8021_v3, %v8021_v3 }
 0x62d   :  { %v8030_v11 = vpack.c.bf16 %v8022_v40, %v8022_v40  ;;  %v8031_v0 = vpack.c.bf16 %v8023_v33, %v8023_v33 }
 0x62e   :  { %v8032_v45 = vpack.c.bf16 %v8024_v14, %v8024_v14 }
 0x62f   :  { %8664 = vmatprep.mubr.bf16.mxu0 %v8030_v11 }
 0x630   :  { %8704 = vmatprep.mubr.bf16.mxu1 %v8032_v45  ;;  %8665 = vmatmul.mubr.bf16.vlgmr.msra.gmra.mrb[28].mxu0 %v8029_v38 }
 0x631   :  { %8705 = vmatmul.mubr.bf16.vlgmr.msra.gmra.mrb[28].mxu1 %v8031_v0 }
 0x647   :  { %v9881_v35 = vpop.f32.mrb[24].mxu0 }
 0x648   :  { %v9903_v6 = vpop.f32.mrb[24].mxu1  ;;  %v9882_v62 = vpop.f32.mrb[25].mxu0 }
 0x649   :  { %v9883_v57 = vadd.f32 %v9882_v62, %v9881_v35  ;;  %v9904_v41 = vpop.f32.mrb[25].mxu1  ;;  %v9884_v36 = vpop.f32.mrb[26].mxu0 }
 0x64a   :  { %v9905_v24 = vadd.f32 %v9904_v41, %v9903_v6  ;;  %v9906_v42 = vpop.f32.mrb[26].mxu1  ;;  %v9885_v49 = vpop.f32.mrb[27].mxu0 }
 0x64b   :  { %v8587_v60 = vadd.f32 %v9883_v57, %v9800_v39  ;;  %v9907_v25 = vpop.f32.mrb[27].mxu1 }
 0x64d   :  { %v8627_v15 = vadd.f32 %v9905_v24, %v8587_v60 }
 0x703   :  { %v9925_v22 = vpop.f32.mrb[28].mxu0 }
 0x704   :  { %v9947_v2 = vpop.f32.mrb[28].mxu1  ;;  %v9926_v16 = vpop.f32.mrb[29].mxu0 }
 0x705   :  { %v9927_v55 = vadd.f32 %v9926_v16, %v9925_v22  ;;  %v9948_v46 = vpop.f32.mrb[29].mxu1  ;;  %v9928_v58 = vpop.f32.mrb[30].mxu0 }
 0x706   :  { %v9949_v47 = vadd.f32 %v9948_v46, %v9947_v2  ;;  %v9950_v50 = vpop.f32.mrb[30].mxu1  ;;  %v9929_v48 = vpop.f32.mrb[31].mxu0 }
 0x707   :  { %v8667_v5 = vadd.f32 %v9927_v55, %v8627_v15  ;;  %v9951_v63 = vpop.f32.mrb[31].mxu1 }
 0x709   :  { %v8707_v52 = vadd.f32 %v9949_v47, %v8667_v5 }
 0x70b   :  { %v8716_v4 = vsel %vm8715_vm1, %v8707_v52, -inf  ;;  %8712 = vst [vmem:[%s10770_s9] sm:$0xff] %v8707_v52 }
 0x70c   :  { %8717 = vmax.xlane.f32.xlu0 %v8716_v4 }
 0x799   :  { %v8718_v8 = vpop.xlane.xlu0 %8717 }
 0x79a   :  { %8720 = vst.msk [vmem:[%s10771_s10] sm:$0xff] %vm8719_vm2, %v8718_v8  ;;  %vm8721_vm3 = vcmp.eq.f32.partialorder %v8716_v4, %v8718_v8 }
 0x79b   :  { %vm8722_vm4 = vmand %vm8721_vm3, %vm8715_vm1 }
 0x79c   :  { %v8723_v43 = vsel %vm8722_vm4, %v8714_v54, 128 }
 0x79d   :  { %v8725_v59 = vshra.s32 %v8723_v43, 16  ;;  %v8724_v9 = vand.u32 65535, %v8723_v43 }
 0x79f   :  { %v8727_v1 = vcvt.s32.f32 %v8725_v59  ;;  %v8726_v12 = vcvt.s32.f32 %v8724_v9 }
 0x7a1   :  { %8728 = vmin.xlane.f32.xlu0 %v8727_v1 }
 0x82e   :  { %v8729_v10 = vpop.xlane.xlu0 %8728 }
 0x82f   :  { %vm8730_vm5 = vcmp.eq.f32.partialorder %v8727_v1, %v8729_v10  ;;  %v8735_v17 = vcvt.f32.s32 %v8729_v10 }
 0x830   :  { %v8731_v13 = vsel %vm8730_vm5, %v8726_v12, inf }
 0x831   :  { %8732 = vmin.xlane.f32.xlu1 %v8731_v13  ;;  %v8736_v19 = vshll.u32 %v8735_v17, 16 }
 0x8be   :  { %v8733_v18 = vpop.xlane.xlu1 %8732 }
 0x8bf   :  { %v8734_v20 = vcvt.f32.s32 %v8733_v18 }
 0x8c1   :  { %v8737_v21 = vadd.s32 %v8736_v19, %v8734_v20 }
 0x8c3   :  { %8738 = vst.msk [vmem:[%s10772_s11] sm:$0xff] %vm8719_vm2, %v8737_v21 }
 0x8c4   :  { %8751 = vsyncpa [#allocation3], 1 }
 0x8c5   :  { %8752 = vsyncpa [#allocation5], 1 }
 0x8c6   :  { %8753 = vsyncpa [#allocation8], 1 }
 0x8c7   :  { %8754 = vsyncpa [#allocation11], 1 }
 0x8c8   :  { %8755 = vsyncpa [#allocation14], 1 }

</bundles_post_ra>
